<compile_context>
chip_gen: v7x
topology: tpu7x:2x2x1
jax: 0.10.0
libtpu: 0.0.40
codegen_flags: <defaults>
</compile_context>

<pallas_src>
import functools

import jax
import jax.numpy as jnp
from jax.experimental import pallas as pl
from jax.experimental.pallas import tpu as pltpu


def _round_up(x, m):
    return (x + m - 1) // m * m


def char_lstm_kernel(x_ref, w_ih_ref, w_hh_ref, b_ref, w_dec_ref, b_dec_ref,
                     logits_ref, hn_ref, cn_ref, buf_ref, *, seq_len, batch_p):
    """All-in-VMEM CharLSTM forward (padded, time-major layout).

    x_ref:      (T*Bp, Hp)   embedded tokens, time-major (layer-0 input), f32
    w_ih_ref:   (L, Hp, 4Hp) input->gates weights, pre-transposed, bf16
    w_hh_ref:   (L, Hp, 4Hp) hidden->gates weights, pre-transposed, bf16
    b_ref:      (L, 1, 4Hp)  combined bias (b_ih + b_hh), f32
    w_dec_ref:  (Hp, Vp)     decode Linear weight, pre-transposed, bf16
    b_dec_ref:  (1, Vp)      decode Linear bias, f32
    logits_ref: (T*Bp, Vp)   f32
    hn_ref:     (L, Bp, Hp)  f32
    cn_ref:     (L, Bp, Hp)  f32
    buf_ref:    (T*Bp, Hp)   f32 scratch holding the current layer's outputs
    """
    T, Bp = seq_len, batch_p
    Hp = x_ref.shape[-1]
    L = w_ih_ref.shape[0]
    cdtype = w_ih_ref.dtype   # MXU operand dtype (bf16); accumulation stays f32.

    for l in range(L):
        w_ih = w_ih_ref[l]                       # (Hp, 4Hp)
        w_hh = w_hh_ref[l]                       # (Hp, 4Hp)
        b = b_ref[l]                             # (1, 4Hp)

        # ---- hoisted input projection: one MXU matmul over the whole sequence ----
        xs = x_ref[...] if l == 0 else buf_ref[...]            # (T*Bp, Hp) f32
        gx = jnp.dot(xs.astype(cdtype), w_ih,
                     preferred_element_type=jnp.float32) + b   # (T*Bp, 4Hp) f32

        h = jnp.zeros((Bp, Hp), jnp.float32)
        c = jnp.zeros((Bp, Hp), jnp.float32)
        # T is a small compile-time constant -> static unroll.
        # TODO(synk): switch to lax.fori_loop carrying (h, c) for large T (>8).
        for t in range(T):
            gates = gx[t * Bp:(t + 1) * Bp, :] + jnp.dot(
                h.astype(cdtype), w_hh, preferred_element_type=jnp.float32)  # (Bp, 4Hp)
            # PyTorch gate order i, f, g, o; Hp-wide slices are full 128-lane tiles.
            i_g = jax.nn.sigmoid(gates[:, 0 * Hp:1 * Hp])
            f_g = jax.nn.sigmoid(gates[:, 1 * Hp:2 * Hp])
            g_g = jnp.tanh(gates[:, 2 * Hp:3 * Hp])
            o_g = jax.nn.sigmoid(gates[:, 3 * Hp:4 * Hp])
            c = f_g * c + i_g * g_g
            h = o_g * jnp.tanh(c)
            # Contiguous, tile-aligned (Bp, Hp) store; buf becomes next layer's input.
            buf_ref[pl.ds(t * Bp, Bp), :] = h
        hn_ref[l] = h
        cn_ref[l] = c

    # ---- decode Linear(H -> V) over the whole sequence; lane-dense (T*Bp, Vp) output ----
    seq = buf_ref[...].astype(cdtype)
    logits_ref[...] = jnp.dot(seq, w_dec_ref[...],
                              preferred_element_type=jnp.float32) + b_dec_ref[...]


def char_lstm_forward(token_ids, params, matmul_dtype=jnp.bfloat16):
    emb = params["emb"]        # (V, H)
    w_ih = params["w_ih"]      # (L, 4H, H)   PyTorch layout
    w_hh = params["w_hh"]      # (L, 4H, H)
    b = params["b"]            # (L, 4H)      b_ih + b_hh
    w_dec = params["w_dec"]    # (V, H)
    b_dec = params["b_dec"]    # (V,)

    B, T = token_ids.shape
    V, H = emb.shape
    L = w_ih.shape[0]

    Bp = _round_up(B, 8)       # sublane-align batch
    Hp = _round_up(H, 128)     # lane-align hidden (gate slices = full lane tiles)
    Vp = _round_up(V, 128)     # lane-align vocab  (unmasked decode stores)

    # Glue: embedding gather stays in plain JAX; go time-major and zero-pad.
    x = emb[token_ids].astype(jnp.float32)               # (B, T, H)
    x = jnp.transpose(x, (1, 0, 2))                      # (T, B, H) time-major
    x = jnp.pad(x, ((0, 0), (0, Bp - B), (0, Hp - H))).reshape(T * Bp, Hp)

    # Pre-transpose / pad / cast weights once outside the kernel.
    def prep_gate_w(w):  # (L, 4H, H) -> (L, Hp, 4Hp), contraction on lhs last dim
        w4 = w.reshape(L, 4, H, H)                                   # (L, gate, out, in)
        w4 = jnp.pad(w4, ((0, 0), (0, 0), (0, Hp - H), (0, Hp - H)))
        return jnp.transpose(w4, (0, 3, 1, 2)).reshape(L, Hp, 4 * Hp).astype(matmul_dtype)

    w_ih_p = prep_gate_w(w_ih)
    w_hh_p = prep_gate_w(w_hh)
    b_p = jnp.pad(b.reshape(L, 4, H), ((0, 0), (0, 0), (0, Hp - H)))
    b_p = b_p.reshape(L, 1, 4 * Hp).astype(jnp.float32)
    w_dec_p = jnp.pad(w_dec.T, ((0, Hp - H), (0, Vp - V))).astype(matmul_dtype)
    b_dec_p = jnp.pad(b_dec, (0, Vp - V)).reshape(1, Vp).astype(jnp.float32)

    out_shapes = (
        jax.ShapeDtypeStruct((T * Bp, Vp), jnp.float32),   # logits (time-major, padded)
        jax.ShapeDtypeStruct((L, Bp, Hp), jnp.float32),    # h_n (padded)
        jax.ShapeDtypeStruct((L, Bp, Hp), jnp.float32),    # c_n (padded)
    )
    vmem = pl.BlockSpec(memory_space=pltpu.MemorySpace.VMEM)
    kernel = functools.partial(char_lstm_kernel, seq_len=T, batch_p=Bp)
    # TODO(synk): for large B, add a batch-tiled grid (BlockSpec over Bp) with
    # dimension_semantics=("parallel",) so v7x's two TensorCores split the batch,
    # and set vmem_limit_bytes explicitly for the 64 MiB v7x budget.
    logits_p, hn_p, cn_p = pl.pallas_call(
        kernel,
        out_shape=out_shapes,
        in_specs=[vmem] * 6,
        out_specs=(vmem, vmem, vmem),
        scratch_shapes=[pltpu.VMEM((T * Bp, Hp), jnp.float32)],
    )(x, w_ih_p, w_hh_p, b_p, w_dec_p, b_dec_p)

    # Un-pad and return batch-first PyTorch layout.
    logits = logits_p.reshape(T, Bp, Vp)[:, :B, :V].transpose(1, 0, 2)   # (B, T, V)
    h_n = hn_p[:, :B, :H]                                                # (L, B, H)
    c_n = cn_p[:, :B, :H]
    return logits, (h_n, c_n)


def reference_forward(token_ids, params, matmul_dtype=jnp.bfloat16):
    """Pure-JAX reference matching torch.nn.LSTM / Linear semantics.

    Matmul operands are cast to `matmul_dtype` (with f32 accumulation) to mirror the
    kernel's MXU precision; pass jnp.float32 for a pure-f32 reference.
    """
    emb, w_ih, w_hh, b = params["emb"], params["w_ih"], params["w_hh"], params["b"]
    w_dec, b_dec = params["w_dec"], params["b_dec"]
    B, T = token_ids.shape
    V, H = emb.shape
    L = w_ih.shape[0]

    def mm(a, w):   # a: (M, K) f32, w: (N, K) torch layout -> (M, N) f32
        return jnp.dot(a.astype(matmul_dtype), w.T.astype(matmul_dtype),
                       preferred_element_type=jnp.float32)

    x = emb[token_ids].astype(jnp.float32)               # (B, T, H)
    hs, cs = [], []
    cur = x
    for l in range(L):
        h = jnp.zeros((B, H), jnp.float32)
        c = jnp.zeros((B, H), jnp.float32)
        outs = []
        for t in range(T):
            gates = mm(cur[:, t, :], w_ih[l]) + mm(h, w_hh[l]) + b[l][None, :]
            i_g = jax.nn.sigmoid(gates[:, 0 * H:1 * H])
            f_g = jax.nn.sigmoid(gates[:, 1 * H:2 * H])
            g_g = jnp.tanh(gates[:, 2 * H:3 * H])
            o_g = jax.nn.sigmoid(gates[:, 3 * H:4 * H])
            c = f_g * c + i_g * g_g
            h = o_g * jnp.tanh(c)
            outs.append(h)
        cur = jnp.stack(outs, axis=1)
        hs.append(h)
        cs.append(c)
    logits = mm(cur.reshape(B * T, H), w_dec).reshape(B, T, V) + b_dec[None, None, :]
    return logits, (jnp.stack(hs, 0), jnp.stack(cs, 0))


def init_params(key, vocab, hidden, n_layers):
    k = 1.0 / jnp.sqrt(jnp.float32(hidden))
    ks = jax.random.split(key, 7)
    emb = jax.random.normal(ks[0], (vocab, hidden), jnp.float32)
    w_ih = jax.random.uniform(ks[1], (n_layers, 4 * hidden, hidden), jnp.float32, -k, k)
    w_hh = jax.random.uniform(ks[2], (n_layers, 4 * hidden, hidden), jnp.float32, -k, k)
    b_ih = jax.random.uniform(ks[3], (n_layers, 4 * hidden), jnp.float32, -k, k)
    b_hh = jax.random.uniform(ks[4], (n_layers, 4 * hidden), jnp.float32, -k, k)
    w_dec = jax.random.uniform(ks[5], (vocab, hidden), jnp.float32, -k, k)
    b_dec = jax.random.uniform(ks[6], (vocab,), jnp.float32, -k, k)
    return {
        "emb": emb,
        "w_ih": w_ih,
        "w_hh": w_hh,
        "b": b_ih + b_hh,   # LSTM adds both biases; fold into one
        "w_dec": w_dec,
        "b_dec": b_dec,
    }


if __name__ == "__main__":
    VOCAB = 62      # input_size / output_size
    HIDDEN = 32     # hidden_size (small for the demo)
    N_LAYERS = 3
    B, T = 2, 8

    key = jax.random.PRNGKey(0)
    pkey, ikey = jax.random.split(key)
    params = init_params(pkey, VOCAB, HIDDEN, N_LAYERS)
    token_ids = jax.random.randint(ikey, (B, T), 0, VOCAB, dtype=jnp.int32)

    logits, (h_n, c_n) = jax.block_until_ready(char_lstm_forward(token_ids, params))

    # Reference with matching MXU-operand precision (bf16 operands, f32 accumulation).
    ref_logits, (ref_h, ref_c) = reference_forward(token_ids, params)
    assert logits.shape == (B, T, VOCAB)
    assert h_n.shape == (N_LAYERS, B, HIDDEN) and c_n.shape == (N_LAYERS, B, HIDDEN)
    assert jnp.allclose(logits, ref_logits, rtol=1e-2, atol=1e-2)
    assert jnp.allclose(h_n, ref_h, rtol=1e-2, atol=1e-2)
    assert jnp.allclose(c_n, ref_c, rtol=1e-2, atol=1e-2)

    print("KERNEL_OK")
</pallas_src>

<mosaic_0001>
module attributes {stable_mosaic.version = 11 : i64} {
  func.func @char_lstm_kernel(%arg0: memref<64x128xf32, #tpu.memory_space<vmem>>, %arg1: memref<3x128x512xbf16, #tpu.memory_space<vmem>>, %arg2: memref<3x128x512xbf16, #tpu.memory_space<vmem>>, %arg3: memref<3x1x512xf32, #tpu.memory_space<vmem>>, %arg4: memref<128x128xbf16, #tpu.memory_space<vmem>>, %arg5: memref<1x128xf32, #tpu.memory_space<vmem>>, %arg6: memref<64x128xf32, #tpu.memory_space<vmem>>, %arg7: memref<3x8x128xf32, #tpu.memory_space<vmem>>, %arg8: memref<3x8x128xf32, #tpu.memory_space<vmem>>, %arg9: memref<64x128xf32, #tpu.memory_space<vmem>>) attributes {dimension_semantics = [], scalar_prefetch = 0 : i64, scratch_operands = 1 : i64, tpu.core_type = #tpu.core_type<tc>} {
    %c0 = arith.constant 0 : index
    %c0_0 = arith.constant 0 : index
    %c0_1 = arith.constant 0 : index
    %0 = vector.load %arg1[%c0, %c0_0, %c0_1] : memref<3x128x512xbf16, #tpu.memory_space<vmem>>, vector<1x128x512xbf16>
    %1 = vector.shape_cast %0 : vector<1x128x512xbf16> to vector<128x512xbf16>
    %c0_2 = arith.constant 0 : index
    %c0_3 = arith.constant 0 : index
    %c0_4 = arith.constant 0 : index
    %2 = vector.load %arg2[%c0_2, %c0_3, %c0_4] : memref<3x128x512xbf16, #tpu.memory_space<vmem>>, vector<1x128x512xbf16>
    %3 = vector.shape_cast %2 : vector<1x128x512xbf16> to vector<128x512xbf16>
    %c0_5 = arith.constant 0 : index
    %c0_6 = arith.constant 0 : index
    %c0_7 = arith.constant 0 : index
    %4 = vector.load %arg3[%c0_5, %c0_6, %c0_7] : memref<3x1x512xf32, #tpu.memory_space<vmem>>, vector<1x1x512xf32>
    %5 = vector.shape_cast %4 : vector<1x1x512xf32> to vector<1x512xf32>
    %c0_8 = arith.constant 0 : index
    %c0_9 = arith.constant 0 : index
    %6 = vector.load %arg0[%c0_8, %c0_9] : memref<64x128xf32, #tpu.memory_space<vmem>>, vector<64x128xf32>
    %7 = arith.truncf %6 : vector<64x128xf32> to vector<64x128xbf16>
    %cst = arith.constant dense<0.000000e+00> : vector<64x512xf32>
    %8 = tpu.matmul %7, %1, %cst {dimension_numbers = #tpu.dot_dimension_numbers<[1], [0], [0], [1], [0, 0, 1, 1], [], []>} : vector<64x128xbf16>, vector<128x512xbf16>, vector<64x512xf32> -> vector<64x512xf32>
    %9 = vector.broadcast %5 : vector<1x512xf32> to vector<64x512xf32>
    %10 = arith.addf %8, %9 : vector<64x512xf32>
    %cst_10 = arith.constant 0.000000e+00 : f32
    %11 = vector.broadcast %cst_10 : f32 to vector<8x128xf32>
    %cst_11 = arith.constant 0.000000e+00 : f32
    %12 = vector.broadcast %cst_11 : f32 to vector<8x128xf32>
    %13 = vector.extract_strided_slice %10 {offsets = [0, 0], sizes = [8, 512], strides = [1, 1]} : vector<64x512xf32> to vector<8x512xf32>
    %14 = arith.truncf %11 : vector<8x128xf32> to vector<8x128xbf16>
    %cst_12 = arith.constant dense<0.000000e+00> : vector<8x512xf32>
    %15 = tpu.matmul %14, %3, %cst_12 {dimension_numbers = #tpu.dot_dimension_numbers<[1], [0], [0], [1], [0, 0, 1, 1], [], []>} : vector<8x128xbf16>, vector<128x512xbf16>, vector<8x512xf32> -> vector<8x512xf32>
    %16 = arith.addf %13, %15 : vector<8x512xf32>
    %17 = vector.extract_strided_slice %16 {offsets = [0, 0], sizes = [8, 128], strides = [1, 1]} : vector<8x512xf32> to vector<8x128xf32>
    %18 = arith.negf %17 : vector<8x128xf32>
    %19 = math.exp %18 : vector<8x128xf32>
    %cst_13 = arith.constant 1.000000e+00 : f32
    %20 = vector.broadcast %cst_13 : f32 to vector<8x128xf32>
    %21 = arith.addf %20, %19 : vector<8x128xf32>
    %22 = arith.divf %20, %21 : vector<8x128xf32>
    %23 = vector.extract_strided_slice %16 {offsets = [0, 128], sizes = [8, 128], strides = [1, 1]} : vector<8x512xf32> to vector<8x128xf32>
    %24 = arith.negf %23 : vector<8x128xf32>
    %25 = math.exp %24 : vector<8x128xf32>
    %cst_14 = arith.constant 1.000000e+00 : f32
    %26 = vector.broadcast %cst_14 : f32 to vector<8x128xf32>
    %27 = arith.addf %26, %25 : vector<8x128xf32>
    %28 = arith.divf %26, %27 : vector<8x128xf32>
    %29 = vector.extract_strided_slice %16 {offsets = [0, 256], sizes = [8, 128], strides = [1, 1]} : vector<8x512xf32> to vector<8x128xf32>
    %30 = math.tanh %29 : vector<8x128xf32>
    %31 = vector.extract_strided_slice %16 {offsets = [0, 384], sizes = [8, 128], strides = [1, 1]} : vector<8x512xf32> to vector<8x128xf32>
    %32 = arith.negf %31 : vector<8x128xf32>
    %33 = math.exp %32 : vector<8x128xf32>
    %cst_15 = arith.constant 1.000000e+00 : f32
    %34 = vector.broadcast %cst_15 : f32 to vector<8x128xf32>
    %35 = arith.addf %34, %33 : vector<8x128xf32>
    %36 = arith.divf %34, %35 : vector<8x128xf32>
    %37 = arith.mulf %28, %12 : vector<8x128xf32>
    %38 = arith.mulf %22, %30 : vector<8x128xf32>
    %39 = arith.addf %37, %38 : vector<8x128xf32>
    %40 = math.tanh %39 : vector<8x128xf32>
    %41 = arith.mulf %36, %40 : vector<8x128xf32>
    %c0_16 = arith.constant 0 : index
    %c0_17 = arith.constant 0 : index
    %42 = vector.load %arg9[%c0_16, %c0_17] : memref<64x128xf32, #tpu.memory_space<vmem>>, vector<8x128xf32>
    tpu.vector_store %arg9[%c0_16, %c0_17], %41 {strides = array<i32>} : memref<64x128xf32, #tpu.memory_space<vmem>>, vector<8x128xf32>,
    %43 = vector.extract_strided_slice %10 {offsets = [8, 0], sizes = [8, 512], strides = [1, 1]} : vector<64x512xf32> to vector<8x512xf32>
    %44 = arith.truncf %41 : vector<8x128xf32> to vector<8x128xbf16>
    %cst_18 = arith.constant dense<0.000000e+00> : vector<8x512xf32>
    %45 = tpu.matmul %44, %3, %cst_18 {dimension_numbers = #tpu.dot_dimension_numbers<[1], [0], [0], [1], [0, 0, 1, 1], [], []>} : vector<8x128xbf16>, vector<128x512xbf16>, vector<8x512xf32> -> vector<8x512xf32>
    %46 = arith.addf %43, %45 : vector<8x512xf32>
    %47 = vector.extract_strided_slice %46 {offsets = [0, 0], sizes = [8, 128], strides = [1, 1]} : vector<8x512xf32> to vector<8x128xf32>
    %48 = arith.negf %47 : vector<8x128xf32>
    %49 = math.exp %48 : vector<8x128xf32>
    %cst_19 = arith.constant 1.000000e+00 : f32
    %50 = vector.broadcast %cst_19 : f32 to vector<8x128xf32>
    %51 = arith.addf %50, %49 : vector<8x128xf32>
    %52 = arith.divf %50, %51 : vector<8x128xf32>
    %53 = vector.extract_strided_slice %46 {offsets = [0, 128], sizes = [8, 128], strides = [1, 1]} : vector<8x512xf32> to vector<8x128xf32>
    %54 = arith.negf %53 : vector<8x128xf32>
    %55 = math.exp %54 : vector<8x128xf32>
    %cst_20 = arith.constant 1.000000e+00 : f32
    %56 = vector.broadcast %cst_20 : f32 to vector<8x128xf32>
    %57 = arith.addf %56, %55 : vector<8x128xf32>
    %58 = arith.divf %56, %57 : vector<8x128xf32>
    %59 = vector.extract_strided_slice %46 {offsets = [0, 256], sizes = [8, 128], strides = [1, 1]} : vector<8x512xf32> to vector<8x128xf32>
    %60 = math.tanh %59 : vector<8x128xf32>
    %61 = vector.extract_strided_slice %46 {offsets = [0, 384], sizes = [8, 128], strides = [1, 1]} : vector<8x512xf32> to vector<8x128xf32>
    %62 = arith.negf %61 : vector<8x128xf32>
    %63 = math.exp %62 : vector<8x128xf32>
    %cst_21 = arith.constant 1.000000e+00 : f32
    %64 = vector.broadcast %cst_21 : f32 to vector<8x128xf32>
    %65 = arith.addf %64, %63 : vector<8x128xf32>
    %66 = arith.divf %64, %65 : vector<8x128xf32>
    %67 = arith.mulf %58, %39 : vector<8x128xf32>
    %68 = arith.mulf %52, %60 : vector<8x128xf32>
    %69 = arith.addf %67, %68 : vector<8x128xf32>
    %70 = math.tanh %69 : vector<8x128xf32>
    %71 = arith.mulf %66, %70 : vector<8x128xf32>
    %c8 = arith.constant 8 : index
    %c0_22 = arith.constant 0 : index
    %72 = vector.load %arg9[%c8, %c0_22] : memref<64x128xf32, #tpu.memory_space<vmem>>, vector<8x128xf32>
    tpu.vector_store %arg9[%c8, %c0_22], %71 {strides = array<i32>} : memref<64x128xf32, #tpu.memory_space<vmem>>, vector<8x128xf32>,
    %73 = vector.extract_strided_slice %10 {offsets = [16, 0], sizes = [8, 512], strides = [1, 1]} : vector<64x512xf32> to vector<8x512xf32>
    %74 = arith.truncf %71 : vector<8x128xf32> to vector<8x128xbf16>
    %cst_23 = arith.constant dense<0.000000e+00> : vector<8x512xf32>
    %75 = tpu.matmul %74, %3, %cst_23 {dimension_numbers = #tpu.dot_dimension_numbers<[1], [0], [0], [1], [0, 0, 1, 1], [], []>} : vector<8x128xbf16>, vector<128x512xbf16>, vector<8x512xf32> -> vector<8x512xf32>
    %76 = arith.addf %73, %75 : vector<8x512xf32>
    %77 = vector.extract_strided_slice %76 {offsets = [0, 0], sizes = [8, 128], strides = [1, 1]} : vector<8x512xf32> to vector<8x128xf32>
    %78 = arith.negf %77 : vector<8x128xf32>
    %79 = math.exp %78 : vector<8x128xf32>
    %cst_24 = arith.constant 1.000000e+00 : f32
    %80 = vector.broadcast %cst_24 : f32 to vector<8x128xf32>
    %81 = arith.addf %80, %79 : vector<8x128xf32>
    %82 = arith.divf %80, %81 : vector<8x128xf32>
    %83 = vector.extract_strided_slice %76 {offsets = [0, 128], sizes = [8, 128], strides = [1, 1]} : vector<8x512xf32> to vector<8x128xf32>
    %84 = arith.negf %83 : vector<8x128xf32>
    %85 = math.exp %84 : vector<8x128xf32>
    %cst_25 = arith.constant 1.000000e+00 : f32
    %86 = vector.broadcast %cst_25 : f32 to vector<8x128xf32>
    %87 = arith.addf %86, %85 : vector<8x128xf32>
    %88 = arith.divf %86, %87 : vector<8x128xf32>
    %89 = vector.extract_strided_slice %76 {offsets = [0, 256], sizes = [8, 128], strides = [1, 1]} : vector<8x512xf32> to vector<8x128xf32>
    %90 = math.tanh %89 : vector<8x128xf32>
    %91 = vector.extract_strided_slice %76 {offsets = [0, 384], sizes = [8, 128], strides = [1, 1]} : vector<8x512xf32> to vector<8x128xf32>
    %92 = arith.negf %91 : vector<8x128xf32>
    %93 = math.exp %92 : vector<8x128xf32>
    %cst_26 = arith.constant 1.000000e+00 : f32
    %94 = vector.broadcast %cst_26 : f32 to vector<8x128xf32>
    %95 = arith.addf %94, %93 : vector<8x128xf32>
    %96 = arith.divf %94, %95 : vector<8x128xf32>
    %97 = arith.mulf %88, %69 : vector<8x128xf32>
    %98 = arith.mulf %82, %90 : vector<8x128xf32>
    %99 = arith.addf %97, %98 : vector<8x128xf32>
    %100 = math.tanh %99 : vector<8x128xf32>
    %101 = arith.mulf %96, %100 : vector<8x128xf32>
    %c16 = arith.constant 16 : index
    %c0_27 = arith.constant 0 : index
    %102 = vector.load %arg9[%c16, %c0_27] : memref<64x128xf32, #tpu.memory_space<vmem>>, vector<8x128xf32>
    tpu.vector_store %arg9[%c16, %c0_27], %101 {strides = array<i32>} : memref<64x128xf32, #tpu.memory_space<vmem>>, vector<8x128xf32>,
    %103 = vector.extract_strided_slice %10 {offsets = [24, 0], sizes = [8, 512], strides = [1, 1]} : vector<64x512xf32> to vector<8x512xf32>
    %104 = arith.truncf %101 : vector<8x128xf32> to vector<8x128xbf16>
    %cst_28 = arith.constant dense<0.000000e+00> : vector<8x512xf32>
    %105 = tpu.matmul %104, %3, %cst_28 {dimension_numbers = #tpu.dot_dimension_numbers<[1], [0], [0], [1], [0, 0, 1, 1], [], []>} : vector<8x128xbf16>, vector<128x512xbf16>, vector<8x512xf32> -> vector<8x512xf32>
    %106 = arith.addf %103, %105 : vector<8x512xf32>
    %107 = vector.extract_strided_slice %106 {offsets = [0, 0], sizes = [8, 128], strides = [1, 1]} : vector<8x512xf32> to vector<8x128xf32>
    %108 = arith.negf %107 : vector<8x128xf32>
    %109 = math.exp %108 : vector<8x128xf32>
    %cst_29 = arith.constant 1.000000e+00 : f32
    %110 = vector.broadcast %cst_29 : f32 to vector<8x128xf32>
    %111 = arith.addf %110, %109 : vector<8x128xf32>
    %112 = arith.divf %110, %111 : vector<8x128xf32>
    %113 = vector.extract_strided_slice %106 {offsets = [0, 128], sizes = [8, 128], strides = [1, 1]} : vector<8x512xf32> to vector<8x128xf32>
    %114 = arith.negf %113 : vector<8x128xf32>
    %115 = math.exp %114 : vector<8x128xf32>
    %cst_30 = arith.constant 1.000000e+00 : f32
    %116 = vector.broadcast %cst_30 : f32 to vector<8x128xf32>
    %117 = arith.addf %116, %115 : vector<8x128xf32>
    %118 = arith.divf %116, %117 : vector<8x128xf32>
    %119 = vector.extract_strided_slice %106 {offsets = [0, 256], sizes = [8, 128], strides = [1, 1]} : vector<8x512xf32> to vector<8x128xf32>
    %120 = math.tanh %119 : vector<8x128xf32>
    %121 = vector.extract_strided_slice %106 {offsets = [0, 384], sizes = [8, 128], strides = [1, 1]} : vector<8x512xf32> to vector<8x128xf32>
    %122 = arith.negf %121 : vector<8x128xf32>
    %123 = math.exp %122 : vector<8x128xf32>
    %cst_31 = arith.constant 1.000000e+00 : f32
    %124 = vector.broadcast %cst_31 : f32 to vector<8x128xf32>
    %125 = arith.addf %124, %123 : vector<8x128xf32>
    %126 = arith.divf %124, %125 : vector<8x128xf32>
    %127 = arith.mulf %118, %99 : vector<8x128xf32>
    %128 = arith.mulf %112, %120 : vector<8x128xf32>
    %129 = arith.addf %127, %128 : vector<8x128xf32>
    %130 = math.tanh %129 : vector<8x128xf32>
    %131 = arith.mulf %126, %130 : vector<8x128xf32>
    %c24 = arith.constant 24 : index
    %c0_32 = arith.constant 0 : index
    %132 = vector.load %arg9[%c24, %c0_32] : memref<64x128xf32, #tpu.memory_space<vmem>>, vector<8x128xf32>
    tpu.vector_store %arg9[%c24, %c0_32], %131 {strides = array<i32>} : memref<64x128xf32, #tpu.memory_space<vmem>>, vector<8x128xf32>,
    %133 = vector.extract_strided_slice %10 {offsets = [32, 0], sizes = [8, 512], strides = [1, 1]} : vector<64x512xf32> to vector<8x512xf32>
    %134 = arith.truncf %131 : vector<8x128xf32> to vector<8x128xbf16>
    %cst_33 = arith.constant dense<0.000000e+00> : vector<8x512xf32>
    %135 = tpu.matmul %134, %3, %cst_33 {dimension_numbers = #tpu.dot_dimension_numbers<[1], [0], [0], [1], [0, 0, 1, 1], [], []>} : vector<8x128xbf16>, vector<128x512xbf16>, vector<8x512xf32> -> vector<8x512xf32>
    %136 = arith.addf %133, %135 : vector<8x512xf32>
    %137 = vector.extract_strided_slice %136 {offsets = [0, 0], sizes = [8, 128], strides = [1, 1]} : vector<8x512xf32> to vector<8x128xf32>
    %138 = arith.negf %137 : vector<8x128xf32>
    %139 = math.exp %138 : vector<8x128xf32>
    %cst_34 = arith.constant 1.000000e+00 : f32
    %140 = vector.broadcast %cst_34 : f32 to vector<8x128xf32>
    %141 = arith.addf %140, %139 : vector<8x128xf32>
    %142 = arith.divf %140, %141 : vector<8x128xf32>
    %143 = vector.extract_strided_slice %136 {offsets = [0, 128], sizes = [8, 128], strides = [1, 1]} : vector<8x512xf32> to vector<8x128xf32>
    %144 = arith.negf %143 : vector<8x128xf32>
    %145 = math.exp %144 : vector<8x128xf32>
    %cst_35 = arith.constant 1.000000e+00 : f32
    %146 = vector.broadcast %cst_35 : f32 to vector<8x128xf32>
    %147 = arith.addf %146, %145 : vector<8x128xf32>
    %148 = arith.divf %146, %147 : vector<8x128xf32>
    %149 = vector.extract_strided_slice %136 {offsets = [0, 256], sizes = [8, 128], strides = [1, 1]} : vector<8x512xf32> to vector<8x128xf32>
    %150 = math.tanh %149 : vector<8x128xf32>
    %151 = vector.extract_strided_slice %136 {offsets = [0, 384], sizes = [8, 128], strides = [1, 1]} : vector<8x512xf32> to vector<8x128xf32>
    %152 = arith.negf %151 : vector<8x128xf32>
    %153 = math.exp %152 : vector<8x128xf32>
    %cst_36 = arith.constant 1.000000e+00 : f32
    %154 = vector.broadcast %cst_36 : f32 to vector<8x128xf32>
    %155 = arith.addf %154, %153 : vector<8x128xf32>
    %156 = arith.divf %154, %155 : vector<8x128xf32>
    %157 = arith.mulf %148, %129 : vector<8x128xf32>
    %158 = arith.mulf %142, %150 : vector<8x128xf32>
    %159 = arith.addf %157, %158 : vector<8x128xf32>
    %160 = math.tanh %159 : vector<8x128xf32>
    %161 = arith.mulf %156, %160 : vector<8x128xf32>
    %c32 = arith.constant 32 : index
    %c0_37 = arith.constant 0 : index
    %162 = vector.load %arg9[%c32, %c0_37] : memref<64x128xf32, #tpu.memory_space<vmem>>, vector<8x128xf32>
    tpu.vector_store %arg9[%c32, %c0_37], %161 {strides = array<i32>} : memref<64x128xf32, #tpu.memory_space<vmem>>, vector<8x128xf32>,
    %163 = vector.extract_strided_slice %10 {offsets = [40, 0], sizes = [8, 512], strides = [1, 1]} : vector<64x512xf32> to vector<8x512xf32>
    %164 = arith.truncf %161 : vector<8x128xf32> to vector<8x128xbf16>
    %cst_38 = arith.constant dense<0.000000e+00> : vector<8x512xf32>
    %165 = tpu.matmul %164, %3, %cst_38 {dimension_numbers = #tpu.dot_dimension_numbers<[1], [0], [0], [1], [0, 0, 1, 1], [], []>} : vector<8x128xbf16>, vector<128x512xbf16>, vector<8x512xf32> -> vector<8x512xf32>
    %166 = arith.addf %163, %165 : vector<8x512xf32>
    %167 = vector.extract_strided_slice %166 {offsets = [0, 0], sizes = [8, 128], strides = [1, 1]} : vector<8x512xf32> to vector<8x128xf32>
    %168 = arith.negf %167 : vector<8x128xf32>
    %169 = math.exp %168 : vector<8x128xf32>
    %cst_39 = arith.constant 1.000000e+00 : f32
    %170 = vector.broadcast %cst_39 : f32 to vector<8x128xf32>
    %171 = arith.addf %170, %169 : vector<8x128xf32>
    %172 = arith.divf %170, %171 : vector<8x128xf32>
    %173 = vector.extract_strided_slice %166 {offsets = [0, 128], sizes = [8, 128], strides = [1, 1]} : vector<8x512xf32> to vector<8x128xf32>
    %174 = arith.negf %173 : vector<8x128xf32>
    %175 = math.exp %174 : vector<8x128xf32>
    %cst_40 = arith.constant 1.000000e+00 : f32
    %176 = vector.broadcast %cst_40 : f32 to vector<8x128xf32>
    %177 = arith.addf %176, %175 : vector<8x128xf32>
    %178 = arith.divf %176, %177 : vector<8x128xf32>
    %179 = vector.extract_strided_slice %166 {offsets = [0, 256], sizes = [8, 128], strides = [1, 1]} : vector<8x512xf32> to vector<8x128xf32>
    %180 = math.tanh %179 : vector<8x128xf32>
    %181 = vector.extract_strided_slice %166 {offsets = [0, 384], sizes = [8, 128], strides = [1, 1]} : vector<8x512xf32> to vector<8x128xf32>
    %182 = arith.negf %181 : vector<8x128xf32>
    %183 = math.exp %182 : vector<8x128xf32>
    %cst_41 = arith.constant 1.000000e+00 : f32
    %184 = vector.broadcast %cst_41 : f32 to vector<8x128xf32>
    %185 = arith.addf %184, %183 : vector<8x128xf32>
    %186 = arith.divf %184, %185 : vector<8x128xf32>
    %187 = arith.mulf %178, %159 : vector<8x128xf32>
    %188 = arith.mulf %172, %180 : vector<8x128xf32>
    %189 = arith.addf %187, %188 : vector<8x128xf32>
    %190 = math.tanh %189 : vector<8x128xf32>
    %191 = arith.mulf %186, %190 : vector<8x128xf32>
    %c40 = arith.constant 40 : index
    %c0_42 = arith.constant 0 : index
    %192 = vector.load %arg9[%c40, %c0_42] : memref<64x128xf32, #tpu.memory_space<vmem>>, vector<8x128xf32>
    tpu.vector_store %arg9[%c40, %c0_42], %191 {strides = array<i32>} : memref<64x128xf32, #tpu.memory_space<vmem>>, vector<8x128xf32>,
    %193 = vector.extract_strided_slice %10 {offsets = [48, 0], sizes = [8, 512], strides = [1, 1]} : vector<64x512xf32> to vector<8x512xf32>
    %194 = arith.truncf %191 : vector<8x128xf32> to vector<8x128xbf16>
    %cst_43 = arith.constant dense<0.000000e+00> : vector<8x512xf32>
    %195 = tpu.matmul %194, %3, %cst_43 {dimension_numbers = #tpu.dot_dimension_numbers<[1], [0], [0], [1], [0, 0, 1, 1], [], []>} : vector<8x128xbf16>, vector<128x512xbf16>, vector<8x512xf32> -> vector<8x512xf32>
    %196 = arith.addf %193, %195 : vector<8x512xf32>
    %197 = vector.extract_strided_slice %196 {offsets = [0, 0], sizes = [8, 128], strides = [1, 1]} : vector<8x512xf32> to vector<8x128xf32>
    %198 = arith.negf %197 : vector<8x128xf32>
    %199 = math.exp %198 : vector<8x128xf32>
    %cst_44 = arith.constant 1.000000e+00 : f32
    %200 = vector.broadcast %cst_44 : f32 to vector<8x128xf32>
    %201 = arith.addf %200, %199 : vector<8x128xf32>
    %202 = arith.divf %200, %201 : vector<8x128xf32>
    %203 = vector.extract_strided_slice %196 {offsets = [0, 128], sizes = [8, 128], strides = [1, 1]} : vector<8x512xf32> to vector<8x128xf32>
    %204 = arith.negf %203 : vector<8x128xf32>
    %205 = math.exp %204 : vector<8x128xf32>
    %cst_45 = arith.constant 1.000000e+00 : f32
    %206 = vector.broadcast %cst_45 : f32 to vector<8x128xf32>
    %207 = arith.addf %206, %205 : vector<8x128xf32>
    %208 = arith.divf %206, %207 : vector<8x128xf32>
    %209 = vector.extract_strided_slice %196 {offsets = [0, 256], sizes = [8, 128], strides = [1, 1]} : vector<8x512xf32> to vector<8x128xf32>
    %210 = math.tanh %209 : vector<8x128xf32>
    %211 = vector.extract_strided_slice %196 {offsets = [0, 384], sizes = [8, 128], strides = [1, 1]} : vector<8x512xf32> to vector<8x128xf32>
    %212 = arith.negf %211 : vector<8x128xf32>
    %213 = math.exp %212 : vector<8x128xf32>
    %cst_46 = arith.constant 1.000000e+00 : f32
    %214 = vector.broadcast %cst_46 : f32 to vector<8x128xf32>
    %215 = arith.addf %214, %213 : vector<8x128xf32>
    %216 = arith.divf %214, %215 : vector<8x128xf32>
    %217 = arith.mulf %208, %189 : vector<8x128xf32>
    %218 = arith.mulf %202, %210 : vector<8x128xf32>
    %219 = arith.addf %217, %218 : vector<8x128xf32>
    %220 = math.tanh %219 : vector<8x128xf32>
    %221 = arith.mulf %216, %220 : vector<8x128xf32>
    %c48 = arith.constant 48 : index
    %c0_47 = arith.constant 0 : index
    %222 = vector.load %arg9[%c48, %c0_47] : memref<64x128xf32, #tpu.memory_space<vmem>>, vector<8x128xf32>
    tpu.vector_store %arg9[%c48, %c0_47], %221 {strides = array<i32>} : memref<64x128xf32, #tpu.memory_space<vmem>>, vector<8x128xf32>,
    %223 = vector.extract_strided_slice %10 {offsets = [56, 0], sizes = [8, 512], strides = [1, 1]} : vector<64x512xf32> to vector<8x512xf32>
    %224 = arith.truncf %221 : vector<8x128xf32> to vector<8x128xbf16>
    %cst_48 = arith.constant dense<0.000000e+00> : vector<8x512xf32>
    %225 = tpu.matmul %224, %3, %cst_48 {dimension_numbers = #tpu.dot_dimension_numbers<[1], [0], [0], [1], [0, 0, 1, 1], [], []>} : vector<8x128xbf16>, vector<128x512xbf16>, vector<8x512xf32> -> vector<8x512xf32>
    %226 = arith.addf %223, %225 : vector<8x512xf32>
    %227 = vector.extract_strided_slice %226 {offsets = [0, 0], sizes = [8, 128], strides = [1, 1]} : vector<8x512xf32> to vector<8x128xf32>
    %228 = arith.negf %227 : vector<8x128xf32>
    %229 = math.exp %228 : vector<8x128xf32>
    %cst_49 = arith.constant 1.000000e+00 : f32
    %230 = vector.broadcast %cst_49 : f32 to vector<8x128xf32>
    %231 = arith.addf %230, %229 : vector<8x128xf32>
    %232 = arith.divf %230, %231 : vector<8x128xf32>
    %233 = vector.extract_strided_slice %226 {offsets = [0, 128], sizes = [8, 128], strides = [1, 1]} : vector<8x512xf32> to vector<8x128xf32>
    %234 = arith.negf %233 : vector<8x128xf32>
    %235 = math.exp %234 : vector<8x128xf32>
    %cst_50 = arith.constant 1.000000e+00 : f32
    %236 = vector.broadcast %cst_50 : f32 to vector<8x128xf32>
    %237 = arith.addf %236, %235 : vector<8x128xf32>
    %238 = arith.divf %236, %237 : vector<8x128xf32>
    %239 = vector.extract_strided_slice %226 {offsets = [0, 256], sizes = [8, 128], strides = [1, 1]} : vector<8x512xf32> to vector<8x128xf32>
    %240 = math.tanh %239 : vector<8x128xf32>
    %241 = vector.extract_strided_slice %226 {offsets = [0, 384], sizes = [8, 128], strides = [1, 1]} : vector<8x512xf32> to vector<8x128xf32>
    %242 = arith.negf %241 : vector<8x128xf32>
    %243 = math.exp %242 : vector<8x128xf32>
    %cst_51 = arith.constant 1.000000e+00 : f32
    %244 = vector.broadcast %cst_51 : f32 to vector<8x128xf32>
    %245 = arith.addf %244, %243 : vector<8x128xf32>
    %246 = arith.divf %244, %245 : vector<8x128xf32>
    %247 = arith.mulf %238, %219 : vector<8x128xf32>
    %248 = arith.mulf %232, %240 : vector<8x128xf32>
    %249 = arith.addf %247, %248 : vector<8x128xf32>
    %250 = math.tanh %249 : vector<8x128xf32>
    %251 = arith.mulf %246, %250 : vector<8x128xf32>
    %c56 = arith.constant 56 : index
    %c0_52 = arith.constant 0 : index
    %252 = vector.load %arg9[%c56, %c0_52] : memref<64x128xf32, #tpu.memory_space<vmem>>, vector<8x128xf32>
    tpu.vector_store %arg9[%c56, %c0_52], %251 {strides = array<i32>} : memref<64x128xf32, #tpu.memory_space<vmem>>, vector<8x128xf32>,
    %c0_53 = arith.constant 0 : index
    %c0_54 = arith.constant 0 : index
    %c0_55 = arith.constant 0 : index
    %253 = vector.load %arg7[%c0_53, %c0_54, %c0_55] : memref<3x8x128xf32, #tpu.memory_space<vmem>>, vector<1x8x128xf32>
    %254 = vector.shape_cast %253 : vector<1x8x128xf32> to vector<8x128xf32>
    %255 = vector.shape_cast %251 : vector<8x128xf32> to vector<1x8x128xf32>
    tpu.vector_store %arg7[%c0_53, %c0_54, %c0_55], %255 {strides = array<i32>} : memref<3x8x128xf32, #tpu.memory_space<vmem>>, vector<1x8x128xf32>,
    %c0_56 = arith.constant 0 : index
    %c0_57 = arith.constant 0 : index
    %c0_58 = arith.constant 0 : index
    %256 = vector.load %arg8[%c0_56, %c0_57, %c0_58] : memref<3x8x128xf32, #tpu.memory_space<vmem>>, vector<1x8x128xf32>
    %257 = vector.shape_cast %256 : vector<1x8x128xf32> to vector<8x128xf32>
    %258 = vector.shape_cast %249 : vector<8x128xf32> to vector<1x8x128xf32>
    tpu.vector_store %arg8[%c0_56, %c0_57, %c0_58], %258 {strides = array<i32>} : memref<3x8x128xf32, #tpu.memory_space<vmem>>, vector<1x8x128xf32>,
    %c1 = arith.constant 1 : index
    %c0_59 = arith.constant 0 : index
    %c0_60 = arith.constant 0 : index
    %259 = vector.load %arg1[%c1, %c0_59, %c0_60] : memref<3x128x512xbf16, #tpu.memory_space<vmem>>, vector<1x128x512xbf16>
    %260 = vector.shape_cast %259 : vector<1x128x512xbf16> to vector<128x512xbf16>
    %c1_61 = arith.constant 1 : index
    %c0_62 = arith.constant 0 : index
    %c0_63 = arith.constant 0 : index
    %261 = vector.load %arg2[%c1_61, %c0_62, %c0_63] : memref<3x128x512xbf16, #tpu.memory_space<vmem>>, vector<1x128x512xbf16>
    %262 = vector.shape_cast %261 : vector<1x128x512xbf16> to vector<128x512xbf16>
    %c1_64 = arith.constant 1 : index
    %c0_65 = arith.constant 0 : index
    %c0_66 = arith.constant 0 : index
    %263 = vector.load %arg3[%c1_64, %c0_65, %c0_66] : memref<3x1x512xf32, #tpu.memory_space<vmem>>, vector<1x1x512xf32>
    %264 = vector.shape_cast %263 : vector<1x1x512xf32> to vector<1x512xf32>
    %c0_67 = arith.constant 0 : index
    %c0_68 = arith.constant 0 : index
    %265 = vector.load %arg9[%c0_67, %c0_68] : memref<64x128xf32, #tpu.memory_space<vmem>>, vector<64x128xf32>
    %266 = arith.truncf %265 : vector<64x128xf32> to vector<64x128xbf16>
    %cst_69 = arith.constant dense<0.000000e+00> : vector<64x512xf32>
    %267 = tpu.matmul %266, %260, %cst_69 {dimension_numbers = #tpu.dot_dimension_numbers<[1], [0], [0], [1], [0, 0, 1, 1], [], []>} : vector<64x128xbf16>, vector<128x512xbf16>, vector<64x512xf32> -> vector<64x512xf32>
    %268 = vector.broadcast %264 : vector<1x512xf32> to vector<64x512xf32>
    %269 = arith.addf %267, %268 : vector<64x512xf32>
    %cst_70 = arith.constant 0.000000e+00 : f32
    %270 = vector.broadcast %cst_70 : f32 to vector<8x128xf32>
    %cst_71 = arith.constant 0.000000e+00 : f32
    %271 = vector.broadcast %cst_71 : f32 to vector<8x128xf32>
    %272 = vector.extract_strided_slice %269 {offsets = [0, 0], sizes = [8, 512], strides = [1, 1]} : vector<64x512xf32> to vector<8x512xf32>
    %273 = arith.truncf %270 : vector<8x128xf32> to vector<8x128xbf16>
    %cst_72 = arith.constant dense<0.000000e+00> : vector<8x512xf32>
    %274 = tpu.matmul %273, %262, %cst_72 {dimension_numbers = #tpu.dot_dimension_numbers<[1], [0], [0], [1], [0, 0, 1, 1], [], []>} : vector<8x128xbf16>, vector<128x512xbf16>, vector<8x512xf32> -> vector<8x512xf32>
    %275 = arith.addf %272, %274 : vector<8x512xf32>
    %276 = vector.extract_strided_slice %275 {offsets = [0, 0], sizes = [8, 128], strides = [1, 1]} : vector<8x512xf32> to vector<8x128xf32>
    %277 = arith.negf %276 : vector<8x128xf32>
    %278 = math.exp %277 : vector<8x128xf32>
    %cst_73 = arith.constant 1.000000e+00 : f32
    %279 = vector.broadcast %cst_73 : f32 to vector<8x128xf32>
    %280 = arith.addf %279, %278 : vector<8x128xf32>
    %281 = arith.divf %279, %280 : vector<8x128xf32>
    %282 = vector.extract_strided_slice %275 {offsets = [0, 128], sizes = [8, 128], strides = [1, 1]} : vector<8x512xf32> to vector<8x128xf32>
    %283 = arith.negf %282 : vector<8x128xf32>
    %284 = math.exp %283 : vector<8x128xf32>
    %cst_74 = arith.constant 1.000000e+00 : f32
    %285 = vector.broadcast %cst_74 : f32 to vector<8x128xf32>
    %286 = arith.addf %285, %284 : vector<8x128xf32>
    %287 = arith.divf %285, %286 : vector<8x128xf32>
    %288 = vector.extract_strided_slice %275 {offsets = [0, 256], sizes = [8, 128], strides = [1, 1]} : vector<8x512xf32> to vector<8x128xf32>
    %289 = math.tanh %288 : vector<8x128xf32>
    %290 = vector.extract_strided_slice %275 {offsets = [0, 384], sizes = [8, 128], strides = [1, 1]} : vector<8x512xf32> to vector<8x128xf32>
    %291 = arith.negf %290 : vector<8x128xf32>
    %292 = math.exp %291 : vector<8x128xf32>
    %cst_75 = arith.constant 1.000000e+00 : f32
    %293 = vector.broadcast %cst_75 : f32 to vector<8x128xf32>
    %294 = arith.addf %293, %292 : vector<8x128xf32>
    %295 = arith.divf %293, %294 : vector<8x128xf32>
    %296 = arith.mulf %287, %271 : vector<8x128xf32>
    %297 = arith.mulf %281, %289 : vector<8x128xf32>
    %298 = arith.addf %296, %297 : vector<8x128xf32>
    %299 = math.tanh %298 : vector<8x128xf32>
    %300 = arith.mulf %295, %299 : vector<8x128xf32>
    %c0_76 = arith.constant 0 : index
    %c0_77 = arith.constant 0 : index
    %301 = vector.load %arg9[%c0_76, %c0_77] : memref<64x128xf32, #tpu.memory_space<vmem>>, vector<8x128xf32>
    tpu.vector_store %arg9[%c0_76, %c0_77], %300 {strides = array<i32>} : memref<64x128xf32, #tpu.memory_space<vmem>>, vector<8x128xf32>,
    %302 = vector.extract_strided_slice %269 {offsets = [8, 0], sizes = [8, 512], strides = [1, 1]} : vector<64x512xf32> to vector<8x512xf32>
    %303 = arith.truncf %300 : vector<8x128xf32> to vector<8x128xbf16>
    %cst_78 = arith.constant dense<0.000000e+00> : vector<8x512xf32>
    %304 = tpu.matmul %303, %262, %cst_78 {dimension_numbers = #tpu.dot_dimension_numbers<[1], [0], [0], [1], [0, 0, 1, 1], [], []>} : vector<8x128xbf16>, vector<128x512xbf16>, vector<8x512xf32> -> vector<8x512xf32>
    %305 = arith.addf %302, %304 : vector<8x512xf32>
    %306 = vector.extract_strided_slice %305 {offsets = [0, 0], sizes = [8, 128], strides = [1, 1]} : vector<8x512xf32> to vector<8x128xf32>
    %307 = arith.negf %306 : vector<8x128xf32>
    %308 = math.exp %307 : vector<8x128xf32>
    %cst_79 = arith.constant 1.000000e+00 : f32
    %309 = vector.broadcast %cst_79 : f32 to vector<8x128xf32>
    %310 = arith.addf %309, %308 : vector<8x128xf32>
    %311 = arith.divf %309, %310 : vector<8x128xf32>
    %312 = vector.extract_strided_slice %305 {offsets = [0, 128], sizes = [8, 128], strides = [1, 1]} : vector<8x512xf32> to vector<8x128xf32>
    %313 = arith.negf %312 : vector<8x128xf32>
    %314 = math.exp %313 : vector<8x128xf32>
    %cst_80 = arith.constant 1.000000e+00 : f32
    %315 = vector.broadcast %cst_80 : f32 to vector<8x128xf32>
    %316 = arith.addf %315, %314 : vector<8x128xf32>
    %317 = arith.divf %315, %316 : vector<8x128xf32>
    %318 = vector.extract_strided_slice %305 {offsets = [0, 256], sizes = [8, 128], strides = [1, 1]} : vector<8x512xf32> to vector<8x128xf32>
    %319 = math.tanh %318 : vector<8x128xf32>
    %320 = vector.extract_strided_slice %305 {offsets = [0, 384], sizes = [8, 128], strides = [1, 1]} : vector<8x512xf32> to vector<8x128xf32>
    %321 = arith.negf %320 : vector<8x128xf32>
    %322 = math.exp %321 : vector<8x128xf32>
    %cst_81 = arith.constant 1.000000e+00 : f32
    %323 = vector.broadcast %cst_81 : f32 to vector<8x128xf32>
    %324 = arith.addf %323, %322 : vector<8x128xf32>
    %325 = arith.divf %323, %324 : vector<8x128xf32>
    %326 = arith.mulf %317, %298 : vector<8x128xf32>
    %327 = arith.mulf %311, %319 : vector<8x128xf32>
    %328 = arith.addf %326, %327 : vector<8x128xf32>
    %329 = math.tanh %328 : vector<8x128xf32>
    %330 = arith.mulf %325, %329 : vector<8x128xf32>
    %c8_82 = arith.constant 8 : index
    %c0_83 = arith.constant 0 : index
    %331 = vector.load %arg9[%c8_82, %c0_83] : memref<64x128xf32, #tpu.memory_space<vmem>>, vector<8x128xf32>
    tpu.vector_store %arg9[%c8_82, %c0_83], %330 {strides = array<i32>} : memref<64x128xf32, #tpu.memory_space<vmem>>, vector<8x128xf32>,
    %332 = vector.extract_strided_slice %269 {offsets = [16, 0], sizes = [8, 512], strides = [1, 1]} : vector<64x512xf32> to vector<8x512xf32>
    %333 = arith.truncf %330 : vector<8x128xf32> to vector<8x128xbf16>
    %cst_84 = arith.constant dense<0.000000e+00> : vector<8x512xf32>
    %334 = tpu.matmul %333, %262, %cst_84 {dimension_numbers = #tpu.dot_dimension_numbers<[1], [0], [0], [1], [0, 0, 1, 1], [], []>} : vector<8x128xbf16>, vector<128x512xbf16>, vector<8x512xf32> -> vector<8x512xf32>
    %335 = arith.addf %332, %334 : vector<8x512xf32>
    %336 = vector.extract_strided_slice %335 {offsets = [0, 0], sizes = [8, 128], strides = [1, 1]} : vector<8x512xf32> to vector<8x128xf32>
    %337 = arith.negf %336 : vector<8x128xf32>
    %338 = math.exp %337 : vector<8x128xf32>
    %cst_85 = arith.constant 1.000000e+00 : f32
    %339 = vector.broadcast %cst_85 : f32 to vector<8x128xf32>
    %340 = arith.addf %339, %338 : vector<8x128xf32>
    %341 = arith.divf %339, %340 : vector<8x128xf32>
    %342 = vector.extract_strided_slice %335 {offsets = [0, 128], sizes = [8, 128], strides = [1, 1]} : vector<8x512xf32> to vector<8x128xf32>
    %343 = arith.negf %342 : vector<8x128xf32>
    %344 = math.exp %343 : vector<8x128xf32>
    %cst_86 = arith.constant 1.000000e+00 : f32
    %345 = vector.broadcast %cst_86 : f32 to vector<8x128xf32>
    %346 = arith.addf %345, %344 : vector<8x128xf32>
    %347 = arith.divf %345, %346 : vector<8x128xf32>
    %348 = vector.extract_strided_slice %335 {offsets = [0, 256], sizes = [8, 128], strides = [1, 1]} : vector<8x512xf32> to vector<8x128xf32>
    %349 = math.tanh %348 : vector<8x128xf32>
    %350 = vector.extract_strided_slice %335 {offsets = [0, 384], sizes = [8, 128], strides = [1, 1]} : vector<8x512xf32> to vector<8x128xf32>
    %351 = arith.negf %350 : vector<8x128xf32>
    %352 = math.exp %351 : vector<8x128xf32>
    %cst_87 = arith.constant 1.000000e+00 : f32
    %353 = vector.broadcast %cst_87 : f32 to vector<8x128xf32>
    %354 = arith.addf %353, %352 : vector<8x128xf32>
    %355 = arith.divf %353, %354 : vector<8x128xf32>
    %356 = arith.mulf %347, %328 : vector<8x128xf32>
    %357 = arith.mulf %341, %349 : vector<8x128xf32>
    %358 = arith.addf %356, %357 : vector<8x128xf32>
    %359 = math.tanh %358 : vector<8x128xf32>
    %360 = arith.mulf %355, %359 : vector<8x128xf32>
    %c16_88 = arith.constant 16 : index
    %c0_89 = arith.constant 0 : index
    %361 = vector.load %arg9[%c16_88, %c0_89] : memref<64x128xf32, #tpu.memory_space<vmem>>, vector<8x128xf32>
    tpu.vector_store %arg9[%c16_88, %c0_89], %360 {strides = array<i32>} : memref<64x128xf32, #tpu.memory_space<vmem>>, vector<8x128xf32>,
    %362 = vector.extract_strided_slice %269 {offsets = [24, 0], sizes = [8, 512], strides = [1, 1]} : vector<64x512xf32> to vector<8x512xf32>
    %363 = arith.truncf %360 : vector<8x128xf32> to vector<8x128xbf16>
    %cst_90 = arith.constant dense<0.000000e+00> : vector<8x512xf32>
    %364 = tpu.matmul %363, %262, %cst_90 {dimension_numbers = #tpu.dot_dimension_numbers<[1], [0], [0], [1], [0, 0, 1, 1], [], []>} : vector<8x128xbf16>, vector<128x512xbf16>, vector<8x512xf32> -> vector<8x512xf32>
    %365 = arith.addf %362, %364 : vector<8x512xf32>
    %366 = vector.extract_strided_slice %365 {offsets = [0, 0], sizes = [8, 128], strides = [1, 1]} : vector<8x512xf32> to vector<8x128xf32>
    %367 = arith.negf %366 : vector<8x128xf32>
    %368 = math.exp %367 : vector<8x128xf32>
    %cst_91 = arith.constant 1.000000e+00 : f32
    %369 = vector.broadcast %cst_91 : f32 to vector<8x128xf32>
    %370 = arith.addf %369, %368 : vector<8x128xf32>
    %371 = arith.divf %369, %370 : vector<8x128xf32>
    %372 = vector.extract_strided_slice %365 {offsets = [0, 128], sizes = [8, 128], strides = [1, 1]} : vector<8x512xf32> to vector<8x128xf32>
    %373 = arith.negf %372 : vector<8x128xf32>
    %374 = math.exp %373 : vector<8x128xf32>
    %cst_92 = arith.constant 1.000000e+00 : f32
    %375 = vector.broadcast %cst_92 : f32 to vector<8x128xf32>
    %376 = arith.addf %375, %374 : vector<8x128xf32>
    %377 = arith.divf %375, %376 : vector<8x128xf32>
    %378 = vector.extract_strided_slice %365 {offsets = [0, 256], sizes = [8, 128], strides = [1, 1]} : vector<8x512xf32> to vector<8x128xf32>
    %379 = math.tanh %378 : vector<8x128xf32>
    %380 = vector.extract_strided_slice %365 {offsets = [0, 384], sizes = [8, 128], strides = [1, 1]} : vector<8x512xf32> to vector<8x128xf32>
    %381 = arith.negf %380 : vector<8x128xf32>
    %382 = math.exp %381 : vector<8x128xf32>
    %cst_93 = arith.constant 1.000000e+00 : f32
    %383 = vector.broadcast %cst_93 : f32 to vector<8x128xf32>
    %384 = arith.addf %383, %382 : vector<8x128xf32>
    %385 = arith.divf %383, %384 : vector<8x128xf32>
    %386 = arith.mulf %377, %358 : vector<8x128xf32>
    %387 = arith.mulf %371, %379 : vector<8x128xf32>
    %388 = arith.addf %386, %387 : vector<8x128xf32>
    %389 = math.tanh %388 : vector<8x128xf32>
    %390 = arith.mulf %385, %389 : vector<8x128xf32>
    %c24_94 = arith.constant 24 : index
    %c0_95 = arith.constant 0 : index
    %391 = vector.load %arg9[%c24_94, %c0_95] : memref<64x128xf32, #tpu.memory_space<vmem>>, vector<8x128xf32>
    tpu.vector_store %arg9[%c24_94, %c0_95], %390 {strides = array<i32>} : memref<64x128xf32, #tpu.memory_space<vmem>>, vector<8x128xf32>,
    %392 = vector.extract_strided_slice %269 {offsets = [32, 0], sizes = [8, 512], strides = [1, 1]} : vector<64x512xf32> to vector<8x512xf32>
    %393 = arith.truncf %390 : vector<8x128xf32> to vector<8x128xbf16>
    %cst_96 = arith.constant dense<0.000000e+00> : vector<8x512xf32>
    %394 = tpu.matmul %393, %262, %cst_96 {dimension_numbers = #tpu.dot_dimension_numbers<[1], [0], [0], [1], [0, 0, 1, 1], [], []>} : vector<8x128xbf16>, vector<128x512xbf16>, vector<8x512xf32> -> vector<8x512xf32>
    %395 = arith.addf %392, %394 : vector<8x512xf32>
    %396 = vector.extract_strided_slice %395 {offsets = [0, 0], sizes = [8, 128], strides = [1, 1]} : vector<8x512xf32> to vector<8x128xf32>
    %397 = arith.negf %396 : vector<8x128xf32>
    %398 = math.exp %397 : vector<8x128xf32>
    %cst_97 = arith.constant 1.000000e+00 : f32
    %399 = vector.broadcast %cst_97 : f32 to vector<8x128xf32>
    %400 = arith.addf %399, %398 : vector<8x128xf32>
    %401 = arith.divf %399, %400 : vector<8x128xf32>
    %402 = vector.extract_strided_slice %395 {offsets = [0, 128], sizes = [8, 128], strides = [1, 1]} : vector<8x512xf32> to vector<8x128xf32>
    %403 = arith.negf %402 : vector<8x128xf32>
    %404 = math.exp %403 : vector<8x128xf32>
    %cst_98 = arith.constant 1.000000e+00 : f32
    %405 = vector.broadcast %cst_98 : f32 to vector<8x128xf32>
    %406 = arith.addf %405, %404 : vector<8x128xf32>
    %407 = arith.divf %405, %406 : vector<8x128xf32>
    %408 = vector.extract_strided_slice %395 {offsets = [0, 256], sizes = [8, 128], strides = [1, 1]} : vector<8x512xf32> to vector<8x128xf32>
    %409 = math.tanh %408 : vector<8x128xf32>
    %410 = vector.extract_strided_slice %395 {offsets = [0, 384], sizes = [8, 128], strides = [1, 1]} : vector<8x512xf32> to vector<8x128xf32>
    %411 = arith.negf %410 : vector<8x128xf32>
    %412 = math.exp %411 : vector<8x128xf32>
    %cst_99 = arith.constant 1.000000e+00 : f32
    %413 = vector.broadcast %cst_99 : f32 to vector<8x128xf32>
    %414 = arith.addf %413, %412 : vector<8x128xf32>
    %415 = arith.divf %413, %414 : vector<8x128xf32>
    %416 = arith.mulf %407, %388 : vector<8x128xf32>
    %417 = arith.mulf %401, %409 : vector<8x128xf32>
    %418 = arith.addf %416, %417 : vector<8x128xf32>
    %419 = math.tanh %418 : vector<8x128xf32>
    %420 = arith.mulf %415, %419 : vector<8x128xf32>
    %c32_100 = arith.constant 32 : index
    %c0_101 = arith.constant 0 : index
    %421 = vector.load %arg9[%c32_100, %c0_101] : memref<64x128xf32, #tpu.memory_space<vmem>>, vector<8x128xf32>
    tpu.vector_store %arg9[%c32_100, %c0_101], %420 {strides = array<i32>} : memref<64x128xf32, #tpu.memory_space<vmem>>, vector<8x128xf32>,
    %422 = vector.extract_strided_slice %269 {offsets = [40, 0], sizes = [8, 512], strides = [1, 1]} : vector<64x512xf32> to vector<8x512xf32>
    %423 = arith.truncf %420 : vector<8x128xf32> to vector<8x128xbf16>
    %cst_102 = arith.constant dense<0.000000e+00> : vector<8x512xf32>
    %424 = tpu.matmul %423, %262, %cst_102 {dimension_numbers = #tpu.dot_dimension_numbers<[1], [0], [0], [1], [0, 0, 1, 1], [], []>} : vector<8x128xbf16>, vector<128x512xbf16>, vector<8x512xf32> -> vector<8x512xf32>
    %425 = arith.addf %422, %424 : vector<8x512xf32>
    %426 = vector.extract_strided_slice %425 {offsets = [0, 0], sizes = [8, 128], strides = [1, 1]} : vector<8x512xf32> to vector<8x128xf32>
    %427 = arith.negf %426 : vector<8x128xf32>
    %428 = math.exp %427 : vector<8x128xf32>
    %cst_103 = arith.constant 1.000000e+00 : f32
    %429 = vector.broadcast %cst_103 : f32 to vector<8x128xf32>
    %430 = arith.addf %429, %428 : vector<8x128xf32>
    %431 = arith.divf %429, %430 : vector<8x128xf32>
    %432 = vector.extract_strided_slice %425 {offsets = [0, 128], sizes = [8, 128], strides = [1, 1]} : vector<8x512xf32> to vector<8x128xf32>
    %433 = arith.negf %432 : vector<8x128xf32>
    %434 = math.exp %433 : vector<8x128xf32>
    %cst_104 = arith.constant 1.000000e+00 : f32
    %435 = vector.broadcast %cst_104 : f32 to vector<8x128xf32>
    %436 = arith.addf %435, %434 : vector<8x128xf32>
    %437 = arith.divf %435, %436 : vector<8x128xf32>
    %438 = vector.extract_strided_slice %425 {offsets = [0, 256], sizes = [8, 128], strides = [1, 1]} : vector<8x512xf32> to vector<8x128xf32>
    %439 = math.tanh %438 : vector<8x128xf32>
    %440 = vector.extract_strided_slice %425 {offsets = [0, 384], sizes = [8, 128], strides = [1, 1]} : vector<8x512xf32> to vector<8x128xf32>
    %441 = arith.negf %440 : vector<8x128xf32>
    %442 = math.exp %441 : vector<8x128xf32>
    %cst_105 = arith.constant 1.000000e+00 : f32
    %443 = vector.broadcast %cst_105 : f32 to vector<8x128xf32>
    %444 = arith.addf %443, %442 : vector<8x128xf32>
    %445 = arith.divf %443, %444 : vector<8x128xf32>
    %446 = arith.mulf %437, %418 : vector<8x128xf32>
    %447 = arith.mulf %431, %439 : vector<8x128xf32>
    %448 = arith.addf %446, %447 : vector<8x128xf32>
    %449 = math.tanh %448 : vector<8x128xf32>
    %450 = arith.mulf %445, %449 : vector<8x128xf32>
    %c40_106 = arith.constant 40 : index
    %c0_107 = arith.constant 0 : index
    %451 = vector.load %arg9[%c40_106, %c0_107] : memref<64x128xf32, #tpu.memory_space<vmem>>, vector<8x128xf32>
    tpu.vector_store %arg9[%c40_106, %c0_107], %450 {strides = array<i32>} : memref<64x128xf32, #tpu.memory_space<vmem>>, vector<8x128xf32>,
    %452 = vector.extract_strided_slice %269 {offsets = [48, 0], sizes = [8, 512], strides = [1, 1]} : vector<64x512xf32> to vector<8x512xf32>
    %453 = arith.truncf %450 : vector<8x128xf32> to vector<8x128xbf16>
    %cst_108 = arith.constant dense<0.000000e+00> : vector<8x512xf32>
    %454 = tpu.matmul %453, %262, %cst_108 {dimension_numbers = #tpu.dot_dimension_numbers<[1], [0], [0], [1], [0, 0, 1, 1], [], []>} : vector<8x128xbf16>, vector<128x512xbf16>, vector<8x512xf32> -> vector<8x512xf32>
    %455 = arith.addf %452, %454 : vector<8x512xf32>
    %456 = vector.extract_strided_slice %455 {offsets = [0, 0], sizes = [8, 128], strides = [1, 1]} : vector<8x512xf32> to vector<8x128xf32>
    %457 = arith.negf %456 : vector<8x128xf32>
    %458 = math.exp %457 : vector<8x128xf32>
    %cst_109 = arith.constant 1.000000e+00 : f32
    %459 = vector.broadcast %cst_109 : f32 to vector<8x128xf32>
    %460 = arith.addf %459, %458 : vector<8x128xf32>
    %461 = arith.divf %459, %460 : vector<8x128xf32>
    %462 = vector.extract_strided_slice %455 {offsets = [0, 128], sizes = [8, 128], strides = [1, 1]} : vector<8x512xf32> to vector<8x128xf32>
    %463 = arith.negf %462 : vector<8x128xf32>
    %464 = math.exp %463 : vector<8x128xf32>
    %cst_110 = arith.constant 1.000000e+00 : f32
    %465 = vector.broadcast %cst_110 : f32 to vector<8x128xf32>
    %466 = arith.addf %465, %464 : vector<8x128xf32>
    %467 = arith.divf %465, %466 : vector<8x128xf32>
    %468 = vector.extract_strided_slice %455 {offsets = [0, 256], sizes = [8, 128], strides = [1, 1]} : vector<8x512xf32> to vector<8x128xf32>
    %469 = math.tanh %468 : vector<8x128xf32>
    %470 = vector.extract_strided_slice %455 {offsets = [0, 384], sizes = [8, 128], strides = [1, 1]} : vector<8x512xf32> to vector<8x128xf32>
    %471 = arith.negf %470 : vector<8x128xf32>
    %472 = math.exp %471 : vector<8x128xf32>
    %cst_111 = arith.constant 1.000000e+00 : f32
    %473 = vector.broadcast %cst_111 : f32 to vector<8x128xf32>
    %474 = arith.addf %473, %472 : vector<8x128xf32>
    %475 = arith.divf %473, %474 : vector<8x128xf32>
    %476 = arith.mulf %467, %448 : vector<8x128xf32>
    %477 = arith.mulf %461, %469 : vector<8x128xf32>
    %478 = arith.addf %476, %477 : vector<8x128xf32>
    %479 = math.tanh %478 : vector<8x128xf32>
    %480 = arith.mulf %475, %479 : vector<8x128xf32>
    %c48_112 = arith.constant 48 : index
    %c0_113 = arith.constant 0 : index
    %481 = vector.load %arg9[%c48_112, %c0_113] : memref<64x128xf32, #tpu.memory_space<vmem>>, vector<8x128xf32>
    tpu.vector_store %arg9[%c48_112, %c0_113], %480 {strides = array<i32>} : memref<64x128xf32, #tpu.memory_space<vmem>>, vector<8x128xf32>,
    %482 = vector.extract_strided_slice %269 {offsets = [56, 0], sizes = [8, 512], strides = [1, 1]} : vector<64x512xf32> to vector<8x512xf32>
    %483 = arith.truncf %480 : vector<8x128xf32> to vector<8x128xbf16>
    %cst_114 = arith.constant dense<0.000000e+00> : vector<8x512xf32>
    %484 = tpu.matmul %483, %262, %cst_114 {dimension_numbers = #tpu.dot_dimension_numbers<[1], [0], [0], [1], [0, 0, 1, 1], [], []>} : vector<8x128xbf16>, vector<128x512xbf16>, vector<8x512xf32> -> vector<8x512xf32>
    %485 = arith.addf %482, %484 : vector<8x512xf32>
    %486 = vector.extract_strided_slice %485 {offsets = [0, 0], sizes = [8, 128], strides = [1, 1]} : vector<8x512xf32> to vector<8x128xf32>
    %487 = arith.negf %486 : vector<8x128xf32>
    %488 = math.exp %487 : vector<8x128xf32>
    %cst_115 = arith.constant 1.000000e+00 : f32
    %489 = vector.broadcast %cst_115 : f32 to vector<8x128xf32>
    %490 = arith.addf %489, %488 : vector<8x128xf32>
    %491 = arith.divf %489, %490 : vector<8x128xf32>
    %492 = vector.extract_strided_slice %485 {offsets = [0, 128], sizes = [8, 128], strides = [1, 1]} : vector<8x512xf32> to vector<8x128xf32>
    %493 = arith.negf %492 : vector<8x128xf32>
    %494 = math.exp %493 : vector<8x128xf32>
    %cst_116 = arith.constant 1.000000e+00 : f32
    %495 = vector.broadcast %cst_116 : f32 to vector<8x128xf32>
    %496 = arith.addf %495, %494 : vector<8x128xf32>
    %497 = arith.divf %495, %496 : vector<8x128xf32>
    %498 = vector.extract_strided_slice %485 {offsets = [0, 256], sizes = [8, 128], strides = [1, 1]} : vector<8x512xf32> to vector<8x128xf32>
    %499 = math.tanh %498 : vector<8x128xf32>
    %500 = vector.extract_strided_slice %485 {offsets = [0, 384], sizes = [8, 128], strides = [1, 1]} : vector<8x512xf32> to vector<8x128xf32>
    %501 = arith.negf %500 : vector<8x128xf32>
    %502 = math.exp %501 : vector<8x128xf32>
    %cst_117 = arith.constant 1.000000e+00 : f32
    %503 = vector.broadcast %cst_117 : f32 to vector<8x128xf32>
    %504 = arith.addf %503, %502 : vector<8x128xf32>
    %505 = arith.divf %503, %504 : vector<8x128xf32>
    %506 = arith.mulf %497, %478 : vector<8x128xf32>
    %507 = arith.mulf %491, %499 : vector<8x128xf32>
    %508 = arith.addf %506, %507 : vector<8x128xf32>
    %509 = math.tanh %508 : vector<8x128xf32>
    %510 = arith.mulf %505, %509 : vector<8x128xf32>
    %c56_118 = arith.constant 56 : index
    %c0_119 = arith.constant 0 : index
    %511 = vector.load %arg9[%c56_118, %c0_119] : memref<64x128xf32, #tpu.memory_space<vmem>>, vector<8x128xf32>
    tpu.vector_store %arg9[%c56_118, %c0_119], %510 {strides = array<i32>} : memref<64x128xf32, #tpu.memory_space<vmem>>, vector<8x128xf32>,
    %c1_120 = arith.constant 1 : index
    %c0_121 = arith.constant 0 : index
    %c0_122 = arith.constant 0 : index
    %512 = vector.load %arg7[%c1_120, %c0_121, %c0_122] : memref<3x8x128xf32, #tpu.memory_space<vmem>>, vector<1x8x128xf32>
    %513 = vector.shape_cast %512 : vector<1x8x128xf32> to vector<8x128xf32>
    %514 = vector.shape_cast %510 : vector<8x128xf32> to vector<1x8x128xf32>
    tpu.vector_store %arg7[%c1_120, %c0_121, %c0_122], %514 {strides = array<i32>} : memref<3x8x128xf32, #tpu.memory_space<vmem>>, vector<1x8x128xf32>,
    %c1_123 = arith.constant 1 : index
    %c0_124 = arith.constant 0 : index
    %c0_125 = arith.constant 0 : index
    %515 = vector.load %arg8[%c1_123, %c0_124, %c0_125] : memref<3x8x128xf32, #tpu.memory_space<vmem>>, vector<1x8x128xf32>
    %516 = vector.shape_cast %515 : vector<1x8x128xf32> to vector<8x128xf32>
    %517 = vector.shape_cast %508 : vector<8x128xf32> to vector<1x8x128xf32>
    tpu.vector_store %arg8[%c1_123, %c0_124, %c0_125], %517 {strides = array<i32>} : memref<3x8x128xf32, #tpu.memory_space<vmem>>, vector<1x8x128xf32>,
    %c2 = arith.constant 2 : index
    %c0_126 = arith.constant 0 : index
    %c0_127 = arith.constant 0 : index
    %518 = vector.load %arg1[%c2, %c0_126, %c0_127] : memref<3x128x512xbf16, #tpu.memory_space<vmem>>, vector<1x128x512xbf16>
    %519 = vector.shape_cast %518 : vector<1x128x512xbf16> to vector<128x512xbf16>
    %c2_128 = arith.constant 2 : index
    %c0_129 = arith.constant 0 : index
    %c0_130 = arith.constant 0 : index
    %520 = vector.load %arg2[%c2_128, %c0_129, %c0_130] : memref<3x128x512xbf16, #tpu.memory_space<vmem>>, vector<1x128x512xbf16>
    %521 = vector.shape_cast %520 : vector<1x128x512xbf16> to vector<128x512xbf16>
    %c2_131 = arith.constant 2 : index
    %c0_132 = arith.constant 0 : index
    %c0_133 = arith.constant 0 : index
    %522 = vector.load %arg3[%c2_131, %c0_132, %c0_133] : memref<3x1x512xf32, #tpu.memory_space<vmem>>, vector<1x1x512xf32>
    %523 = vector.shape_cast %522 : vector<1x1x512xf32> to vector<1x512xf32>
    %c0_134 = arith.constant 0 : index
    %c0_135 = arith.constant 0 : index
    %524 = vector.load %arg9[%c0_134, %c0_135] : memref<64x128xf32, #tpu.memory_space<vmem>>, vector<64x128xf32>
    %525 = arith.truncf %524 : vector<64x128xf32> to vector<64x128xbf16>
    %cst_136 = arith.constant dense<0.000000e+00> : vector<64x512xf32>
    %526 = tpu.matmul %525, %519, %cst_136 {dimension_numbers = #tpu.dot_dimension_numbers<[1], [0], [0], [1], [0, 0, 1, 1], [], []>} : vector<64x128xbf16>, vector<128x512xbf16>, vector<64x512xf32> -> vector<64x512xf32>
    %527 = vector.broadcast %523 : vector<1x512xf32> to vector<64x512xf32>
    %528 = arith.addf %526, %527 : vector<64x512xf32>
    %cst_137 = arith.constant 0.000000e+00 : f32
    %529 = vector.broadcast %cst_137 : f32 to vector<8x128xf32>
    %cst_138 = arith.constant 0.000000e+00 : f32
    %530 = vector.broadcast %cst_138 : f32 to vector<8x128xf32>
    %531 = vector.extract_strided_slice %528 {offsets = [0, 0], sizes = [8, 512], strides = [1, 1]} : vector<64x512xf32> to vector<8x512xf32>
    %532 = arith.truncf %529 : vector<8x128xf32> to vector<8x128xbf16>
    %cst_139 = arith.constant dense<0.000000e+00> : vector<8x512xf32>
    %533 = tpu.matmul %532, %521, %cst_139 {dimension_numbers = #tpu.dot_dimension_numbers<[1], [0], [0], [1], [0, 0, 1, 1], [], []>} : vector<8x128xbf16>, vector<128x512xbf16>, vector<8x512xf32> -> vector<8x512xf32>
    %534 = arith.addf %531, %533 : vector<8x512xf32>
    %535 = vector.extract_strided_slice %534 {offsets = [0, 0], sizes = [8, 128], strides = [1, 1]} : vector<8x512xf32> to vector<8x128xf32>
    %536 = arith.negf %535 : vector<8x128xf32>
    %537 = math.exp %536 : vector<8x128xf32>
    %cst_140 = arith.constant 1.000000e+00 : f32
    %538 = vector.broadcast %cst_140 : f32 to vector<8x128xf32>
    %539 = arith.addf %538, %537 : vector<8x128xf32>
    %540 = arith.divf %538, %539 : vector<8x128xf32>
    %541 = vector.extract_strided_slice %534 {offsets = [0, 128], sizes = [8, 128], strides = [1, 1]} : vector<8x512xf32> to vector<8x128xf32>
    %542 = arith.negf %541 : vector<8x128xf32>
    %543 = math.exp %542 : vector<8x128xf32>
    %cst_141 = arith.constant 1.000000e+00 : f32
    %544 = vector.broadcast %cst_141 : f32 to vector<8x128xf32>
    %545 = arith.addf %544, %543 : vector<8x128xf32>
    %546 = arith.divf %544, %545 : vector<8x128xf32>
    %547 = vector.extract_strided_slice %534 {offsets = [0, 256], sizes = [8, 128], strides = [1, 1]} : vector<8x512xf32> to vector<8x128xf32>
    %548 = math.tanh %547 : vector<8x128xf32>
    %549 = vector.extract_strided_slice %534 {offsets = [0, 384], sizes = [8, 128], strides = [1, 1]} : vector<8x512xf32> to vector<8x128xf32>
    %550 = arith.negf %549 : vector<8x128xf32>
    %551 = math.exp %550 : vector<8x128xf32>
    %cst_142 = arith.constant 1.000000e+00 : f32
    %552 = vector.broadcast %cst_142 : f32 to vector<8x128xf32>
    %553 = arith.addf %552, %551 : vector<8x128xf32>
    %554 = arith.divf %552, %553 : vector<8x128xf32>
    %555 = arith.mulf %546, %530 : vector<8x128xf32>
    %556 = arith.mulf %540, %548 : vector<8x128xf32>
    %557 = arith.addf %555, %556 : vector<8x128xf32>
    %558 = math.tanh %557 : vector<8x128xf32>
    %559 = arith.mulf %554, %558 : vector<8x128xf32>
    %c0_143 = arith.constant 0 : index
    %c0_144 = arith.constant 0 : index
    %560 = vector.load %arg9[%c0_143, %c0_144] : memref<64x128xf32, #tpu.memory_space<vmem>>, vector<8x128xf32>
    tpu.vector_store %arg9[%c0_143, %c0_144], %559 {strides = array<i32>} : memref<64x128xf32, #tpu.memory_space<vmem>>, vector<8x128xf32>,
    %561 = vector.extract_strided_slice %528 {offsets = [8, 0], sizes = [8, 512], strides = [1, 1]} : vector<64x512xf32> to vector<8x512xf32>
    %562 = arith.truncf %559 : vector<8x128xf32> to vector<8x128xbf16>
    %cst_145 = arith.constant dense<0.000000e+00> : vector<8x512xf32>
    %563 = tpu.matmul %562, %521, %cst_145 {dimension_numbers = #tpu.dot_dimension_numbers<[1], [0], [0], [1], [0, 0, 1, 1], [], []>} : vector<8x128xbf16>, vector<128x512xbf16>, vector<8x512xf32> -> vector<8x512xf32>
    %564 = arith.addf %561, %563 : vector<8x512xf32>
    %565 = vector.extract_strided_slice %564 {offsets = [0, 0], sizes = [8, 128], strides = [1, 1]} : vector<8x512xf32> to vector<8x128xf32>
    %566 = arith.negf %565 : vector<8x128xf32>
    %567 = math.exp %566 : vector<8x128xf32>
    %cst_146 = arith.constant 1.000000e+00 : f32
    %568 = vector.broadcast %cst_146 : f32 to vector<8x128xf32>
    %569 = arith.addf %568, %567 : vector<8x128xf32>
    %570 = arith.divf %568, %569 : vector<8x128xf32>
    %571 = vector.extract_strided_slice %564 {offsets = [0, 128], sizes = [8, 128], strides = [1, 1]} : vector<8x512xf32> to vector<8x128xf32>
    %572 = arith.negf %571 : vector<8x128xf32>
    %573 = math.exp %572 : vector<8x128xf32>
    %cst_147 = arith.constant 1.000000e+00 : f32
    %574 = vector.broadcast %cst_147 : f32 to vector<8x128xf32>
    %575 = arith.addf %574, %573 : vector<8x128xf32>
    %576 = arith.divf %574, %575 : vector<8x128xf32>
    %577 = vector.extract_strided_slice %564 {offsets = [0, 256], sizes = [8, 128], strides = [1, 1]} : vector<8x512xf32> to vector<8x128xf32>
    %578 = math.tanh %577 : vector<8x128xf32>
    %579 = vector.extract_strided_slice %564 {offsets = [0, 384], sizes = [8, 128], strides = [1, 1]} : vector<8x512xf32> to vector<8x128xf32>
    %580 = arith.negf %579 : vector<8x128xf32>
    %581 = math.exp %580 : vector<8x128xf32>
    %cst_148 = arith.constant 1.000000e+00 : f32
    %582 = vector.broadcast %cst_148 : f32 to vector<8x128xf32>
    %583 = arith.addf %582, %581 : vector<8x128xf32>
    %584 = arith.divf %582, %583 : vector<8x128xf32>
    %585 = arith.mulf %576, %557 : vector<8x128xf32>
    %586 = arith.mulf %570, %578 : vector<8x128xf32>
    %587 = arith.addf %585, %586 : vector<8x128xf32>
    %588 = math.tanh %587 : vector<8x128xf32>
    %589 = arith.mulf %584, %588 : vector<8x128xf32>
    %c8_149 = arith.constant 8 : index
    %c0_150 = arith.constant 0 : index
    %590 = vector.load %arg9[%c8_149, %c0_150] : memref<64x128xf32, #tpu.memory_space<vmem>>, vector<8x128xf32>
    tpu.vector_store %arg9[%c8_149, %c0_150], %589 {strides = array<i32>} : memref<64x128xf32, #tpu.memory_space<vmem>>, vector<8x128xf32>,
    %591 = vector.extract_strided_slice %528 {offsets = [16, 0], sizes = [8, 512], strides = [1, 1]} : vector<64x512xf32> to vector<8x512xf32>
    %592 = arith.truncf %589 : vector<8x128xf32> to vector<8x128xbf16>
    %cst_151 = arith.constant dense<0.000000e+00> : vector<8x512xf32>
    %593 = tpu.matmul %592, %521, %cst_151 {dimension_numbers = #tpu.dot_dimension_numbers<[1], [0], [0], [1], [0, 0, 1, 1], [], []>} : vector<8x128xbf16>, vector<128x512xbf16>, vector<8x512xf32> -> vector<8x512xf32>
    %594 = arith.addf %591, %593 : vector<8x512xf32>
    %595 = vector.extract_strided_slice %594 {offsets = [0, 0], sizes = [8, 128], strides = [1, 1]} : vector<8x512xf32> to vector<8x128xf32>
    %596 = arith.negf %595 : vector<8x128xf32>
    %597 = math.exp %596 : vector<8x128xf32>
    %cst_152 = arith.constant 1.000000e+00 : f32
    %598 = vector.broadcast %cst_152 : f32 to vector<8x128xf32>
    %599 = arith.addf %598, %597 : vector<8x128xf32>
    %600 = arith.divf %598, %599 : vector<8x128xf32>
    %601 = vector.extract_strided_slice %594 {offsets = [0, 128], sizes = [8, 128], strides = [1, 1]} : vector<8x512xf32> to vector<8x128xf32>
    %602 = arith.negf %601 : vector<8x128xf32>
    %603 = math.exp %602 : vector<8x128xf32>
    %cst_153 = arith.constant 1.000000e+00 : f32
    %604 = vector.broadcast %cst_153 : f32 to vector<8x128xf32>
    %605 = arith.addf %604, %603 : vector<8x128xf32>
    %606 = arith.divf %604, %605 : vector<8x128xf32>
    %607 = vector.extract_strided_slice %594 {offsets = [0, 256], sizes = [8, 128], strides = [1, 1]} : vector<8x512xf32> to vector<8x128xf32>
    %608 = math.tanh %607 : vector<8x128xf32>
    %609 = vector.extract_strided_slice %594 {offsets = [0, 384], sizes = [8, 128], strides = [1, 1]} : vector<8x512xf32> to vector<8x128xf32>
    %610 = arith.negf %609 : vector<8x128xf32>
    %611 = math.exp %610 : vector<8x128xf32>
    %cst_154 = arith.constant 1.000000e+00 : f32
    %612 = vector.broadcast %cst_154 : f32 to vector<8x128xf32>
    %613 = arith.addf %612, %611 : vector<8x128xf32>
    %614 = arith.divf %612, %613 : vector<8x128xf32>
    %615 = arith.mulf %606, %587 : vector<8x128xf32>
    %616 = arith.mulf %600, %608 : vector<8x128xf32>
    %617 = arith.addf %615, %616 : vector<8x128xf32>
    %618 = math.tanh %617 : vector<8x128xf32>
    %619 = arith.mulf %614, %618 : vector<8x128xf32>
    %c16_155 = arith.constant 16 : index
    %c0_156 = arith.constant 0 : index
    %620 = vector.load %arg9[%c16_155, %c0_156] : memref<64x128xf32, #tpu.memory_space<vmem>>, vector<8x128xf32>
    tpu.vector_store %arg9[%c16_155, %c0_156], %619 {strides = array<i32>} : memref<64x128xf32, #tpu.memory_space<vmem>>, vector<8x128xf32>,
    %621 = vector.extract_strided_slice %528 {offsets = [24, 0], sizes = [8, 512], strides = [1, 1]} : vector<64x512xf32> to vector<8x512xf32>
    %622 = arith.truncf %619 : vector<8x128xf32> to vector<8x128xbf16>
    %cst_157 = arith.constant dense<0.000000e+00> : vector<8x512xf32>
    %623 = tpu.matmul %622, %521, %cst_157 {dimension_numbers = #tpu.dot_dimension_numbers<[1], [0], [0], [1], [0, 0, 1, 1], [], []>} : vector<8x128xbf16>, vector<128x512xbf16>, vector<8x512xf32> -> vector<8x512xf32>
    %624 = arith.addf %621, %623 : vector<8x512xf32>
    %625 = vector.extract_strided_slice %624 {offsets = [0, 0], sizes = [8, 128], strides = [1, 1]} : vector<8x512xf32> to vector<8x128xf32>
    %626 = arith.negf %625 : vector<8x128xf32>
    %627 = math.exp %626 : vector<8x128xf32>
    %cst_158 = arith.constant 1.000000e+00 : f32
    %628 = vector.broadcast %cst_158 : f32 to vector<8x128xf32>
    %629 = arith.addf %628, %627 : vector<8x128xf32>
    %630 = arith.divf %628, %629 : vector<8x128xf32>
    %631 = vector.extract_strided_slice %624 {offsets = [0, 128], sizes = [8, 128], strides = [1, 1]} : vector<8x512xf32> to vector<8x128xf32>
    %632 = arith.negf %631 : vector<8x128xf32>
    %633 = math.exp %632 : vector<8x128xf32>
    %cst_159 = arith.constant 1.000000e+00 : f32
    %634 = vector.broadcast %cst_159 : f32 to vector<8x128xf32>
    %635 = arith.addf %634, %633 : vector<8x128xf32>
    %636 = arith.divf %634, %635 : vector<8x128xf32>
    %637 = vector.extract_strided_slice %624 {offsets = [0, 256], sizes = [8, 128], strides = [1, 1]} : vector<8x512xf32> to vector<8x128xf32>
    %638 = math.tanh %637 : vector<8x128xf32>
    %639 = vector.extract_strided_slice %624 {offsets = [0, 384], sizes = [8, 128], strides = [1, 1]} : vector<8x512xf32> to vector<8x128xf32>
    %640 = arith.negf %639 : vector<8x128xf32>
    %641 = math.exp %640 : vector<8x128xf32>
    %cst_160 = arith.constant 1.000000e+00 : f32
    %642 = vector.broadcast %cst_160 : f32 to vector<8x128xf32>
    %643 = arith.addf %642, %641 : vector<8x128xf32>
    %644 = arith.divf %642, %643 : vector<8x128xf32>
    %645 = arith.mulf %636, %617 : vector<8x128xf32>
    %646 = arith.mulf %630, %638 : vector<8x128xf32>
    %647 = arith.addf %645, %646 : vector<8x128xf32>
    %648 = math.tanh %647 : vector<8x128xf32>
    %649 = arith.mulf %644, %648 : vector<8x128xf32>
    %c24_161 = arith.constant 24 : index
    %c0_162 = arith.constant 0 : index
    %650 = vector.load %arg9[%c24_161, %c0_162] : memref<64x128xf32, #tpu.memory_space<vmem>>, vector<8x128xf32>
    tpu.vector_store %arg9[%c24_161, %c0_162], %649 {strides = array<i32>} : memref<64x128xf32, #tpu.memory_space<vmem>>, vector<8x128xf32>,
    %651 = vector.extract_strided_slice %528 {offsets = [32, 0], sizes = [8, 512], strides = [1, 1]} : vector<64x512xf32> to vector<8x512xf32>
    %652 = arith.truncf %649 : vector<8x128xf32> to vector<8x128xbf16>
    %cst_163 = arith.constant dense<0.000000e+00> : vector<8x512xf32>
    %653 = tpu.matmul %652, %521, %cst_163 {dimension_numbers = #tpu.dot_dimension_numbers<[1], [0], [0], [1], [0, 0, 1, 1], [], []>} : vector<8x128xbf16>, vector<128x512xbf16>, vector<8x512xf32> -> vector<8x512xf32>
    %654 = arith.addf %651, %653 : vector<8x512xf32>
    %655 = vector.extract_strided_slice %654 {offsets = [0, 0], sizes = [8, 128], strides = [1, 1]} : vector<8x512xf32> to vector<8x128xf32>
    %656 = arith.negf %655 : vector<8x128xf32>
    %657 = math.exp %656 : vector<8x128xf32>
    %cst_164 = arith.constant 1.000000e+00 : f32
    %658 = vector.broadcast %cst_164 : f32 to vector<8x128xf32>
    %659 = arith.addf %658, %657 : vector<8x128xf32>
    %660 = arith.divf %658, %659 : vector<8x128xf32>
    %661 = vector.extract_strided_slice %654 {offsets = [0, 128], sizes = [8, 128], strides = [1, 1]} : vector<8x512xf32> to vector<8x128xf32>
    %662 = arith.negf %661 : vector<8x128xf32>
    %663 = math.exp %662 : vector<8x128xf32>
    %cst_165 = arith.constant 1.000000e+00 : f32
    %664 = vector.broadcast %cst_165 : f32 to vector<8x128xf32>
    %665 = arith.addf %664, %663 : vector<8x128xf32>
    %666 = arith.divf %664, %665 : vector<8x128xf32>
    %667 = vector.extract_strided_slice %654 {offsets = [0, 256], sizes = [8, 128], strides = [1, 1]} : vector<8x512xf32> to vector<8x128xf32>
    %668 = math.tanh %667 : vector<8x128xf32>
    %669 = vector.extract_strided_slice %654 {offsets = [0, 384], sizes = [8, 128], strides = [1, 1]} : vector<8x512xf32> to vector<8x128xf32>
    %670 = arith.negf %669 : vector<8x128xf32>
    %671 = math.exp %670 : vector<8x128xf32>
    %cst_166 = arith.constant 1.000000e+00 : f32
    %672 = vector.broadcast %cst_166 : f32 to vector<8x128xf32>
    %673 = arith.addf %672, %671 : vector<8x128xf32>
    %674 = arith.divf %672, %673 : vector<8x128xf32>
    %675 = arith.mulf %666, %647 : vector<8x128xf32>
    %676 = arith.mulf %660, %668 : vector<8x128xf32>
    %677 = arith.addf %675, %676 : vector<8x128xf32>
    %678 = math.tanh %677 : vector<8x128xf32>
    %679 = arith.mulf %674, %678 : vector<8x128xf32>
    %c32_167 = arith.constant 32 : index
    %c0_168 = arith.constant 0 : index
    %680 = vector.load %arg9[%c32_167, %c0_168] : memref<64x128xf32, #tpu.memory_space<vmem>>, vector<8x128xf32>
    tpu.vector_store %arg9[%c32_167, %c0_168], %679 {strides = array<i32>} : memref<64x128xf32, #tpu.memory_space<vmem>>, vector<8x128xf32>,
    %681 = vector.extract_strided_slice %528 {offsets = [40, 0], sizes = [8, 512], strides = [1, 1]} : vector<64x512xf32> to vector<8x512xf32>
    %682 = arith.truncf %679 : vector<8x128xf32> to vector<8x128xbf16>
    %cst_169 = arith.constant dense<0.000000e+00> : vector<8x512xf32>
    %683 = tpu.matmul %682, %521, %cst_169 {dimension_numbers = #tpu.dot_dimension_numbers<[1], [0], [0], [1], [0, 0, 1, 1], [], []>} : vector<8x128xbf16>, vector<128x512xbf16>, vector<8x512xf32> -> vector<8x512xf32>
    %684 = arith.addf %681, %683 : vector<8x512xf32>
    %685 = vector.extract_strided_slice %684 {offsets = [0, 0], sizes = [8, 128], strides = [1, 1]} : vector<8x512xf32> to vector<8x128xf32>
    %686 = arith.negf %685 : vector<8x128xf32>
    %687 = math.exp %686 : vector<8x128xf32>
    %cst_170 = arith.constant 1.000000e+00 : f32
    %688 = vector.broadcast %cst_170 : f32 to vector<8x128xf32>
    %689 = arith.addf %688, %687 : vector<8x128xf32>
    %690 = arith.divf %688, %689 : vector<8x128xf32>
    %691 = vector.extract_strided_slice %684 {offsets = [0, 128], sizes = [8, 128], strides = [1, 1]} : vector<8x512xf32> to vector<8x128xf32>
    %692 = arith.negf %691 : vector<8x128xf32>
    %693 = math.exp %692 : vector<8x128xf32>
    %cst_171 = arith.constant 1.000000e+00 : f32
    %694 = vector.broadcast %cst_171 : f32 to vector<8x128xf32>
    %695 = arith.addf %694, %693 : vector<8x128xf32>
    %696 = arith.divf %694, %695 : vector<8x128xf32>
    %697 = vector.extract_strided_slice %684 {offsets = [0, 256], sizes = [8, 128], strides = [1, 1]} : vector<8x512xf32> to vector<8x128xf32>
    %698 = math.tanh %697 : vector<8x128xf32>
    %699 = vector.extract_strided_slice %684 {offsets = [0, 384], sizes = [8, 128], strides = [1, 1]} : vector<8x512xf32> to vector<8x128xf32>
    %700 = arith.negf %699 : vector<8x128xf32>
    %701 = math.exp %700 : vector<8x128xf32>
    %cst_172 = arith.constant 1.000000e+00 : f32
    %702 = vector.broadcast %cst_172 : f32 to vector<8x128xf32>
    %703 = arith.addf %702, %701 : vector<8x128xf32>
    %704 = arith.divf %702, %703 : vector<8x128xf32>
    %705 = arith.mulf %696, %677 : vector<8x128xf32>
    %706 = arith.mulf %690, %698 : vector<8x128xf32>
    %707 = arith.addf %705, %706 : vector<8x128xf32>
    %708 = math.tanh %707 : vector<8x128xf32>
    %709 = arith.mulf %704, %708 : vector<8x128xf32>
    %c40_173 = arith.constant 40 : index
    %c0_174 = arith.constant 0 : index
    %710 = vector.load %arg9[%c40_173, %c0_174] : memref<64x128xf32, #tpu.memory_space<vmem>>, vector<8x128xf32>
    tpu.vector_store %arg9[%c40_173, %c0_174], %709 {strides = array<i32>} : memref<64x128xf32, #tpu.memory_space<vmem>>, vector<8x128xf32>,
    %711 = vector.extract_strided_slice %528 {offsets = [48, 0], sizes = [8, 512], strides = [1, 1]} : vector<64x512xf32> to vector<8x512xf32>
    %712 = arith.truncf %709 : vector<8x128xf32> to vector<8x128xbf16>
    %cst_175 = arith.constant dense<0.000000e+00> : vector<8x512xf32>
    %713 = tpu.matmul %712, %521, %cst_175 {dimension_numbers = #tpu.dot_dimension_numbers<[1], [0], [0], [1], [0, 0, 1, 1], [], []>} : vector<8x128xbf16>, vector<128x512xbf16>, vector<8x512xf32> -> vector<8x512xf32>
    %714 = arith.addf %711, %713 : vector<8x512xf32>
    %715 = vector.extract_strided_slice %714 {offsets = [0, 0], sizes = [8, 128], strides = [1, 1]} : vector<8x512xf32> to vector<8x128xf32>
    %716 = arith.negf %715 : vector<8x128xf32>
    %717 = math.exp %716 : vector<8x128xf32>
    %cst_176 = arith.constant 1.000000e+00 : f32
    %718 = vector.broadcast %cst_176 : f32 to vector<8x128xf32>
    %719 = arith.addf %718, %717 : vector<8x128xf32>
    %720 = arith.divf %718, %719 : vector<8x128xf32>
    %721 = vector.extract_strided_slice %714 {offsets = [0, 128], sizes = [8, 128], strides = [1, 1]} : vector<8x512xf32> to vector<8x128xf32>
    %722 = arith.negf %721 : vector<8x128xf32>
    %723 = math.exp %722 : vector<8x128xf32>
    %cst_177 = arith.constant 1.000000e+00 : f32
    %724 = vector.broadcast %cst_177 : f32 to vector<8x128xf32>
    %725 = arith.addf %724, %723 : vector<8x128xf32>
    %726 = arith.divf %724, %725 : vector<8x128xf32>
    %727 = vector.extract_strided_slice %714 {offsets = [0, 256], sizes = [8, 128], strides = [1, 1]} : vector<8x512xf32> to vector<8x128xf32>
    %728 = math.tanh %727 : vector<8x128xf32>
    %729 = vector.extract_strided_slice %714 {offsets = [0, 384], sizes = [8, 128], strides = [1, 1]} : vector<8x512xf32> to vector<8x128xf32>
    %730 = arith.negf %729 : vector<8x128xf32>
    %731 = math.exp %730 : vector<8x128xf32>
    %cst_178 = arith.constant 1.000000e+00 : f32
    %732 = vector.broadcast %cst_178 : f32 to vector<8x128xf32>
    %733 = arith.addf %732, %731 : vector<8x128xf32>
    %734 = arith.divf %732, %733 : vector<8x128xf32>
    %735 = arith.mulf %726, %707 : vector<8x128xf32>
    %736 = arith.mulf %720, %728 : vector<8x128xf32>
    %737 = arith.addf %735, %736 : vector<8x128xf32>
    %738 = math.tanh %737 : vector<8x128xf32>
    %739 = arith.mulf %734, %738 : vector<8x128xf32>
    %c48_179 = arith.constant 48 : index
    %c0_180 = arith.constant 0 : index
    %740 = vector.load %arg9[%c48_179, %c0_180] : memref<64x128xf32, #tpu.memory_space<vmem>>, vector<8x128xf32>
    tpu.vector_store %arg9[%c48_179, %c0_180], %739 {strides = array<i32>} : memref<64x128xf32, #tpu.memory_space<vmem>>, vector<8x128xf32>,
    %741 = vector.extract_strided_slice %528 {offsets = [56, 0], sizes = [8, 512], strides = [1, 1]} : vector<64x512xf32> to vector<8x512xf32>
    %742 = arith.truncf %739 : vector<8x128xf32> to vector<8x128xbf16>
    %cst_181 = arith.constant dense<0.000000e+00> : vector<8x512xf32>
    %743 = tpu.matmul %742, %521, %cst_181 {dimension_numbers = #tpu.dot_dimension_numbers<[1], [0], [0], [1], [0, 0, 1, 1], [], []>} : vector<8x128xbf16>, vector<128x512xbf16>, vector<8x512xf32> -> vector<8x512xf32>
    %744 = arith.addf %741, %743 : vector<8x512xf32>
    %745 = vector.extract_strided_slice %744 {offsets = [0, 0], sizes = [8, 128], strides = [1, 1]} : vector<8x512xf32> to vector<8x128xf32>
    %746 = arith.negf %745 : vector<8x128xf32>
    %747 = math.exp %746 : vector<8x128xf32>
    %cst_182 = arith.constant 1.000000e+00 : f32
    %748 = vector.broadcast %cst_182 : f32 to vector<8x128xf32>
    %749 = arith.addf %748, %747 : vector<8x128xf32>
    %750 = arith.divf %748, %749 : vector<8x128xf32>
    %751 = vector.extract_strided_slice %744 {offsets = [0, 128], sizes = [8, 128], strides = [1, 1]} : vector<8x512xf32> to vector<8x128xf32>
    %752 = arith.negf %751 : vector<8x128xf32>
    %753 = math.exp %752 : vector<8x128xf32>
    %cst_183 = arith.constant 1.000000e+00 : f32
    %754 = vector.broadcast %cst_183 : f32 to vector<8x128xf32>
    %755 = arith.addf %754, %753 : vector<8x128xf32>
    %756 = arith.divf %754, %755 : vector<8x128xf32>
    %757 = vector.extract_strided_slice %744 {offsets = [0, 256], sizes = [8, 128], strides = [1, 1]} : vector<8x512xf32> to vector<8x128xf32>
    %758 = math.tanh %757 : vector<8x128xf32>
    %759 = vector.extract_strided_slice %744 {offsets = [0, 384], sizes = [8, 128], strides = [1, 1]} : vector<8x512xf32> to vector<8x128xf32>
    %760 = arith.negf %759 : vector<8x128xf32>
    %761 = math.exp %760 : vector<8x128xf32>
    %cst_184 = arith.constant 1.000000e+00 : f32
    %762 = vector.broadcast %cst_184 : f32 to vector<8x128xf32>
    %763 = arith.addf %762, %761 : vector<8x128xf32>
    %764 = arith.divf %762, %763 : vector<8x128xf32>
    %765 = arith.mulf %756, %737 : vector<8x128xf32>
    %766 = arith.mulf %750, %758 : vector<8x128xf32>
    %767 = arith.addf %765, %766 : vector<8x128xf32>
    %768 = math.tanh %767 : vector<8x128xf32>
    %769 = arith.mulf %764, %768 : vector<8x128xf32>
    %c56_185 = arith.constant 56 : index
    %c0_186 = arith.constant 0 : index
    %770 = vector.load %arg9[%c56_185, %c0_186] : memref<64x128xf32, #tpu.memory_space<vmem>>, vector<8x128xf32>
    tpu.vector_store %arg9[%c56_185, %c0_186], %769 {strides = array<i32>} : memref<64x128xf32, #tpu.memory_space<vmem>>, vector<8x128xf32>,
    %c2_187 = arith.constant 2 : index
    %c0_188 = arith.constant 0 : index
    %c0_189 = arith.constant 0 : index
    %771 = vector.load %arg7[%c2_187, %c0_188, %c0_189] : memref<3x8x128xf32, #tpu.memory_space<vmem>>, vector<1x8x128xf32>
    %772 = vector.shape_cast %771 : vector<1x8x128xf32> to vector<8x128xf32>
    %773 = vector.shape_cast %769 : vector<8x128xf32> to vector<1x8x128xf32>
    tpu.vector_store %arg7[%c2_187, %c0_188, %c0_189], %773 {strides = array<i32>} : memref<3x8x128xf32, #tpu.memory_space<vmem>>, vector<1x8x128xf32>,
    %c2_190 = arith.constant 2 : index
    %c0_191 = arith.constant 0 : index
    %c0_192 = arith.constant 0 : index
    %774 = vector.load %arg8[%c2_190, %c0_191, %c0_192] : memref<3x8x128xf32, #tpu.memory_space<vmem>>, vector<1x8x128xf32>
    %775 = vector.shape_cast %774 : vector<1x8x128xf32> to vector<8x128xf32>
    %776 = vector.shape_cast %767 : vector<8x128xf32> to vector<1x8x128xf32>
    tpu.vector_store %arg8[%c2_190, %c0_191, %c0_192], %776 {strides = array<i32>} : memref<3x8x128xf32, #tpu.memory_space<vmem>>, vector<1x8x128xf32>,
    %c0_193 = arith.constant 0 : index
    %c0_194 = arith.constant 0 : index
    %777 = vector.load %arg9[%c0_193, %c0_194] : memref<64x128xf32, #tpu.memory_space<vmem>>, vector<64x128xf32>
    %778 = arith.truncf %777 : vector<64x128xf32> to vector<64x128xbf16>
    %c0_195 = arith.constant 0 : index
    %c0_196 = arith.constant 0 : index
    %779 = vector.load %arg4[%c0_195, %c0_196] : memref<128x128xbf16, #tpu.memory_space<vmem>>, vector<128x128xbf16>
    %cst_197 = arith.constant dense<0.000000e+00> : vector<64x128xf32>
    %780 = tpu.matmul %778, %779, %cst_197 {dimension_numbers = #tpu.dot_dimension_numbers<[1], [0], [0], [1], [0, 0, 1, 1], [], []>} : vector<64x128xbf16>, vector<128x128xbf16>, vector<64x128xf32> -> vector<64x128xf32>
    %c0_198 = arith.constant 0 : index
    %c0_199 = arith.constant 0 : index
    %781 = vector.load %arg5[%c0_198, %c0_199] : memref<1x128xf32, #tpu.memory_space<vmem>>, vector<1x128xf32>
    %782 = vector.broadcast %781 : vector<1x128xf32> to vector<64x128xf32>
    %783 = arith.addf %780, %782 : vector<64x128xf32>
    %c0_200 = arith.constant 0 : index
    %c0_201 = arith.constant 0 : index
    %784 = vector.load %arg6[%c0_200, %c0_201] : memref<64x128xf32, #tpu.memory_space<vmem>>, vector<64x128xf32>
    tpu.vector_store %arg6[%c0_200, %c0_201], %783 {strides = array<i32>} : memref<64x128xf32, #tpu.memory_space<vmem>>, vector<64x128xf32>,
    return
  }
}

</mosaic_0001>

<bundles_post_ra>
// kernel: tpu_custom_call.1
= control target key start
LH: loop header
LB: loop body
LE: loop exit
PB: predicated region body
PF: predicated region fallthrough
CT: control target
= control target key end

     0   :  { %14 = vsyncpa [#allocation4], 0  ;;  %s7954_s0 = inlined_call_operand.hbm [shape: f32[64,128], index: 0, kind: input, shape index: {}]   ;;  %s7955_s1 = inlined_call_operand.hbm [shape: bf16[3,128,512], index: 1, kind: input, shape index: {}]   ;;  %s7956_s2 = inlined_call_operand.hbm [shape: bf16[3,128,512], index: 2, kind: input, shape index: {}]   ;;  %s7957_s3 = inlined_call_operand.hbm [shape: f32[3,1,512], index: 3, kind: input, shape index: {}]   ;;  %s7958_s4 = inlined_call_operand.hbm [shape: bf16[128,128], index: 4, kind: input, shape index: {}]   ;;  %s7959_s5 = inlined_call_operand.vmem [shape: f32[1,128], index: 5, kind: input, shape index: {}]   ;;  %s7960_s6 = inlined_call_operand.hbm [shape: f32[64,128], index: 6, kind: output, shape index: {0}]   ;;  %s7961_s7 = inlined_call_operand.hbm [shape: f32[3,8,128], index: 7, kind: output, shape index: {1}]   ;;  %s7962_s8 = inlined_call_operand.hbm [shape: f32[3,8,128], index: 8, kind: output, shape index: {2}]  }
   0x1   :  { %15 = vsyncpa [#allocation7], 0 }
   0x2   :  { %16 = vsyncpa [#allocation10], 0 }
   0x3   :  { %17 = vsyncpa [#allocation5], 0 }
   0x4   :  { %18 = vsyncpa [#allocation14], 0  ;;  %s5982_s27 = smov [#allocation6]   ;;  %s5796_s9 = scalar_lea.hbm %s7955_s1, 12288 }
   0x5   :  { %s36_s28 = sshll.u32 %s5982_s27, 4  ;;  %p5797_p0 = scmp.ne.s32.totalorder %s7955_s1, %s5796_s9  ;;  %s37_s28 = int_to_ptr.vmem [resolvable:$true] %s36_s28 }
   0x6   :  { %p5800_p1 = scmp.lt.u32.totalorder %s5796_s9, %s7955_s1 }
   0x8   :  { %p5802_p2 = pnand %p5800_p1, %p5797_p0 }
   0xa   :  { %5805 = shalt.err (!%p5802_p2)
}
   0xb   :  { %s5806_s14 = scalar_lea.vmem %s37_s28, 12288  ;;  %p5811_p4 = scmp.lt.s32.totalorder %s37_s28, %s37_s28 }
   0xc   :  { %p5807_p3 = scmp.ne.s32.totalorder %s37_s28, %s5806_s14  ;;  %p5812_p5 = scmp.lt.s32.totalorder %s5806_s14, %s5806_s14 }
   0xe   :  { %p5813_p6 = por %p5812_p5, %p5811_p4 }
  0x10   :  { %p5814_p7 = pnand %p5813_p6, %p5807_p3 }
  0x12   :  { %5817 = shalt.err (!%p5814_p7)
}
  0x13   :  { %s5983_s15 = smov 256   ;;  %s5984_s16 = smov 16  }
  0x14   :  { %42 = dma.hbm_to_vmem [thread:$0]  %s7955_s1, 12288, %s37_s28, [#allocation7], %s5983_s15, %s5983_s15, %s5984_s16  }
  0x15   :  { %s5985_s19 = smov [#allocation9]   ;;  %s5818_s23 = scalar_lea.hbm %s7957_s3, 192 }
  0x16   :  { %s60_s20 = sshll.u32 %s5985_s19, 4  ;;  %p5819_p8 = scmp.ne.s32.totalorder %s7957_s3, %s5818_s23  ;;  %s61_s20 = int_to_ptr.vmem [resolvable:$true] %s60_s20 }
  0x17   :  { %p5822_p9 = scmp.lt.u32.totalorder %s5818_s23, %s7957_s3 }
  0x19   :  { %p5824_p10 = pnand %p5822_p9, %p5819_p8 }
  0x1b   :  { %5827 = shalt.err (!%p5824_p10)
}
  0x1c   :  { %s5828_s29 = scalar_lea.vmem %s61_s20, 192  ;;  %p5833_p12 = scmp.lt.s32.totalorder %s61_s20, %s61_s20 }
  0x1d   :  { %p5829_p11 = scmp.ne.s32.totalorder %s61_s20, %s5828_s29  ;;  %p5834_p13 = scmp.lt.s32.totalorder %s5828_s29, %s5828_s29 }
  0x1f   :  { %p5835_p0 = por %p5834_p13, %p5833_p12 }
  0x21   :  { %p5836_p1 = pnand %p5835_p0, %p5829_p11 }
  0x23   :  { %5839 = shalt.err (!%p5836_p1)
}
  0x24   :  { %s5986_s1 = smov 64   ;;  %s5987_s28 = smov 4  }
  0x25   :  { %66 = dma.hbm_to_vmem [thread:$0]  %s7957_s3, 192, %s61_s20, [#allocation10], %s5986_s1, %s5986_s1, %s5987_s28  }
  0x26   :  { %s5988_s10 = smov [#allocation3]   ;;  %s5840_s14 = scalar_lea.hbm %s7954_s0, 1024 }
  0x27   :  { %s24_s11 = sshll.u32 %s5988_s10, 4  ;;  %p5841_p2 = scmp.ne.s32.totalorder %s7954_s0, %s5840_s14  ;;  %s25_s11 = int_to_ptr.vmem [resolvable:$true] %s24_s11 }
  0x28   :  { %p5844_p3 = scmp.lt.u32.totalorder %s5840_s14, %s7954_s0 }
  0x2a   :  { %p5846_p4 = pnand %p5844_p3, %p5841_p2 }
  0x2c   :  { %5849 = shalt.err (!%p5846_p4)
}
  0x2d   :  { %s5850_s22 = scalar_lea.vmem %s25_s11, 1024  ;;  %p5855_p6 = scmp.lt.s32.totalorder %s25_s11, %s25_s11 }
  0x2e   :  { %p5851_p5 = scmp.ne.s32.totalorder %s25_s11, %s5850_s22  ;;  %p5856_p7 = scmp.lt.s32.totalorder %s5850_s22, %s5850_s22 }
  0x30   :  { %p5857_p8 = por %p5856_p7, %p5855_p6 }
  0x32   :  { %p5858_p9 = pnand %p5857_p8, %p5851_p5 }
  0x34   :  { %5861 = shalt.err (!%p5858_p9)
}
  0x35   :  { %s5989_s3 = smov 128   ;;  %s5990_s20 = smov 8  }
  0x36   :  { %30 = dma.hbm_to_vmem [thread:$0]  %s7954_s0, 1024, %s25_s11, [#allocation4], %s5989_s3, %s5989_s3, %s5990_s20  }
  0x37   :  { %s5991_s25 = smov [#allocation8]   ;;  %s5992_s27 = smov [#allocation11]  }
  0x38   :  { %s48_s26 = sshll.u32 %s5991_s25, 4  ;;  %s72_s29 = sshll.u32 %s5992_s27, 4  ;;  %s49_s26 = int_to_ptr.vmem [resolvable:$true] %s48_s26  ;;  %s73_s29 = int_to_ptr.vmem [resolvable:$true] %s72_s29 }
  0x39   :  { %s5862_s10 = scalar_lea.hbm %s7956_s2, 12288 }
  0x3a   :  { %p5863_p10 = scmp.ne.s32.totalorder %s7956_s2, %s5862_s10  ;;  %p5866_p11 = scmp.lt.u32.totalorder %s5862_s10, %s7956_s2 }
  0x3c   :  { %p5868_p12 = pnand %p5866_p11, %p5863_p10 }
  0x3e   :  { %5871 = shalt.err (!%p5868_p12)
}
  0x3f   :  { %s5872_s0 = scalar_lea.vmem %s49_s26, 12288  ;;  %p5877_p0 = scmp.lt.s32.totalorder %s49_s26, %s49_s26 }
  0x40   :  { %p5873_p13 = scmp.ne.s32.totalorder %s49_s26, %s5872_s0  ;;  %p5878_p1 = scmp.lt.s32.totalorder %s5872_s0, %s5872_s0 }
  0x42   :  { %p5879_p2 = por %p5878_p1, %p5877_p0 }
  0x44   :  { %p5880_p3 = pnand %p5879_p2, %p5873_p13 }
  0x46   :  { %5883 = shalt.err (!%p5880_p3)
}
  0x47   :  { %54 = dma.hbm_to_vmem [thread:$0]  %s7956_s2, 12288, %s49_s26, [#allocation7], %s5983_s15, %s5983_s15, %s5984_s16  }
  0x48   :  { %s5884_s22 = scalar_lea.hbm %s7958_s4, 1024 }
  0x49   :  { %p5885_p4 = scmp.ne.s32.totalorder %s7958_s4, %s5884_s22  ;;  %p5888_p5 = scmp.lt.u32.totalorder %s5884_s22, %s7958_s4 }
  0x4b   :  { %p5890_p6 = pnand %p5888_p5, %p5885_p4 }
  0x4d   :  { %5893 = shalt.err (!%p5890_p6)
}
  0x4e   :  { %s5894_s30 = scalar_lea.vmem %s73_s29, 1024  ;;  %p5899_p8 = scmp.lt.s32.totalorder %s73_s29, %s73_s29 }
  0x4f   :  { %p5895_p7 = scmp.ne.s32.totalorder %s73_s29, %s5894_s30  ;;  %p5900_p9 = scmp.lt.s32.totalorder %s5894_s30, %s5894_s30 }
  0x51   :  { %p5901_p10 = por %p5900_p9, %p5899_p8 }
  0x53   :  { %p5902_p11 = pnand %p5901_p10, %p5895_p7 }
  0x55   :  { %5905 = shalt.err (!%p5902_p11)
}
  0x56   :  { %78 = dma.hbm_to_vmem [thread:$0]  %s7958_s4, 1024, %s73_s29, [#allocation10], %s5986_s1, %s5986_s1, %s5987_s28  }
  0x57   :  { %5972 = dma.done.wait [#allocation4], 1024  }
  0x58   :  { %5973 = vsyncadd [#allocation4], 4294966272 }
  0x59   :  { %5974 = dma.done.wait [#allocation7], 24576  }
  0x5a   :  { %5975 = vsyncadd [#allocation7], 4294942720 }
  0x5b   :  { %5976 = dma.done.wait [#allocation10], 1216  }
  0x5c   :  { %5977 = vsyncadd [#allocation10], 4294966080  ;;  %v7963_v0 = vmov 0   ;;  %v5020_v1 = vld [vmem:[#allocation6 + $0x4] ss:$16 sps:$4 sm:$0xff]   ;;  %v163_v33 = vld [vmem:[#allocation3 + $0x8] sm:$0xff] }
  0x5d   :  { %387 = vmatprep.mubr.bf16.mxu1 %v7963_v0  ;;  %693 = vmatprep.mubr.bf16.mxu0 %v7963_v0  ;;  %v5022_v2 = vld [vmem:[#allocation6] ss:$16 sps:$4 sm:$0xff]   ;;  %v6119_v3 = vld [vmem:[#allocation8 + $0x4] ss:$16 sps:$4 sm:$0xff]   ;;  %v5070_v34 = vld [vmem:[#allocation6 + $0xc] ss:$16 sps:$4 sm:$0xff]  }
  0x5e   :  { %355 = vmatprep.subr.bf16.mxu1 %v5020_v1  ;;  %v6121_v4 = vld [vmem:[#allocation8] ss:$16 sps:$4 sm:$0xff]   ;;  %v5026_v5 = vld [vmem:[#allocation6 + $0x24] ss:$16 sps:$4 sm:$0xff]   ;;  %661 = vmatprep.subr.bf16.mxu0 %v6119_v3  ;;  %v5068_v37 = vld [vmem:[#allocation6 + $0x8] ss:$16 sps:$4 sm:$0xff]  }
  0x5f   :  { %356 = vmatpush1.bf16.msra.mxu1 %v5022_v2  ;;  %v5028_v6 = vld [vmem:[#allocation6 + $0x20] ss:$16 sps:$4 sm:$0xff]   ;;  %v6124_v7 = vld [vmem:[#allocation8 + $0x24] ss:$16 sps:$4 sm:$0xff]   ;;  %662 = vmatpush1.bf16.msra.mxu0 %v6121_v4  ;;  %v5073_v38 = vld [vmem:[#allocation6 + $0x2c] ss:$16 sps:$4 sm:$0xff]  }
  0x60   :  { %357 = vmatprep.subr.bf16.mxu1 %v5026_v5  ;;  %v6127_v8 = vld [vmem:[#allocation8 + $0x20] ss:$16 sps:$4 sm:$0xff]   ;;  %663 = vmatprep.subr.bf16.mxu0 %v6124_v7  ;;  %v5032_v9 = vld [vmem:[#allocation6 + $0x44] ss:$16 sps:$4 sm:$0xff]   ;;  %v5071_v39 = vld [vmem:[#allocation6 + $0x28] ss:$16 sps:$4 sm:$0xff]  }
  0x61   :  { %v5034_v10 = vld [vmem:[#allocation6 + $0x40] ss:$16 sps:$4 sm:$0xff]   ;;  %v6130_v11 = vld [vmem:[#allocation8 + $0x44] ss:$16 sps:$4 sm:$0xff]   ;;  %v165_v41 = vld [vmem:[#allocation3 + $0x18] sm:$0xff] }
  0x62   :  { %v5038_v12 = vld [vmem:[#allocation6 + $0x64] ss:$16 sps:$4 sm:$0xff]   ;;  %v6133_v13 = vld [vmem:[#allocation8 + $0x40] ss:$16 sps:$4 sm:$0xff]   ;;  %v5076_v42 = vld [vmem:[#allocation6 + $0x4c] ss:$16 sps:$4 sm:$0xff]  }
  0x63   :  { %358 = vmatpush1.bf16.msra.mxu1 %v5028_v6  ;;  %664 = vmatpush1.bf16.msra.mxu0 %v6127_v8  ;;  %v6136_v14 = vld [vmem:[#allocation8 + $0x64] ss:$16 sps:$4 sm:$0xff]   ;;  %v5040_v15 = vld [vmem:[#allocation6 + $0x60] ss:$16 sps:$4 sm:$0xff]   ;;  %v5074_v44 = vld [vmem:[#allocation6 + $0x48] ss:$16 sps:$4 sm:$0xff]  }
  0x64   :  { %359 = vmatprep.subr.bf16.mxu1 %v5032_v9  ;;  %665 = vmatprep.subr.bf16.mxu0 %v6130_v11  ;;  %v5044_v16 = vld [vmem:[#allocation6 + $0x84] ss:$16 sps:$4 sm:$0xff]   ;;  %v6139_v17 = vld [vmem:[#allocation8 + $0x60] ss:$16 sps:$4 sm:$0xff]   ;;  %v5079_v45 = vld [vmem:[#allocation6 + $0x6c] ss:$16 sps:$4 sm:$0xff]  }
  0x65   :  { %v6142_v18 = vld [vmem:[#allocation8 + $0x84] ss:$16 sps:$4 sm:$0xff]   ;;  %v5046_v19 = vld [vmem:[#allocation6 + $0x80] ss:$16 sps:$4 sm:$0xff]   ;;  %v5077_v46 = vld [vmem:[#allocation6 + $0x68] ss:$16 sps:$4 sm:$0xff]  }
  0x66   :  { %v5050_v20 = vld [vmem:[#allocation6 + $0xa4] ss:$16 sps:$4 sm:$0xff]   ;;  %v6145_v21 = vld [vmem:[#allocation8 + $0x80] ss:$16 sps:$4 sm:$0xff]   ;;  %v167_v48 = vld [vmem:[#allocation3 + $0x28] sm:$0xff] }
  0x67   :  { %360 = vmatpush1.bf16.msra.mxu1 %v5034_v10  ;;  %666 = vmatpush1.bf16.msra.mxu0 %v6133_v13  ;;  %v6148_v22 = vld [vmem:[#allocation8 + $0xa4] ss:$16 sps:$4 sm:$0xff]   ;;  %v5052_v23 = vld [vmem:[#allocation6 + $0xa0] ss:$16 sps:$4 sm:$0xff]   ;;  %v5082_v49 = vld [vmem:[#allocation6 + $0x8c] ss:$16 sps:$4 sm:$0xff]  }
  0x68   :  { %361 = vmatprep.subr.bf16.mxu1 %v5038_v12  ;;  %667 = vmatprep.subr.bf16.mxu0 %v6136_v14  ;;  %v5056_v24 = vld [vmem:[#allocation6 + $0xc4] ss:$16 sps:$4 sm:$0xff]   ;;  %v6151_v25 = vld [vmem:[#allocation8 + $0xa0] ss:$16 sps:$4 sm:$0xff]   ;;  %v5080_v50 = vld [vmem:[#allocation6 + $0x88] ss:$16 sps:$4 sm:$0xff]  }
  0x69   :  { %v6154_v26 = vld [vmem:[#allocation8 + $0xc4] ss:$16 sps:$4 sm:$0xff]   ;;  %v5058_v27 = vld [vmem:[#allocation6 + $0xc0] ss:$16 sps:$4 sm:$0xff]   ;;  %v5085_v52 = vld [vmem:[#allocation6 + $0xac] ss:$16 sps:$4 sm:$0xff]  }
  0x6a   :  { %v5062_v28 = vld [vmem:[#allocation6 + $0xe4] ss:$16 sps:$4 sm:$0xff]   ;;  %v6157_v29 = vld [vmem:[#allocation8 + $0xc0] ss:$16 sps:$4 sm:$0xff]   ;;  %v5083_v53 = vld [vmem:[#allocation6 + $0xa8] ss:$16 sps:$4 sm:$0xff]  }
  0x6b   :  { %362 = vmatpush1.bf16.msra.mxu1 %v5040_v15  ;;  %668 = vmatpush1.bf16.msra.mxu0 %v6139_v17  ;;  %v5064_v30 = vld [vmem:[#allocation6 + $0xe0] ss:$16 sps:$4 sm:$0xff]   ;;  %v6160_v31 = vld [vmem:[#allocation8 + $0xe4] ss:$16 sps:$4 sm:$0xff]   ;;  %v169_v55 = vld [vmem:[#allocation3 + $0x38] sm:$0xff] }
  0x6c   :  { %363 = vmatprep.subr.bf16.mxu1 %v5044_v16  ;;  %669 = vmatprep.subr.bf16.mxu0 %v6142_v18  ;;  %v162_v32 = vld [vmem:[#allocation3] sm:$0xff]  ;;  %v164_v40 = vld [vmem:[#allocation3 + $0x10] sm:$0xff]  ;;  %v5088_v56 = vld [vmem:[#allocation6 + $0xcc] ss:$16 sps:$4 sm:$0xff]  }
  0x6d   :  { %v6163_v35 = vld [vmem:[#allocation8 + $0xe0] ss:$16 sps:$4 sm:$0xff]   ;;  %v6166_v36 = vpack.c.bf16 %v163_v33, %v162_v32  ;;  %v6175_v43 = vpack.c.bf16 %v165_v41, %v164_v40  ;;  %v5086_v57 = vld [vmem:[#allocation6 + $0xc8] ss:$16 sps:$4 sm:$0xff]   ;;  %v5091_v59 = vld [vmem:[#allocation6 + $0xec] ss:$16 sps:$4 sm:$0xff]  }
  0x6e   :  { %v166_v47 = vld [vmem:[#allocation3 + $0x20] sm:$0xff]  ;;  %v168_v54 = vld [vmem:[#allocation3 + $0x30] sm:$0xff]  ;;  %v5089_v60 = vld [vmem:[#allocation6 + $0xe8] ss:$16 sps:$4 sm:$0xff]  }
  0x6f   :  { %364 = vmatpush1.bf16.msra.mxu1 %v5046_v19  ;;  %670 = vmatpush1.bf16.msra.mxu0 %v6145_v21  ;;  %v172_v51 = vpack.c.bf16 %v167_v48, %v166_v47  ;;  %v173_v58 = vpack.c.bf16 %v169_v55, %v168_v54  ;;  %v6190_v61 = vld [vmem:[#allocation8 + $0xc] ss:$16 sps:$4 sm:$0xff]   ;;  %v6194_v62 = vld [vmem:[#allocation8 + $0x8] ss:$16 sps:$4 sm:$0xff]  }
  0x70   :  { %365 = vmatprep.subr.bf16.mxu1 %v5050_v20  ;;  %671 = vmatprep.subr.bf16.mxu0 %v6148_v22  ;;  %v6197_v63 = vld [vmem:[#allocation8 + $0x2c] ss:$16 sps:$4 sm:$0xff]   ;;  %v6201_v1 = vld [vmem:[#allocation8 + $0x28] ss:$16 sps:$4 sm:$0xff]  }
  0x71   :  { %v6205_v2 = vld [vmem:[#allocation8 + $0x4c] ss:$16 sps:$4 sm:$0xff]   ;;  %v6211_v5 = vld [vmem:[#allocation8 + $0x48] ss:$16 sps:$4 sm:$0xff]  }
  0x72   :  { %v6213_v6 = vld [vmem:[#allocation8 + $0x6c] ss:$16 sps:$4 sm:$0xff]   ;;  %v6217_v9 = vld [vmem:[#allocation8 + $0x68] ss:$16 sps:$4 sm:$0xff]  }
  0x73   :  { %366 = vmatpush1.bf16.msra.mxu1 %v5052_v23  ;;  %672 = vmatpush1.bf16.msra.mxu0 %v6151_v25  ;;  %v6220_v10 = vld [vmem:[#allocation8 + $0x8c] ss:$16 sps:$4 sm:$0xff]   ;;  %v6231_v15 = vld [vmem:[#allocation8 + $0xa8] ss:$16 sps:$4 sm:$0xff]  }
  0x74   :  { %367 = vmatprep.subr.bf16.mxu1 %v5056_v24  ;;  %673 = vmatprep.subr.bf16.mxu0 %v6154_v26  ;;  %v6227_v12 = vld [vmem:[#allocation8 + $0xac] ss:$16 sps:$4 sm:$0xff]   ;;  %v6238_v19 = vld [vmem:[#allocation8 + $0xc8] ss:$16 sps:$4 sm:$0xff]   ;;  %v175_v24 = vlaneseq }
  0x75   :  { %v6233_v16 = vld [vmem:[#allocation8 + $0xcc] ss:$16 sps:$4 sm:$0xff]   ;;  %v6244_v23 = vld [vmem:[#allocation8 + $0xe8] ss:$16 sps:$4 sm:$0xff]  }
  0x76   :  { %v6240_v20 = vld [vmem:[#allocation8 + $0xec] ss:$16 sps:$4 sm:$0xff]  }
  0x77   :  { %368 = vmatpush1.bf16.msra.mxu1 %v5058_v27  ;;  %674 = vmatpush1.bf16.msra.mxu0 %v6157_v29  ;;  %v176_v27 = vshrl.u32 %v175_v24, 7 }
  0x78   :  { %369 = vmatprep.subr.bf16.mxu1 %v5062_v28  ;;  %675 = vmatprep.subr.bf16.mxu0 %v6160_v31 }
  0x79   :  { %v6269_v28 = vsub.s32 0, %v176_v27  ;;  %v6271_v32 = vsub.s32 1, %v176_v27 }
  0x7b   :  { %370 = vmatpush1.bf16.msra.mxu1 %v5064_v30  ;;  %676 = vmatpush1.bf16.msra.mxu0 %v6163_v35  ;;  %7973 = vst [vmem:[#allocation21_spill] sm:$0xff] %v6269_v28  ;;  %v161_v30 = vld [vmem:[#allocation9] sm:$0xf]  ;;  %7974 = vst [vmem:[#allocation22_spill] sm:$0xff] %v6271_v32 }
  0x7c   :  { %428 = vmatprep.subr.bf16.mxu1 %v5070_v34  ;;  %773 = vmatprep.subr.bf16.mxu0 %v6119_v3  ;;  %v178_v33 = vrot.slane %v161_v30, %v6269_v28  ;;  %v182_v34 = vrot.slane %v161_v30, %v6271_v32 }
  0x7e   :  { %388 = vmatmul.mubr.bf16.vlgmr.msra.gmra.mrb[0].mxu1 %v6166_v36  ;;  %694 = vmatmul.mubr.bf16.vlgmr.msra.gmra.mrb[0].mxu0 %v7963_v0 }
  0x7f   :  { %429 = vmatpush1.bf16.msra.mxu1 %v5068_v37  ;;  %397 = vmatprep.mubr.bf16.mxu1 %v7963_v0 }
  0x80   :  { %430 = vmatprep.subr.bf16.mxu1 %v5073_v38  ;;  %774 = vmatpush1.bf16.msra.mxu0 %v6121_v4 }
  0x81   :  { %805 = vmatprep.mubr.bf16.mxu0 %v7963_v0  ;;  %775 = vmatprep.subr.bf16.mxu0 %v6124_v7 }
  0x83   :  { %431 = vmatpush1.bf16.msra.mxu1 %v5071_v39 }
  0x84   :  { %432 = vmatprep.subr.bf16.mxu1 %v5076_v42  ;;  %776 = vmatpush1.bf16.msra.mxu0 %v6127_v8 }
  0x85   :  { %777 = vmatprep.subr.bf16.mxu0 %v6130_v11 }
  0x86   :  { %398 = vmatmul.mubr.bf16.gmra.mrb[4].mxu1 %v6175_v43 }
  0x87   :  { %433 = vmatpush1.bf16.msra.mxu1 %v5074_v44  ;;  %407 = vmatprep.mubr.bf16.mxu1 %v7963_v0 }
  0x88   :  { %434 = vmatprep.subr.bf16.mxu1 %v5079_v45  ;;  %778 = vmatpush1.bf16.msra.mxu0 %v6133_v13 }
  0x89   :  { %779 = vmatprep.subr.bf16.mxu0 %v6136_v14 }
  0x8b   :  { %435 = vmatpush1.bf16.msra.mxu1 %v5077_v46 }
  0x8c   :  { %436 = vmatprep.subr.bf16.mxu1 %v5082_v49  ;;  %780 = vmatpush1.bf16.msra.mxu0 %v6139_v17 }
  0x8d   :  { %781 = vmatprep.subr.bf16.mxu0 %v6142_v18 }
  0x8e   :  { %408 = vmatmul.mubr.bf16.gmra.mrb[8].mxu1 %v172_v51 }
  0x8f   :  { %437 = vmatpush1.bf16.msra.mxu1 %v5080_v50  ;;  %417 = vmatprep.mubr.bf16.mxu1 %v7963_v0 }
  0x90   :  { %438 = vmatprep.subr.bf16.mxu1 %v5085_v52  ;;  %782 = vmatpush1.bf16.msra.mxu0 %v6145_v21 }
  0x91   :  { %783 = vmatprep.subr.bf16.mxu0 %v6148_v22 }
  0x93   :  { %439 = vmatpush1.bf16.msra.mxu1 %v5083_v53 }
  0x94   :  { %440 = vmatprep.subr.bf16.mxu1 %v5088_v56  ;;  %784 = vmatpush1.bf16.msra.mxu0 %v6151_v25 }
  0x95   :  { %785 = vmatprep.subr.bf16.mxu0 %v6154_v26 }
  0x96   :  { %418 = vmatmul.mubr.bf16.gmra.mrb[12].mxu1 %v173_v58 }
  0x97   :  { %441 = vmatpush1.bf16.msra.mxu1 %v5086_v57  ;;  %460 = vmatprep.mubr.bf16.mxu1 %v7963_v0 }
  0x98   :  { %442 = vmatprep.subr.bf16.mxu1 %v5091_v59  ;;  %786 = vmatpush1.bf16.msra.mxu0 %v6157_v29 }
  0x99   :  { %787 = vmatprep.subr.bf16.mxu0 %v6160_v31 }
  0x9b   :  { %443 = vmatpush1.bf16.msra.mxu1 %v5089_v60 }
  0x9c   :  { %702 = vmatprep.subr.bf16.mxu1 %v6190_v61  ;;  %788 = vmatpush1.bf16.msra.mxu0 %v6163_v35 }
  0x9d   :  { %885 = vmatprep.subr.bf16.mxu0 %v6119_v3  ;;  %v6225_v3 = vld [vmem:[#allocation8 + $0x88] ss:$16 sps:$4 sm:$0xff]  }
  0x9e   :  { %461 = vmatmul.mubr.bf16.vlgmr.msra.gmra.mrb[16].mxu1 %v6166_v36 }
  0x9f   :  { %703 = vmatpush1.bf16.msra.mxu1 %v6194_v62  ;;  %470 = vmatprep.mubr.bf16.mxu1 %v7963_v0 }
  0xa0   :  { %704 = vmatprep.subr.bf16.mxu1 %v6197_v63 }
  0xa3   :  { %705 = vmatpush1.bf16.msra.mxu1 %v6201_v1 }
  0xa4   :  { %706 = vmatprep.subr.bf16.mxu1 %v6205_v2 }
  0xa6   :  { %471 = vmatmul.mubr.bf16.gmra.mrb[20].mxu1 %v6175_v43 }
  0xa7   :  { %707 = vmatpush1.bf16.msra.mxu1 %v6211_v5  ;;  %480 = vmatprep.mubr.bf16.mxu1 %v7963_v0 }
  0xa8   :  { %708 = vmatprep.subr.bf16.mxu1 %v6213_v6 }
  0xab   :  { %709 = vmatpush1.bf16.msra.mxu1 %v6217_v9 }
  0xac   :  { %710 = vmatprep.subr.bf16.mxu1 %v6220_v10 }
  0xae   :  { %481 = vmatmul.mubr.bf16.gmra.mrb[24].mxu1 %v172_v51 }
  0xaf   :  { %711 = vmatpush1.bf16.msra.mxu1 %v6225_v3  ;;  %490 = vmatprep.mubr.bf16.mxu1 %v7963_v0 }
  0xb0   :  { %712 = vmatprep.subr.bf16.mxu1 %v6227_v12 }
  0xb3   :  { %713 = vmatpush1.bf16.msra.mxu1 %v6231_v15 }
  0xb4   :  { %714 = vmatprep.subr.bf16.mxu1 %v6233_v16 }
  0xb6   :  { %491 = vmatmul.mubr.bf16.gmra.mrb[28].mxu1 %v173_v58 }
  0xb7   :  { %715 = vmatpush1.bf16.msra.mxu1 %v6238_v19  ;;  %734 = vmatprep.mubr.bf16.mxu1 %v7963_v0 }
  0xb8   :  { %716 = vmatprep.subr.bf16.mxu1 %v6240_v20 }
  0xbb   :  { %717 = vmatpush1.bf16.msra.mxu1 %v6244_v23 }
  0xbc   :  { %814 = vmatprep.subr.bf16.mxu1 %v6190_v61 }
  0xbe   :  { %735 = vmatmul.mubr.bf16.vlgmr.msra.gmra.mrb[32].mxu1 %v7963_v0 }
  0xbf   :  { %815 = vmatpush1.bf16.msra.mxu1 %v6194_v62  ;;  %846 = vmatprep.mubr.bf16.mxu1 %v7963_v0 }
  0xc0   :  { %816 = vmatprep.subr.bf16.mxu1 %v6197_v63 }
  0xc3   :  { %817 = vmatpush1.bf16.msra.mxu1 %v6201_v1 }
  0xc4   :  { %818 = vmatprep.subr.bf16.mxu1 %v6205_v2 }
  0xc7   :  { %819 = vmatpush1.bf16.msra.mxu1 %v6211_v5 }
  0xc8   :  { %820 = vmatprep.subr.bf16.mxu1 %v6213_v6 }
  0xcb   :  { %821 = vmatpush1.bf16.msra.mxu1 %v6217_v9 }
  0xcc   :  { %822 = vmatprep.subr.bf16.mxu1 %v6220_v10 }
  0xcf   :  { %823 = vmatpush1.bf16.msra.mxu1 %v6225_v3 }
  0xd0   :  { %824 = vmatprep.subr.bf16.mxu1 %v6227_v12 }
  0xd3   :  { %825 = vmatpush1.bf16.msra.mxu1 %v6231_v15 }
  0xd4   :  { %826 = vmatprep.subr.bf16.mxu1 %v6233_v16 }
  0xd7   :  { %827 = vmatpush1.bf16.msra.mxu1 %v6238_v19 }
  0xd8   :  { %828 = vmatprep.subr.bf16.mxu1 %v6240_v20 }
  0xdb   :  { %829 = vmatpush1.bf16.msra.mxu1 %v6244_v23 }
  0xdc   :  { %926 = vmatprep.subr.bf16.mxu1 %v6190_v61 }
 0x151   :  { %v389_v36 = vpop.f32.mrb[0].mxu1  ;;  %v695_v41 = vpop.f32.mrb[0].mxu0 }
 0x152   :  { %v390_v37 = vadd.f32 %v389_v36, %v178_v33  ;;  %v391_v38 = vpop.f32.mrb[1].mxu1  ;;  %v697_v45 = vpop.f32.mrb[1].mxu0 }
 0x153   :  { %v392_v39 = vadd.f32 %v391_v38, %v182_v34  ;;  %v393_v40 = vpop.f32.mrb[2].mxu1  ;;  %v699_v48 = vpop.f32.mrb[2].mxu0 }
 0x154   :  { %v6275_v42 = vadd.f32 %v393_v40, %v178_v33  ;;  %v743_v43 = vadd.f32 %v695_v41, %v390_v37  ;;  %v395_v44 = vpop.f32.mrb[3].mxu1  ;;  %v700_v49 = vpop.f32.mrb[3].mxu0 }
 0x155   :  { %v6277_v46 = vadd.f32 %v395_v44, %v182_v34  ;;  %v744_v47 = vadd.f32 %v697_v45, %v392_v39 }
 0x159   :  { %v399_v50 = vpop.f32.mrb[4].mxu1 }
 0x15a   :  { %v6279_v51 = vadd.f32 %v399_v50, %v178_v33  ;;  %v401_v52 = vpop.f32.mrb[5].mxu1 }
 0x15b   :  { %v6281_v53 = vadd.f32 %v401_v52, %v182_v34  ;;  %v403_v54 = vpop.f32.mrb[6].mxu1 }
 0x15c   :  { %v6283_v55 = vadd.f32 %v403_v54, %v178_v33  ;;  %v405_v56 = vpop.f32.mrb[7].mxu1  ;;  %v6303_v54 = vsub.s32 2, %v176_v27 }
 0x15d   :  { %v6285_v57 = vadd.f32 %v405_v56, %v182_v34  ;;  %v6305_v56 = vsub.s32 3, %v176_v27 }
 0x15e   :  { %7983 = vst [vmem:[#allocation31_spill] sm:$0xff] %v6303_v54 }
 0x15f   :  { %7984 = vst [vmem:[#allocation32_spill] sm:$0xff] %v6305_v56 }
 0x161   :  { %v409_v58 = vpop.f32.mrb[8].mxu1 }
 0x162   :  { %v6287_v59 = vadd.f32 %v409_v58, %v178_v33  ;;  %v411_v60 = vpop.f32.mrb[9].mxu1 }
 0x163   :  { %v6289_v24 = vadd.f32 %v411_v60, %v182_v34  ;;  %v413_v36 = vpop.f32.mrb[10].mxu1  ;;  %v186_v60 = vrot.slane %v161_v30, %v6303_v54  ;;  %v4761_v54 = vmul.f32 -1.442695, %v744_v47 }
 0x164   :  { %7975 = vst [vmem:[#allocation23_spill] sm:$0xff] %v6287_v59  ;;  %v6291_v37 = vadd.f32 %v413_v36, %v178_v33  ;;  %v415_v38 = vpop.f32.mrb[11].mxu1 }
 0x165   :  { %7976 = vst [vmem:[#allocation24_spill] sm:$0xff] %v6289_v24  ;;  %v6293_v39 = vadd.f32 %v415_v38, %v182_v34  ;;  %v190_v38 = vrot.slane %v161_v30, %v6305_v56  ;;  %v4760_v30 = vmul.f32 -1.442695, %v743_v43  ;;  %5316 = vpow2.f32 %v4761_v54 }
 0x166   :  { %7977 = vst [vmem:[#allocation25_spill] sm:$0xff] %v6291_v37 }
 0x167   :  { %7978 = vst [vmem:[#allocation26_spill] sm:$0xff] %v6293_v39  ;;  %5318 = vpow2.f32 %v4760_v30 }
 0x169   :  { %v419_v40 = vpop.f32.mrb[12].mxu1 }
 0x16a   :  { %v6295_v41 = vadd.f32 %v419_v40, %v178_v33  ;;  %v421_v44 = vpop.f32.mrb[13].mxu1 }
 0x16b   :  { %v6297_v45 = vadd.f32 %v421_v44, %v182_v34  ;;  %v423_v48 = vpop.f32.mrb[14].mxu1 }
 0x16c   :  { %7979 = vst [vmem:[#allocation27_spill] sm:$0xff] %v6295_v41  ;;  %v6299_v49 = vadd.f32 %v423_v48, %v178_v33  ;;  %v425_v50 = vpop.f32.mrb[15].mxu1 }
 0x16d   :  { %7980 = vst [vmem:[#allocation28_spill] sm:$0xff] %v6297_v45  ;;  %v6301_v52 = vadd.f32 %v425_v50, %v182_v34 }
 0x16e   :  { %7981 = vst [vmem:[#allocation29_spill] sm:$0xff] %v6299_v49 }
 0x16f   :  { %7982 = vst [vmem:[#allocation30_spill] sm:$0xff] %v6301_v52 }
 0x171   :  { %v462_v58 = vpop.f32.mrb[16].mxu1 }
 0x172   :  { %v464_v36 = vpop.f32.mrb[17].mxu1 }
 0x173   :  { %v466_v40 = vpop.f32.mrb[18].mxu1 }
 0x174   :  { %v6309_v0 = vadd.f32 %v466_v40, %v186_v60  ;;  %v468_v44 = vpop.f32.mrb[19].mxu1 }
 0x175   :  { %v6311_v32 = vadd.f32 %v468_v44, %v190_v38 }
 0x179   :  { %v472_v33 = vpop.f32.mrb[20].mxu1 }
 0x17a   :  { %v6313_v48 = vadd.f32 %v472_v33, %v186_v60  ;;  %v474_v34 = vpop.f32.mrb[21].mxu1 }
 0x17b   :  { %v6315_v50 = vadd.f32 %v474_v34, %v190_v38  ;;  %v476_v27 = vpop.f32.mrb[22].mxu1 }
 0x17c   :  { %v6317_v28 = vadd.f32 %v476_v27, %v186_v60  ;;  %v478_v52 = vpop.f32.mrb[23].mxu1 }
 0x17d   :  { %v6319_v49 = vadd.f32 %v478_v52, %v190_v38  ;;  %v5317_v52 = vpop.eup %5316 }
 0x17e   :  { %v5319_v30 = vpop.eup %5318 }
 0x17f   :  { %7985 = vst [vmem:[#allocation33_spill] sm:$0xff] %v6319_v49 }
 0x181   :  { %v482_v40 = vpop.f32.mrb[24].mxu1 }
 0x182   :  { %v6321_v56 = vadd.f32 %v482_v40, %v186_v60  ;;  %v484_v44 = vpop.f32.mrb[25].mxu1 }
 0x183   :  { %v6323_v45 = vadd.f32 %v484_v44, %v190_v38  ;;  %v486_v33 = vpop.f32.mrb[26].mxu1 }
 0x184   :  { %7986 = vst [vmem:[#allocation34_spill] sm:$0xff] %v6321_v56  ;;  %v6325_v41 = vadd.f32 %v486_v33, %v186_v60  ;;  %v488_v34 = vpop.f32.mrb[27].mxu1  ;;  %v750_v33 = vadd.f32 1.0, %v5319_v30  ;;  %v465_v56 = vadd.f32 %v464_v36, %v190_v38 }
 0x185   :  { %7987 = vst [vmem:[#allocation35_spill] sm:$0xff] %v6323_v45  ;;  %v6327_v39 = vadd.f32 %v488_v34, %v190_v38  ;;  %v756_v45 = vadd.f32 1.0, %v5317_v52 }
 0x186   :  { %7988 = vst [vmem:[#allocation36_spill] sm:$0xff] %v6325_v41  ;;  %v463_v41 = vadd.f32 %v462_v58, %v186_v60 }
 0x187   :  { %7989 = vst [vmem:[#allocation37_spill] sm:$0xff] %v6327_v39  ;;  %5320 = vrcp.f32 %v756_v45 }
 0x188   :  { %5322 = vrcp.f32 %v750_v33 }
 0x189   :  { %v492_v27 = vpop.f32.mrb[28].mxu1 }
 0x18a   :  { %v6329_v37 = vadd.f32 %v492_v27, %v186_v60  ;;  %v494_v47 = vpop.f32.mrb[29].mxu1 }
 0x18b   :  { %v6331_v43 = vadd.f32 %v494_v47, %v190_v38  ;;  %v496_v54 = vpop.f32.mrb[30].mxu1 }
 0x18c   :  { %7990 = vst [vmem:[#allocation38_spill] sm:$0xff] %v6329_v37  ;;  %v6333_v40 = vadd.f32 %v496_v54, %v186_v60  ;;  %v498_v24 = vpop.f32.mrb[31].mxu1 }
 0x18d   :  { %7991 = vst [vmem:[#allocation39_spill] sm:$0xff] %v6331_v43  ;;  %v6335_v44 = vadd.f32 %v498_v24, %v190_v38 }
 0x18e   :  { %7992 = vst [vmem:[#allocation40_spill] sm:$0xff] %v6333_v40 }
 0x18f   :  { %7993 = vst [vmem:[#allocation41_spill] sm:$0xff] %v6335_v44 }
 0x191   :  { %v736_v34 = vpop.f32.mrb[32].mxu1  ;;  %v5321_v54 = vpop.eup %5320 }
 0x192   :  { %v745_v39 = vadd.f32 %v736_v34, %v463_v41  ;;  %v738_v27 = vpop.f32.mrb[33].mxu1  ;;  %v5323_v40 = vpop.eup %5322  ;;  %v766_v24 = vmul.f32 0.0, %v5321_v54 }
 0x193   :  { %v746_v37 = vadd.f32 %v738_v27, %v465_v56  ;;  %v740_v59 = vpop.f32.mrb[34].mxu1 }
 0x194   :  { %5324 = vtanh.f32 %v745_v39  ;;  %v741_v47 = vpop.f32.mrb[35].mxu1 }
 0x195   :  { %v4762_v43 = vmul.f32 -1.442695, %v746_v37  ;;  %v7994_v37 = vmov 0  }
 0x197   :  { %5326 = vpow2.f32 %v4762_v43 }
 0x19e   :  { %v5325_v49 = vpop.eup %5324 }
 0x19f   :  { %v767_v44 = vmul.f32 %v5325_v49, %v5323_v40 }
 0x1a1   :  { %v5327_v52 = vpop.eup %5326  ;;  %v6337_v30 = vadd.f32 %v767_v44, %v766_v24  ;;  %v6392_v24 = vld [vmem:[#allocation8] ss:$16 sps:$4 sm:$0xff]  }
 0x1a2   :  { %v763_v58 = vadd.f32 1.0, %v5327_v52  ;;  %v6396_v52 = vld [vmem:[#allocation8 + $0x24] ss:$16 sps:$4 sm:$0xff]  }
 0x1a3   :  { %5328 = vtanh.f32 %v6337_v30 }
 0x1a4   :  { %5330 = vrcp.f32 %v763_v58  ;;  %v6406_v58 = vld [vmem:[#allocation8 + $0x44] ss:$16 sps:$4 sm:$0xff]  }
 0x1ad   :  { %v5329_v41 = vpop.eup %5328 }
 0x1ae   :  { %v5331_v45 = vpop.eup %5330 }
 0x1af   :  { %v6340_v56 = vmul.f32 %v5331_v45, %v5329_v41  ;;  %v6410_v41 = vld [vmem:[#allocation8 + $0x40] ss:$16 sps:$4 sm:$0xff]   ;;  %v6414_v45 = vld [vmem:[#allocation8 + $0x64] ss:$16 sps:$4 sm:$0xff]  }
 0x1b1   :  { %v772_v59 = vpack.c.bf16 %v6340_v56, %v6340_v56 }
 0x1b3   :  { %806 = vmatmul.mubr.bf16.vlgmr.msra.gmra.mrb[4].mxu0 %v772_v59  ;;  %847 = vmatmul.mubr.bf16.vlgmr.msra.gmra.mrb[36].mxu1 %v772_v59  ;;  %v6418_v59 = vld [vmem:[#allocation8 + $0x60] ss:$16 sps:$4 sm:$0xff]  }
 0x1b4   :  { %886 = vmatpush1.bf16.msra.mxu0 %v6121_v4  ;;  %927 = vmatpush1.bf16.msra.mxu1 %v6194_v62  ;;  %v6376_v4 = vld [vmem:[#allocation8 + $0x4] ss:$16 sps:$4 sm:$0xff]  }
 0x1b5   :  { %887 = vmatprep.subr.bf16.mxu0 %v6124_v7  ;;  %928 = vmatprep.subr.bf16.mxu1 %v6197_v63 }
 0x1b6   :  { %917 = vmatprep.mubr.bf16.mxu0 %v7994_v37  ;;  %958 = vmatprep.mubr.bf16.mxu1 %v7994_v37 }
 0x1b8   :  { %888 = vmatpush1.bf16.msra.mxu0 %v6127_v8  ;;  %929 = vmatpush1.bf16.msra.mxu1 %v6201_v1 }
 0x1b9   :  { %889 = vmatprep.subr.bf16.mxu0 %v6130_v11  ;;  %930 = vmatprep.subr.bf16.mxu1 %v6205_v2 }
 0x1bc   :  { %890 = vmatpush1.bf16.msra.mxu0 %v6133_v13  ;;  %931 = vmatpush1.bf16.msra.mxu1 %v6211_v5 }
 0x1bd   :  { %891 = vmatprep.subr.bf16.mxu0 %v6136_v14  ;;  %932 = vmatprep.subr.bf16.mxu1 %v6213_v6 }
 0x1c0   :  { %892 = vmatpush1.bf16.msra.mxu0 %v6139_v17  ;;  %933 = vmatpush1.bf16.msra.mxu1 %v6217_v9 }
 0x1c1   :  { %893 = vmatprep.subr.bf16.mxu0 %v6142_v18  ;;  %934 = vmatprep.subr.bf16.mxu1 %v6220_v10 }
 0x1c4   :  { %894 = vmatpush1.bf16.msra.mxu0 %v6145_v21  ;;  %935 = vmatpush1.bf16.msra.mxu1 %v6225_v3 }
 0x1c5   :  { %895 = vmatprep.subr.bf16.mxu0 %v6148_v22  ;;  %936 = vmatprep.subr.bf16.mxu1 %v6227_v12 }
 0x1c8   :  { %896 = vmatpush1.bf16.msra.mxu0 %v6151_v25  ;;  %937 = vmatpush1.bf16.msra.mxu1 %v6231_v15 }
 0x1c9   :  { %897 = vmatprep.subr.bf16.mxu0 %v6154_v26  ;;  %938 = vmatprep.subr.bf16.mxu1 %v6233_v16 }
 0x1cc   :  { %898 = vmatpush1.bf16.msra.mxu0 %v6157_v29  ;;  %939 = vmatpush1.bf16.msra.mxu1 %v6238_v19 }
 0x1cd   :  { %899 = vmatprep.subr.bf16.mxu0 %v6160_v31  ;;  %940 = vmatprep.subr.bf16.mxu1 %v6240_v20 }
 0x1d0   :  { %900 = vmatpush1.bf16.msra.mxu0 %v6163_v35  ;;  %941 = vmatpush1.bf16.msra.mxu1 %v6244_v23 }
 0x1d1   :  { %997 = vmatprep.subr.bf16.mxu0 %v6376_v4  ;;  %1038 = vmatprep.subr.bf16.mxu1 %v6190_v61 }
 0x286   :  { %v807_v7 = vpop.f32.mrb[4].mxu0  ;;  %v848_v8 = vpop.f32.mrb[36].mxu1 }
 0x287   :  { %v855_v11 = vadd.f32 %v807_v7, %v6275_v42  ;;  %v857_v13 = vadd.f32 %v848_v8, %v6309_v0  ;;  %v809_v14 = vpop.f32.mrb[5].mxu0  ;;  %v850_v17 = vpop.f32.mrb[37].mxu1  ;;  %v6422_v7 = vld [vmem:[#allocation8 + $0x84] ss:$16 sps:$4 sm:$0xff]   ;;  %v6426_v8 = vld [vmem:[#allocation8 + $0x80] ss:$16 sps:$4 sm:$0xff]  }
 0x288   :  { %v856_v18 = vadd.f32 %v809_v14, %v6277_v46  ;;  %v858_v21 = vadd.f32 %v850_v17, %v6311_v32  ;;  %v811_v22 = vpop.f32.mrb[6].mxu0  ;;  %v852_v25 = vpop.f32.mrb[38].mxu1  ;;  %v6438_v14 = vld [vmem:[#allocation8 + $0xc4] ss:$16 sps:$4 sm:$0xff]   ;;  %v6442_v17 = vld [vmem:[#allocation8 + $0xc0] ss:$16 sps:$4 sm:$0xff]  }
 0x289   :  { %v4763_v26 = vmul.f32 -1.442695, %v855_v11  ;;  %v812_v29 = vpop.f32.mrb[7].mxu0  ;;  %v853_v31 = vpop.f32.mrb[39].mxu1  ;;  %v6430_v11 = vld [vmem:[#allocation8 + $0xa4] ss:$16 sps:$4 sm:$0xff]  }
 0x28a   :  { %v4764_v35 = vmul.f32 -1.442695, %v856_v18  ;;  %v4765_v39 = vmul.f32 -1.442695, %v858_v21  ;;  %v6446_v18 = vld [vmem:[#allocation8 + $0xe4] ss:$16 sps:$4 sm:$0xff]  }
 0x28b   :  { %5332 = vpow2.f32 %v4763_v26  ;;  %v6450_v21 = vld [vmem:[#allocation8 + $0xe0] ss:$16 sps:$4 sm:$0xff]  }
 0x28c   :  { %5334 = vpow2.f32 %v4764_v35 }
 0x28d   :  { %5336 = vpow2.f32 %v4765_v39 }
 0x28e   :  { %5338 = vtanh.f32 %v857_v13  ;;  %v6434_v13 = vld [vmem:[#allocation8 + $0xa0] ss:$16 sps:$4 sm:$0xff]  }
 0x295   :  { %v5333_v49 = vpop.eup %5332 }
 0x296   :  { %v5335_v60 = vpop.eup %5334  ;;  %v862_v42 = vadd.f32 1.0, %v5333_v49 }
 0x297   :  { %v868_v0 = vadd.f32 1.0, %v5335_v60  ;;  %v5337_v46 = vpop.eup %5336 }
 0x298   :  { %5340 = vrcp.f32 %v862_v42  ;;  %v5339_v36 = vpop.eup %5338  ;;  %v875_v40 = vadd.f32 1.0, %v5337_v46 }
 0x299   :  { %5342 = vrcp.f32 %v868_v0 }
 0x29a   :  { %5344 = vrcp.f32 %v875_v40 }
 0x2a2   :  { %v5341_v32 = vpop.eup %5340 }
 0x2a3   :  { %v5343_v38 = vpop.eup %5342  ;;  %v879_v43 = vmul.f32 %v5341_v32, %v5339_v36 }
 0x2a4   :  { %v878_v44 = vmul.f32 %v5343_v38, %v6337_v30  ;;  %v5345_v34 = vpop.eup %5344  ;;  %v6402_v30 = vld [vmem:[#allocation8 + $0x20] ss:$16 sps:$4 sm:$0xff]  }
 0x2a6   :  { %v6385_v33 = vadd.f32 %v879_v43, %v878_v44 }
 0x2a8   :  { %5346 = vtanh.f32 %v6385_v33 }
 0x2b2   :  { %v5347_v27 = vpop.eup %5346 }
 0x2b3   :  { %v6388_v47 = vmul.f32 %v5347_v27, %v5345_v34 }
 0x2b5   :  { %v884_v54 = vpack.c.bf16 %v6388_v47, %v6388_v47 }
 0x2b7   :  { %918 = vmatmul.mubr.bf16.vlgmr.msra.gmra.mrb[8].mxu0 %v884_v54  ;;  %959 = vmatmul.mubr.bf16.vlgmr.msra.gmra.mrb[40].mxu1 %v884_v54 }
 0x2b8   :  { %998 = vmatpush1.bf16.msra.mxu0 %v6392_v24  ;;  %1039 = vmatpush1.bf16.msra.mxu1 %v6194_v62 }
 0x2b9   :  { %999 = vmatprep.subr.bf16.mxu0 %v6396_v52  ;;  %1040 = vmatprep.subr.bf16.mxu1 %v6197_v63 }
 0x2ba   :  { %1029 = vmatprep.mubr.bf16.mxu0 %v7994_v37  ;;  %1070 = vmatprep.mubr.bf16.mxu1 %v7994_v37 }
 0x2bc   :  { %1000 = vmatpush1.bf16.msra.mxu0 %v6402_v30  ;;  %1041 = vmatpush1.bf16.msra.mxu1 %v6201_v1 }
 0x2bd   :  { %1001 = vmatprep.subr.bf16.mxu0 %v6406_v58  ;;  %1042 = vmatprep.subr.bf16.mxu1 %v6205_v2 }
 0x2c0   :  { %1002 = vmatpush1.bf16.msra.mxu0 %v6410_v41  ;;  %1043 = vmatpush1.bf16.msra.mxu1 %v6211_v5 }
 0x2c1   :  { %1003 = vmatprep.subr.bf16.mxu0 %v6414_v45  ;;  %1044 = vmatprep.subr.bf16.mxu1 %v6213_v6 }
 0x2c4   :  { %1004 = vmatpush1.bf16.msra.mxu0 %v6418_v59  ;;  %1045 = vmatpush1.bf16.msra.mxu1 %v6217_v9 }
 0x2c5   :  { %1005 = vmatprep.subr.bf16.mxu0 %v6422_v7  ;;  %1046 = vmatprep.subr.bf16.mxu1 %v6220_v10 }
 0x2c8   :  { %1006 = vmatpush1.bf16.msra.mxu0 %v6426_v8  ;;  %1047 = vmatpush1.bf16.msra.mxu1 %v6225_v3 }
 0x2c9   :  { %1007 = vmatprep.subr.bf16.mxu0 %v6430_v11  ;;  %1048 = vmatprep.subr.bf16.mxu1 %v6227_v12 }
 0x2cc   :  { %1008 = vmatpush1.bf16.msra.mxu0 %v6434_v13  ;;  %1049 = vmatpush1.bf16.msra.mxu1 %v6231_v15 }
 0x2cd   :  { %1009 = vmatprep.subr.bf16.mxu0 %v6438_v14  ;;  %1050 = vmatprep.subr.bf16.mxu1 %v6233_v16 }
 0x2d0   :  { %1010 = vmatpush1.bf16.msra.mxu0 %v6442_v17  ;;  %1051 = vmatpush1.bf16.msra.mxu1 %v6238_v19 }
 0x2d1   :  { %1011 = vmatprep.subr.bf16.mxu0 %v6446_v18  ;;  %1052 = vmatprep.subr.bf16.mxu1 %v6240_v20 }
 0x2d4   :  { %1012 = vmatpush1.bf16.msra.mxu0 %v6450_v21  ;;  %1053 = vmatpush1.bf16.msra.mxu1 %v6244_v23 }
 0x2d5   :  { %1109 = vmatprep.subr.bf16.mxu0 %v6376_v4  ;;  %1150 = vmatprep.subr.bf16.mxu1 %v6190_v61 }
 0x38a   :  { %v919_v22 = vpop.f32.mrb[8].mxu0  ;;  %v960_v25 = vpop.f32.mrb[40].mxu1 }
 0x38b   :  { %v967_v26 = vadd.f32 %v919_v22, %v6279_v51  ;;  %v969_v29 = vadd.f32 %v960_v25, %v6313_v48  ;;  %v921_v31 = vpop.f32.mrb[9].mxu0  ;;  %v962_v35 = vpop.f32.mrb[41].mxu1 }
 0x38c   :  { %v968_v39 = vadd.f32 %v921_v31, %v6281_v53  ;;  %v970_v49 = vadd.f32 %v962_v35, %v6315_v50  ;;  %v923_v60 = vpop.f32.mrb[10].mxu0  ;;  %v964_v42 = vpop.f32.mrb[42].mxu1 }
 0x38d   :  { %v4766_v0 = vmul.f32 -1.442695, %v967_v26  ;;  %v924_v46 = vpop.f32.mrb[11].mxu0  ;;  %v965_v36 = vpop.f32.mrb[43].mxu1 }
 0x38e   :  { %v4767_v32 = vmul.f32 -1.442695, %v968_v39  ;;  %v4768_v38 = vmul.f32 -1.442695, %v970_v49  ;;  %v7995_v36 = vld [vmem:[#allocation33_spill] sm:$0xff] }
 0x38f   :  { %5348 = vpow2.f32 %v4766_v0 }
 0x390   :  { %5350 = vpow2.f32 %v4767_v32 }
 0x391   :  { %5352 = vpow2.f32 %v4768_v38 }
 0x392   :  { %5354 = vtanh.f32 %v969_v29 }
 0x399   :  { %v5349_v43 = vpop.eup %5348 }
 0x39a   :  { %v5351_v40 = vpop.eup %5350  ;;  %v974_v51 = vadd.f32 1.0, %v5349_v43 }
 0x39b   :  { %v980_v48 = vadd.f32 1.0, %v5351_v40  ;;  %v5353_v53 = vpop.eup %5352 }
 0x39c   :  { %5356 = vrcp.f32 %v974_v51  ;;  %v5355_v44 = vpop.eup %5354  ;;  %v987_v54 = vadd.f32 1.0, %v5353_v53 }
 0x39d   :  { %5358 = vrcp.f32 %v980_v48 }
 0x39e   :  { %5360 = vrcp.f32 %v987_v54 }
 0x3a6   :  { %v5357_v50 = vpop.eup %5356 }
 0x3a7   :  { %v5359_v34 = vpop.eup %5358  ;;  %v991_v27 = vmul.f32 %v5357_v50, %v5355_v44 }
 0x3a8   :  { %v990_v22 = vmul.f32 %v5359_v34, %v6385_v33  ;;  %v5361_v26 = vpop.eup %5360 }
 0x3aa   :  { %v6461_v25 = vadd.f32 %v991_v27, %v990_v22 }
 0x3ac   :  { %5362 = vtanh.f32 %v6461_v25 }
 0x3b6   :  { %v5363_v31 = vpop.eup %5362 }
 0x3b7   :  { %v6464_v35 = vmul.f32 %v5363_v31, %v5361_v26 }
 0x3b9   :  { %v996_v29 = vpack.c.bf16 %v6464_v35, %v6464_v35 }
 0x3bb   :  { %1030 = vmatmul.mubr.bf16.vlgmr.msra.gmra.mrb[12].mxu0 %v996_v29  ;;  %1071 = vmatmul.mubr.bf16.vlgmr.msra.gmra.mrb[44].mxu1 %v996_v29 }
 0x3bc   :  { %1110 = vmatpush1.bf16.msra.mxu0 %v6392_v24  ;;  %1151 = vmatpush1.bf16.msra.mxu1 %v6194_v62 }
 0x3bd   :  { %1111 = vmatprep.subr.bf16.mxu0 %v6396_v52  ;;  %1152 = vmatprep.subr.bf16.mxu1 %v6197_v63 }
 0x3be   :  { %1141 = vmatprep.mubr.bf16.mxu0 %v7994_v37  ;;  %1182 = vmatprep.mubr.bf16.mxu1 %v7994_v37 }
 0x3c0   :  { %1112 = vmatpush1.bf16.msra.mxu0 %v6402_v30  ;;  %1153 = vmatpush1.bf16.msra.mxu1 %v6201_v1 }
 0x3c1   :  { %1113 = vmatprep.subr.bf16.mxu0 %v6406_v58  ;;  %1154 = vmatprep.subr.bf16.mxu1 %v6205_v2 }
 0x3c4   :  { %1114 = vmatpush1.bf16.msra.mxu0 %v6410_v41  ;;  %1155 = vmatpush1.bf16.msra.mxu1 %v6211_v5 }
 0x3c5   :  { %1115 = vmatprep.subr.bf16.mxu0 %v6414_v45  ;;  %1156 = vmatprep.subr.bf16.mxu1 %v6213_v6 }
 0x3c8   :  { %1116 = vmatpush1.bf16.msra.mxu0 %v6418_v59  ;;  %1157 = vmatpush1.bf16.msra.mxu1 %v6217_v9 }
 0x3c9   :  { %1117 = vmatprep.subr.bf16.mxu0 %v6422_v7  ;;  %1158 = vmatprep.subr.bf16.mxu1 %v6220_v10 }
 0x3cc   :  { %1118 = vmatpush1.bf16.msra.mxu0 %v6426_v8  ;;  %1159 = vmatpush1.bf16.msra.mxu1 %v6225_v3 }
 0x3cd   :  { %1119 = vmatprep.subr.bf16.mxu0 %v6430_v11  ;;  %1160 = vmatprep.subr.bf16.mxu1 %v6227_v12 }
 0x3d0   :  { %1120 = vmatpush1.bf16.msra.mxu0 %v6434_v13  ;;  %1161 = vmatpush1.bf16.msra.mxu1 %v6231_v15 }
 0x3d1   :  { %1121 = vmatprep.subr.bf16.mxu0 %v6438_v14  ;;  %1162 = vmatprep.subr.bf16.mxu1 %v6233_v16 }
 0x3d4   :  { %1122 = vmatpush1.bf16.msra.mxu0 %v6442_v17  ;;  %1163 = vmatpush1.bf16.msra.mxu1 %v6238_v19 }
 0x3d5   :  { %1123 = vmatprep.subr.bf16.mxu0 %v6446_v18  ;;  %1164 = vmatprep.subr.bf16.mxu1 %v6240_v20 }
 0x3d8   :  { %1124 = vmatpush1.bf16.msra.mxu0 %v6450_v21  ;;  %1165 = vmatpush1.bf16.msra.mxu1 %v6244_v23 }
 0x3d9   :  { %1221 = vmatprep.subr.bf16.mxu0 %v6376_v4  ;;  %1262 = vmatprep.subr.bf16.mxu1 %v6190_v61 }
 0x48e   :  { %v1031_v33 = vpop.f32.mrb[12].mxu0  ;;  %v1072_v39 = vpop.f32.mrb[44].mxu1 }
 0x48f   :  { %v1079_v49 = vadd.f32 %v1031_v33, %v6283_v55  ;;  %v1081_v60 = vadd.f32 %v1072_v39, %v6317_v28  ;;  %v1033_v42 = vpop.f32.mrb[13].mxu0  ;;  %v1074_v0 = vpop.f32.mrb[45].mxu1 }
 0x490   :  { %v1080_v46 = vadd.f32 %v1033_v42, %v6285_v57  ;;  %v1082_v32 = vadd.f32 %v1074_v0, %v7995_v36  ;;  %v1035_v38 = vpop.f32.mrb[14].mxu0  ;;  %v1076_v43 = vpop.f32.mrb[46].mxu1 }
 0x491   :  { %v4769_v40 = vmul.f32 -1.442695, %v1079_v49  ;;  %v1036_v51 = vpop.f32.mrb[15].mxu0  ;;  %v1077_v48 = vpop.f32.mrb[47].mxu1 }
 0x492   :  { %v4770_v53 = vmul.f32 -1.442695, %v1080_v46  ;;  %v4771_v61 = vmul.f32 -1.442695, %v1082_v32 }
 0x493   :  { %5364 = vpow2.f32 %v4769_v40 }
 0x494   :  { %5366 = vpow2.f32 %v4770_v53 }
 0x495   :  { %5368 = vpow2.f32 %v4771_v61 }
 0x496   :  { %5370 = vtanh.f32 %v1081_v60 }
 0x49d   :  { %v5365_v44 = vpop.eup %5364 }
 0x49e   :  { %v5367_v50 = vpop.eup %5366  ;;  %v1086_v55 = vadd.f32 1.0, %v5365_v44 }
 0x49f   :  { %v1092_v28 = vadd.f32 1.0, %v5367_v50  ;;  %v5369_v57 = vpop.eup %5368 }
 0x4a0   :  { %5372 = vrcp.f32 %v1086_v55  ;;  %v5371_v34 = vpop.eup %5370  ;;  %v1099_v26 = vadd.f32 1.0, %v5369_v57 }
 0x4a1   :  { %5374 = vrcp.f32 %v1092_v28 }
 0x4a2   :  { %5376 = vrcp.f32 %v1099_v26 }
 0x4aa   :  { %v5373_v27 = vpop.eup %5372 }
 0x4ab   :  { %v5375_v54 = vpop.eup %5374  ;;  %v1103_v22 = vmul.f32 %v5373_v27, %v5371_v34 }
 0x4ac   :  { %v1102_v31 = vmul.f32 %v5375_v54, %v6461_v25  ;;  %v5377_v33 = vpop.eup %5376  ;;  %v7999_v25 = vld [vmem:[#allocation35_spill] sm:$0xff] }
 0x4ae   :  { %v6507_v29 = vadd.f32 %v1103_v22, %v1102_v31 }
 0x4b0   :  { %5378 = vtanh.f32 %v6507_v29 }
 0x4ba   :  { %v5379_v39 = vpop.eup %5378 }
 0x4bb   :  { %v6510_v49 = vmul.f32 %v5379_v39, %v5377_v33  ;;  %v6563_v39 = vld [vmem:[#allocation8 + $0x8] ss:$16 sps:$4 sm:$0xff]  }
 0x4bd   :  { %v1108_v60 = vpack.c.bf16 %v6510_v49, %v6510_v49 }
 0x4bf   :  { %1142 = vmatmul.mubr.bf16.vlgmr.msra.gmra.mrb[16].mxu0 %v1108_v60  ;;  %1183 = vmatmul.mubr.bf16.vlgmr.msra.gmra.mrb[48].mxu1 %v1108_v60  ;;  %v6573_v60 = vld [vmem:[#allocation8 + $0x28] ss:$16 sps:$4 sm:$0xff]  }
 0x4c0   :  { %1222 = vmatpush1.bf16.msra.mxu0 %v6392_v24  ;;  %1263 = vmatpush1.bf16.msra.mxu1 %v6194_v62  ;;  %v6547_v62 = vld [vmem:[#allocation8 + $0xc] ss:$16 sps:$4 sm:$0xff]  }
 0x4c1   :  { %1223 = vmatprep.subr.bf16.mxu0 %v6396_v52  ;;  %1264 = vmatprep.subr.bf16.mxu1 %v6197_v63 }
 0x4c2   :  { %1253 = vmatprep.mubr.bf16.mxu0 %v7994_v37  ;;  %1294 = vmatprep.mubr.bf16.mxu1 %v7994_v37 }
 0x4c4   :  { %1224 = vmatpush1.bf16.msra.mxu0 %v6402_v30  ;;  %1265 = vmatpush1.bf16.msra.mxu1 %v6201_v1 }
 0x4c5   :  { %1225 = vmatprep.subr.bf16.mxu0 %v6406_v58  ;;  %1266 = vmatprep.subr.bf16.mxu1 %v6205_v2  ;;  %v7996_v2 = vld [vmem:[#allocation23_spill] sm:$0xff] }
 0x4c8   :  { %1226 = vmatpush1.bf16.msra.mxu0 %v6410_v41  ;;  %1267 = vmatpush1.bf16.msra.mxu1 %v6211_v5 }
 0x4c9   :  { %1227 = vmatprep.subr.bf16.mxu0 %v6414_v45  ;;  %1268 = vmatprep.subr.bf16.mxu1 %v6213_v6  ;;  %v7997_v6 = vld [vmem:[#allocation34_spill] sm:$0xff] }
 0x4cc   :  { %1228 = vmatpush1.bf16.msra.mxu0 %v6418_v59  ;;  %1269 = vmatpush1.bf16.msra.mxu1 %v6217_v9 }
 0x4cd   :  { %1229 = vmatprep.subr.bf16.mxu0 %v6422_v7  ;;  %1270 = vmatprep.subr.bf16.mxu1 %v6220_v10 }
 0x4d0   :  { %1230 = vmatpush1.bf16.msra.mxu0 %v6426_v8  ;;  %1271 = vmatpush1.bf16.msra.mxu1 %v6225_v3 }
 0x4d1   :  { %1231 = vmatprep.subr.bf16.mxu0 %v6430_v11  ;;  %1272 = vmatprep.subr.bf16.mxu1 %v6227_v12  ;;  %v7998_v12 = vld [vmem:[#allocation24_spill] sm:$0xff] }
 0x4d4   :  { %1232 = vmatpush1.bf16.msra.mxu0 %v6434_v13  ;;  %1273 = vmatpush1.bf16.msra.mxu1 %v6231_v15 }
 0x4d5   :  { %1233 = vmatprep.subr.bf16.mxu0 %v6438_v14  ;;  %1274 = vmatprep.subr.bf16.mxu1 %v6233_v16 }
 0x4d8   :  { %1234 = vmatpush1.bf16.msra.mxu0 %v6442_v17  ;;  %1275 = vmatpush1.bf16.msra.mxu1 %v6238_v19 }
 0x4d9   :  { %1235 = vmatprep.subr.bf16.mxu0 %v6446_v18  ;;  %1276 = vmatprep.subr.bf16.mxu1 %v6240_v20 }
 0x4dc   :  { %1236 = vmatpush1.bf16.msra.mxu0 %v6450_v21  ;;  %1277 = vmatpush1.bf16.msra.mxu1 %v6244_v23 }
 0x4dd   :  { %1333 = vmatprep.subr.bf16.mxu0 %v6376_v4  ;;  %1374 = vmatprep.subr.bf16.mxu1 %v6547_v62 }
 0x592   :  { %v1143_v63 = vpop.f32.mrb[16].mxu0  ;;  %v1184_v1 = vpop.f32.mrb[48].mxu1 }
 0x593   :  { %v1191_v5 = vadd.f32 %v1143_v63, %v7996_v2  ;;  %v1193_v9 = vadd.f32 %v1184_v1, %v7997_v6  ;;  %v1145_v10 = vpop.f32.mrb[17].mxu0  ;;  %v1186_v3 = vpop.f32.mrb[49].mxu1  ;;  %v6577_v63 = vld [vmem:[#allocation8 + $0x4c] ss:$16 sps:$4 sm:$0xff]   ;;  %v6581_v1 = vld [vmem:[#allocation8 + $0x48] ss:$16 sps:$4 sm:$0xff]  }
 0x594   :  { %v1192_v15 = vadd.f32 %v1145_v10, %v7998_v12  ;;  %v1194_v42 = vadd.f32 %v1186_v3, %v7999_v25  ;;  %v1147_v0 = vpop.f32.mrb[18].mxu0  ;;  %v1188_v46 = vpop.f32.mrb[50].mxu1  ;;  %v6585_v2 = vld [vmem:[#allocation8 + $0x6c] ss:$16 sps:$4 sm:$0xff]   ;;  %v6605_v3 = vld [vmem:[#allocation8 + $0xa8] ss:$16 sps:$4 sm:$0xff]  }
 0x595   :  { %v4772_v36 = vmul.f32 -1.442695, %v1191_v5  ;;  %v1148_v32 = vpop.f32.mrb[19].mxu0  ;;  %v1189_v38 = vpop.f32.mrb[51].mxu1  ;;  %v6589_v5 = vld [vmem:[#allocation8 + $0x68] ss:$16 sps:$4 sm:$0xff]  }
 0x596   :  { %v4773_v43 = vmul.f32 -1.442695, %v1192_v15  ;;  %v4774_v40 = vmul.f32 -1.442695, %v1194_v42  ;;  %v6593_v6 = vld [vmem:[#allocation8 + $0x8c] ss:$16 sps:$4 sm:$0xff]  }
 0x597   :  { %5380 = vpow2.f32 %v4772_v36  ;;  %v6601_v10 = vld [vmem:[#allocation8 + $0xac] ss:$16 sps:$4 sm:$0xff]   ;;  %v8001_v42 = vld [vmem:[#allocation36_spill] sm:$0xff]  ;;  %v8002_v36 = vld [vmem:[#allocation26_spill] sm:$0xff] }
 0x598   :  { %5382 = vpow2.f32 %v4773_v43  ;;  %v8000_v25 = vld [vmem:[#allocation25_spill] sm:$0xff] }
 0x599   :  { %5384 = vpow2.f32 %v4774_v40  ;;  %v8003_v38 = vld [vmem:[#allocation37_spill] sm:$0xff] }
 0x59a   :  { %5386 = vtanh.f32 %v1193_v9  ;;  %v6597_v9 = vld [vmem:[#allocation8 + $0x88] ss:$16 sps:$4 sm:$0xff]  }
 0x5a1   :  { %v5381_v51 = vpop.eup %5380 }
 0x5a2   :  { %v5383_v48 = vpop.eup %5382  ;;  %v1198_v53 = vadd.f32 1.0, %v5381_v51 }
 0x5a3   :  { %v1204_v61 = vadd.f32 1.0, %v5383_v48  ;;  %v5385_v44 = vpop.eup %5384 }
 0x5a4   :  { %5388 = vrcp.f32 %v1198_v53  ;;  %v5387_v50 = vpop.eup %5386  ;;  %v1211_v34 = vadd.f32 1.0, %v5385_v44 }
 0x5a5   :  { %5390 = vrcp.f32 %v1204_v61 }
 0x5a6   :  { %5392 = vrcp.f32 %v1211_v34 }
 0x5ae   :  { %v5389_v55 = vpop.eup %5388 }
 0x5af   :  { %v5391_v28 = vpop.eup %5390  ;;  %v1215_v57 = vmul.f32 %v5389_v55, %v5387_v50 }
 0x5b0   :  { %v1214_v27 = vmul.f32 %v5391_v28, %v6507_v29  ;;  %v5393_v22 = vpop.eup %5392  ;;  %v6567_v29 = vld [vmem:[#allocation8 + $0x2c] ss:$16 sps:$4 sm:$0xff]  }
 0x5b2   :  { %v6555_v54 = vadd.f32 %v1215_v57, %v1214_v27 }
 0x5b4   :  { %5394 = vtanh.f32 %v6555_v54 }
 0x5be   :  { %v5395_v26 = vpop.eup %5394 }
 0x5bf   :  { %v6558_v31 = vmul.f32 %v5395_v26, %v5393_v22 }
 0x5c1   :  { %v1220_v33 = vpack.c.bf16 %v6558_v31, %v6558_v31 }
 0x5c3   :  { %1254 = vmatmul.mubr.bf16.vlgmr.msra.gmra.mrb[20].mxu0 %v1220_v33  ;;  %1295 = vmatmul.mubr.bf16.vlgmr.msra.gmra.mrb[52].mxu1 %v1220_v33 }
 0x5c4   :  { %1334 = vmatpush1.bf16.msra.mxu0 %v6392_v24  ;;  %1375 = vmatpush1.bf16.msra.mxu1 %v6563_v39 }
 0x5c5   :  { %1335 = vmatprep.subr.bf16.mxu0 %v6396_v52  ;;  %1376 = vmatprep.subr.bf16.mxu1 %v6567_v29 }
 0x5c6   :  { %1365 = vmatprep.mubr.bf16.mxu0 %v7994_v37  ;;  %1406 = vmatprep.mubr.bf16.mxu1 %v7994_v37 }
 0x5c8   :  { %1336 = vmatpush1.bf16.msra.mxu0 %v6402_v30  ;;  %1377 = vmatpush1.bf16.msra.mxu1 %v6573_v60 }
 0x5c9   :  { %1337 = vmatprep.subr.bf16.mxu0 %v6406_v58  ;;  %1378 = vmatprep.subr.bf16.mxu1 %v6577_v63 }
 0x5cc   :  { %1338 = vmatpush1.bf16.msra.mxu0 %v6410_v41  ;;  %1379 = vmatpush1.bf16.msra.mxu1 %v6581_v1 }
 0x5cd   :  { %1339 = vmatprep.subr.bf16.mxu0 %v6414_v45  ;;  %1380 = vmatprep.subr.bf16.mxu1 %v6585_v2 }
 0x5d0   :  { %1340 = vmatpush1.bf16.msra.mxu0 %v6418_v59  ;;  %1381 = vmatpush1.bf16.msra.mxu1 %v6589_v5 }
 0x5d1   :  { %1341 = vmatprep.subr.bf16.mxu0 %v6422_v7  ;;  %1382 = vmatprep.subr.bf16.mxu1 %v6593_v6 }
 0x5d4   :  { %1342 = vmatpush1.bf16.msra.mxu0 %v6426_v8  ;;  %1383 = vmatpush1.bf16.msra.mxu1 %v6597_v9 }
 0x5d5   :  { %1343 = vmatprep.subr.bf16.mxu0 %v6430_v11  ;;  %1384 = vmatprep.subr.bf16.mxu1 %v6601_v10 }
 0x5d8   :  { %1344 = vmatpush1.bf16.msra.mxu0 %v6434_v13  ;;  %1385 = vmatpush1.bf16.msra.mxu1 %v6605_v3 }
 0x5d9   :  { %1345 = vmatprep.subr.bf16.mxu0 %v6438_v14  ;;  %1386 = vmatprep.subr.bf16.mxu1 %v6233_v16 }
 0x5dc   :  { %1346 = vmatpush1.bf16.msra.mxu0 %v6442_v17  ;;  %1387 = vmatpush1.bf16.msra.mxu1 %v6238_v19 }
 0x5dd   :  { %1347 = vmatprep.subr.bf16.mxu0 %v6446_v18  ;;  %1388 = vmatprep.subr.bf16.mxu1 %v6240_v20 }
 0x5e0   :  { %1348 = vmatpush1.bf16.msra.mxu0 %v6450_v21  ;;  %1389 = vmatpush1.bf16.msra.mxu1 %v6244_v23 }
 0x5e1   :  { %1445 = vmatprep.subr.bf16.mxu0 %v6376_v4  ;;  %1486 = vmatprep.subr.bf16.mxu1 %v6547_v62 }
 0x696   :  { %v1255_v12 = vpop.f32.mrb[20].mxu0  ;;  %v1296_v15 = vpop.f32.mrb[52].mxu1 }
 0x697   :  { %v1303_v16 = vadd.f32 %v1255_v12, %v8000_v25  ;;  %v1305_v0 = vadd.f32 %v1296_v15, %v8001_v42  ;;  %v1257_v46 = vpop.f32.mrb[21].mxu0  ;;  %v1298_v19 = vpop.f32.mrb[53].mxu1 }
 0x698   :  { %v1304_v32 = vadd.f32 %v1257_v46, %v8002_v36  ;;  %v1306_v20 = vadd.f32 %v1298_v19, %v8003_v38  ;;  %v1259_v43 = vpop.f32.mrb[22].mxu0  ;;  %v1300_v40 = vpop.f32.mrb[54].mxu1 }
 0x699   :  { %v4775_v51 = vmul.f32 -1.442695, %v1303_v16  ;;  %v1260_v23 = vpop.f32.mrb[23].mxu0  ;;  %v1301_v48 = vpop.f32.mrb[55].mxu1 }
 0x69a   :  { %v4776_v4 = vmul.f32 -1.442695, %v1304_v32  ;;  %v4777_v62 = vmul.f32 -1.442695, %v1306_v20 }
 0x69b   :  { %5396 = vpow2.f32 %v4775_v51 }
 0x69c   :  { %5398 = vpow2.f32 %v4776_v4  ;;  %v5116_v4 = vld [vmem:[#allocation6 + $0x100] ss:$16 sps:$4 sm:$0xff]  }
 0x69d   :  { %5400 = vpow2.f32 %v4777_v62  ;;  %v5119_v62 = vld [vmem:[#allocation6 + $0x108] ss:$16 sps:$4 sm:$0xff]  }
 0x69e   :  { %5402 = vtanh.f32 %v1305_v0 }
 0x6a5   :  { %v5397_v53 = vpop.eup %5396 }
 0x6a6   :  { %v5399_v61 = vpop.eup %5398  ;;  %v1310_v44 = vadd.f32 1.0, %v5397_v53 }
 0x6a7   :  { %v1316_v50 = vadd.f32 1.0, %v5399_v61  ;;  %v5401_v55 = vpop.eup %5400  ;;  %v5124_v61 = vld [vmem:[#allocation6 + $0x124] ss:$16 sps:$4 sm:$0xff]  }
 0x6a8   :  { %5404 = vrcp.f32 %v1310_v44  ;;  %v5403_v28 = vpop.eup %5402  ;;  %v1323_v22 = vadd.f32 1.0, %v5401_v55  ;;  %v5127_v44 = vld [vmem:[#allocation6 + $0x12c] ss:$16 sps:$4 sm:$0xff]   ;;  %v5125_v55 = vld [vmem:[#allocation6 + $0x128] ss:$16 sps:$4 sm:$0xff]  }
 0x6a9   :  { %5406 = vrcp.f32 %v1316_v50  ;;  %v5122_v50 = vld [vmem:[#allocation6 + $0x120] ss:$16 sps:$4 sm:$0xff]  }
 0x6aa   :  { %5408 = vrcp.f32 %v1323_v22  ;;  %v5136_v22 = vld [vmem:[#allocation6 + $0x164] ss:$16 sps:$4 sm:$0xff]  }
 0x6b2   :  { %v5405_v57 = vpop.eup %5404 }
 0x6b3   :  { %v5407_v34 = vpop.eup %5406  ;;  %v1327_v27 = vmul.f32 %v5405_v57, %v5403_v28  ;;  %v5130_v28 = vld [vmem:[#allocation6 + $0x144] ss:$16 sps:$4 sm:$0xff]   ;;  %v5133_v57 = vld [vmem:[#allocation6 + $0x14c] ss:$16 sps:$4 sm:$0xff]  }
 0x6b4   :  { %v1326_v26 = vmul.f32 %v5407_v34, %v6555_v54  ;;  %v5409_v12 = vpop.eup %5408  ;;  %v5128_v34 = vld [vmem:[#allocation6 + $0x140] ss:$16 sps:$4 sm:$0xff]  }
 0x6b6   :  { %v6623_v33 = vadd.f32 %v1327_v27, %v1326_v26  ;;  %v5131_v27 = vld [vmem:[#allocation6 + $0x148] ss:$16 sps:$4 sm:$0xff]   ;;  %v5139_v26 = vld [vmem:[#allocation6 + $0x16c] ss:$16 sps:$4 sm:$0xff]  }
 0x6b8   :  { %5410 = vtanh.f32 %v6623_v33 }
 0x6c2   :  { %v5411_v15 = vpop.eup %5410 }
 0x6c3   :  { %v6626_v25 = vmul.f32 %v5411_v15, %v5409_v12  ;;  %v5137_v12 = vld [vmem:[#allocation6 + $0x168] ss:$16 sps:$4 sm:$0xff]   ;;  %v5142_v15 = vld [vmem:[#allocation6 + $0x184] ss:$16 sps:$4 sm:$0xff]  }
 0x6c5   :  { %v1332_v16 = vpack.c.bf16 %v6626_v25, %v6626_v25 }
 0x6c7   :  { %1366 = vmatmul.mubr.bf16.vlgmr.msra.gmra.mrb[24].mxu0 %v1332_v16  ;;  %1407 = vmatmul.mubr.bf16.vlgmr.msra.gmra.mrb[56].mxu1 %v1332_v16  ;;  %v5145_v16 = vld [vmem:[#allocation6 + $0x18c] ss:$16 sps:$4 sm:$0xff]  }
 0x6c8   :  { %1446 = vmatpush1.bf16.msra.mxu0 %v6392_v24  ;;  %1487 = vmatpush1.bf16.msra.mxu1 %v6563_v39  ;;  %v5728_v24 = vld [vmem:[#allocation8 + $0xcc] ss:$16 sps:$4 sm:$0xff]   ;;  %v8006_v39 = vld [vmem:[#allocation28_spill] sm:$0xff] }
 0x6c9   :  { %1447 = vmatprep.subr.bf16.mxu0 %v6396_v52  ;;  %1488 = vmatprep.subr.bf16.mxu1 %v6567_v29  ;;  %v5729_v52 = vld [vmem:[#allocation8 + $0xc8] ss:$16 sps:$4 sm:$0xff]   ;;  %v8007_v29 = vld [vmem:[#allocation39_spill] sm:$0xff] }
 0x6ca   :  { %1477 = vmatprep.mubr.bf16.mxu0 %v7994_v37  ;;  %1518 = vmatprep.mubr.bf16.mxu1 %v7994_v37 }
 0x6cc   :  { %1448 = vmatpush1.bf16.msra.mxu0 %v6402_v30  ;;  %1489 = vmatpush1.bf16.msra.mxu1 %v6573_v60  ;;  %v5730_v30 = vld [vmem:[#allocation8 + $0xec] ss:$16 sps:$4 sm:$0xff]  }
 0x6cd   :  { %1449 = vmatprep.subr.bf16.mxu0 %v6406_v58  ;;  %1490 = vmatprep.subr.bf16.mxu1 %v6577_v63  ;;  %v5731_v58 = vld [vmem:[#allocation8 + $0xe8] ss:$16 sps:$4 sm:$0xff]  }
 0x6d0   :  { %1450 = vmatpush1.bf16.msra.mxu0 %v6410_v41  ;;  %1491 = vmatpush1.bf16.msra.mxu1 %v6581_v1  ;;  %v5118_v41 = vld [vmem:[#allocation6 + $0x104] ss:$16 sps:$4 sm:$0xff]  }
 0x6d1   :  { %1451 = vmatprep.subr.bf16.mxu0 %v6414_v45  ;;  %1492 = vmatprep.subr.bf16.mxu1 %v6585_v2  ;;  %v5121_v45 = vld [vmem:[#allocation6 + $0x10c] ss:$16 sps:$4 sm:$0xff]  }
 0x6d4   :  { %1452 = vmatpush1.bf16.msra.mxu0 %v6418_v59  ;;  %1493 = vmatpush1.bf16.msra.mxu1 %v6589_v5 }
 0x6d5   :  { %1453 = vmatprep.subr.bf16.mxu0 %v6422_v7  ;;  %1494 = vmatprep.subr.bf16.mxu1 %v6593_v6 }
 0x6d8   :  { %1454 = vmatpush1.bf16.msra.mxu0 %v6426_v8  ;;  %1495 = vmatpush1.bf16.msra.mxu1 %v6597_v9  ;;  %v8004_v8 = vld [vmem:[#allocation27_spill] sm:$0xff] }
 0x6d9   :  { %1455 = vmatprep.subr.bf16.mxu0 %v6430_v11  ;;  %1496 = vmatprep.subr.bf16.mxu1 %v6601_v10 }
 0x6dc   :  { %1456 = vmatpush1.bf16.msra.mxu0 %v6434_v13  ;;  %1497 = vmatpush1.bf16.msra.mxu1 %v6605_v3  ;;  %v8005_v13 = vld [vmem:[#allocation38_spill] sm:$0xff] }
 0x6dd   :  { %1457 = vmatprep.subr.bf16.mxu0 %v6438_v14  ;;  %1498 = vmatprep.subr.bf16.mxu1 %v5728_v24  ;;  %v5140_v24 = vld [vmem:[#allocation6 + $0x180] ss:$16 sps:$4 sm:$0xff]  }
 0x6e0   :  { %1458 = vmatpush1.bf16.msra.mxu0 %v6442_v17  ;;  %1499 = vmatpush1.bf16.msra.mxu1 %v5729_v52  ;;  %v5143_v52 = vld [vmem:[#allocation6 + $0x188] ss:$16 sps:$4 sm:$0xff]  }
 0x6e1   :  { %1459 = vmatprep.subr.bf16.mxu0 %v6446_v18  ;;  %1500 = vmatprep.subr.bf16.mxu1 %v5730_v30  ;;  %v5148_v30 = vld [vmem:[#allocation6 + $0x1a4] ss:$16 sps:$4 sm:$0xff]  }
 0x6e4   :  { %1460 = vmatpush1.bf16.msra.mxu0 %v6450_v21  ;;  %1501 = vmatpush1.bf16.msra.mxu1 %v5731_v58  ;;  %v5151_v58 = vld [vmem:[#allocation6 + $0x1ac] ss:$16 sps:$4 sm:$0xff]  }
 0x6e5   :  { %1819 = vmatprep.subr.bf16.mxu0 %v5118_v41  ;;  %1892 = vmatprep.subr.bf16.mxu1 %v5121_v45  ;;  %v5146_v41 = vld [vmem:[#allocation6 + $0x1a0] ss:$16 sps:$4 sm:$0xff]   ;;  %v5149_v45 = vld [vmem:[#allocation6 + $0x1a8] ss:$16 sps:$4 sm:$0xff]  }
 0x79a   :  { %v1367_v59 = vpop.f32.mrb[24].mxu0  ;;  %v1408_v7 = vpop.f32.mrb[56].mxu1 }
 0x79b   :  { %v1415_v11 = vadd.f32 %v1367_v59, %v8004_v8  ;;  %v1417_v14 = vadd.f32 %v1408_v7, %v8005_v13  ;;  %v1369_v17 = vpop.f32.mrb[25].mxu0  ;;  %v1410_v54 = vpop.f32.mrb[57].mxu1  ;;  %v5154_v59 = vld [vmem:[#allocation6 + $0x1c4] ss:$16 sps:$4 sm:$0xff]   ;;  %v5157_v7 = vld [vmem:[#allocation6 + $0x1cc] ss:$16 sps:$4 sm:$0xff]  }
 0x79c   :  { %v1416_v18 = vadd.f32 %v1369_v17, %v8006_v39  ;;  %v1418_v60 = vadd.f32 %v1410_v54, %v8007_v29  ;;  %v1371_v63 = vpop.f32.mrb[26].mxu0  ;;  %v1412_v21 = vpop.f32.mrb[58].mxu1  ;;  %v5152_v8 = vld [vmem:[#allocation6 + $0x1c0] ss:$16 sps:$4 sm:$0xff]   ;;  %v5160_v13 = vld [vmem:[#allocation6 + $0x1e4] ss:$16 sps:$4 sm:$0xff]   ;;  %v1634_v39 = vpack.c.bf16 %v6388_v47, %v6340_v56  ;;  %v1636_v29 = vpack.c.bf16 %v6626_v25, %v6558_v31 }
 0x79d   :  { %v4778_v1 = vmul.f32 -1.442695, %v1415_v11  ;;  %v1372_v2 = vpop.f32.mrb[27].mxu0  ;;  %v1413_v5 = vpop.f32.mrb[59].mxu1  ;;  %v5155_v11 = vld [vmem:[#allocation6 + $0x1c8] ss:$16 sps:$4 sm:$0xff]  }
 0x79e   :  { %v4779_v6 = vmul.f32 -1.442695, %v1416_v18  ;;  %v4780_v9 = vmul.f32 -1.442695, %v1418_v60  ;;  %v5158_v17 = vld [vmem:[#allocation6 + $0x1e0] ss:$16 sps:$4 sm:$0xff]   ;;  %v1635_v18 = vpack.c.bf16 %v6510_v49, %v6464_v35 }
 0x79f   :  { %5412 = vpow2.f32 %v4778_v1  ;;  %v5161_v54 = vld [vmem:[#allocation6 + $0x1e8] ss:$16 sps:$4 sm:$0xff]   ;;  %v6684_v56 = vld [vmem:[#allocation8 + $0x104] ss:$16 sps:$4 sm:$0xff]   ;;  %v6686_v47 = vld [vmem:[#allocation8 + $0x10c] ss:$16 sps:$4 sm:$0xff]  }
 0x7a0   :  { %5414 = vpow2.f32 %v4779_v6  ;;  %v6688_v35 = vld [vmem:[#allocation8 + $0x100] ss:$16 sps:$4 sm:$0xff]   ;;  %v6690_v49 = vld [vmem:[#allocation8 + $0x108] ss:$16 sps:$4 sm:$0xff]   ;;  %v6696_v31 = vld [vmem:[#allocation8 + $0x124] ss:$16 sps:$4 sm:$0xff]  }
 0x7a1   :  { %5416 = vpow2.f32 %v4780_v9  ;;  %v6698_v25 = vld [vmem:[#allocation8 + $0x12c] ss:$16 sps:$4 sm:$0xff]   ;;  %v6700_v60 = vld [vmem:[#allocation8 + $0x120] ss:$16 sps:$4 sm:$0xff]   ;;  %v6702_v63 = vld [vmem:[#allocation8 + $0x128] ss:$16 sps:$4 sm:$0xff]  }
 0x7a2   :  { %5418 = vtanh.f32 %v1417_v14  ;;  %v5163_v14 = vld [vmem:[#allocation6 + $0x1ec] ss:$16 sps:$4 sm:$0xff]   ;;  %v6708_v21 = vld [vmem:[#allocation8 + $0x144] ss:$16 sps:$4 sm:$0xff]   ;;  %v6712_v2 = vld [vmem:[#allocation8 + $0x140] ss:$16 sps:$4 sm:$0xff]  }
 0x7a3   :  { %v6710_v1 = vld [vmem:[#allocation8 + $0x14c] ss:$16 sps:$4 sm:$0xff]   ;;  %v6714_v5 = vld [vmem:[#allocation8 + $0x148] ss:$16 sps:$4 sm:$0xff]   ;;  %v6720_v6 = vld [vmem:[#allocation8 + $0x164] ss:$16 sps:$4 sm:$0xff]  }
 0x7a4   :  { %v6722_v9 = vld [vmem:[#allocation8 + $0x16c] ss:$16 sps:$4 sm:$0xff]  }
 0x7a9   :  { %v5413_v10 = vpop.eup %5412 }
 0x7aa   :  { %v5415_v3 = vpop.eup %5414  ;;  %v1422_v42 = vadd.f32 1.0, %v5413_v10  ;;  %v6724_v10 = vld [vmem:[#allocation8 + $0x160] ss:$16 sps:$4 sm:$0xff]  }
 0x7ab   :  { %v1428_v0 = vadd.f32 1.0, %v5415_v3  ;;  %v5417_v46 = vpop.eup %5416  ;;  %v6726_v3 = vld [vmem:[#allocation8 + $0x168] ss:$16 sps:$4 sm:$0xff]  }
 0x7ac   :  { %5420 = vrcp.f32 %v1422_v42  ;;  %v5419_v19 = vpop.eup %5418  ;;  %v1435_v20 = vadd.f32 1.0, %v5417_v46  ;;  %v6732_v42 = vld [vmem:[#allocation8 + $0x184] ss:$16 sps:$4 sm:$0xff]   ;;  %v6736_v46 = vld [vmem:[#allocation8 + $0x180] ss:$16 sps:$4 sm:$0xff]  }
 0x7ad   :  { %5422 = vrcp.f32 %v1428_v0  ;;  %v6734_v0 = vld [vmem:[#allocation8 + $0x18c] ss:$16 sps:$4 sm:$0xff]  }
 0x7ae   :  { %5424 = vrcp.f32 %v1435_v20  ;;  %v6750_v20 = vld [vmem:[#allocation8 + $0x1a8] ss:$16 sps:$4 sm:$0xff]  }
 0x7b6   :  { %v5421_v36 = vpop.eup %5420 }
 0x7b7   :  { %v5423_v32 = vpop.eup %5422  ;;  %v1439_v38 = vmul.f32 %v5421_v36, %v5419_v19  ;;  %v6738_v19 = vld [vmem:[#allocation8 + $0x188] ss:$16 sps:$4 sm:$0xff]   ;;  %v6744_v36 = vld [vmem:[#allocation8 + $0x1a4] ss:$16 sps:$4 sm:$0xff]  }
 0x7b8   :  { %v1438_v43 = vmul.f32 %v5423_v32, %v6623_v33  ;;  %v5425_v51 = vpop.eup %5424  ;;  %v5134_v33 = vld [vmem:[#allocation6 + $0x160] ss:$16 sps:$4 sm:$0xff]   ;;  %v6746_v32 = vld [vmem:[#allocation8 + $0x1ac] ss:$16 sps:$4 sm:$0xff]  }
 0x7ba   :  { %v6663_v40 = vadd.f32 %v1439_v38, %v1438_v43  ;;  %v6748_v38 = vld [vmem:[#allocation8 + $0x1a0] ss:$16 sps:$4 sm:$0xff]   ;;  %v6756_v43 = vld [vmem:[#allocation8 + $0x1c4] ss:$16 sps:$4 sm:$0xff]  }
 0x7bc   :  { %5426 = vtanh.f32 %v6663_v40 }
 0x7c6   :  { %v5427_v23 = vpop.eup %5426 }
 0x7c7   :  { %v6666_v48 = vmul.f32 %v5427_v23, %v5425_v51  ;;  %v6758_v51 = vld [vmem:[#allocation8 + $0x1cc] ss:$16 sps:$4 sm:$0xff]   ;;  %v6760_v23 = vld [vmem:[#allocation8 + $0x1c0] ss:$16 sps:$4 sm:$0xff]  }
 0x7c9   :  { %v1444_v53 = vpack.c.bf16 %v6666_v48, %v6666_v48 }
 0x7cb   :  { %1478 = vmatmul.mubr.bf16.vlgmr.msra.gmra.mrb[28].mxu0 %v1444_v53  ;;  %1519 = vmatmul.mubr.bf16.vlgmr.msra.gmra.mrb[60].mxu1 %v1444_v53  ;;  %v6770_v53 = vld [vmem:[#allocation8 + $0x1ec] ss:$16 sps:$4 sm:$0xff]  }
 0x7cc   :  { %1820 = vmatpush1.bf16.msra.mxu0 %v5116_v4  ;;  %1893 = vmatpush1.bf16.msra.mxu1 %v5119_v62  ;;  %v6762_v4 = vld [vmem:[#allocation8 + $0x1c8] ss:$16 sps:$4 sm:$0xff]   ;;  %v6768_v62 = vld [vmem:[#allocation8 + $0x1e4] ss:$16 sps:$4 sm:$0xff]  }
 0x7cd   :  { %1821 = vmatprep.subr.bf16.mxu0 %v5124_v61  ;;  %1894 = vmatprep.subr.bf16.mxu1 %v5127_v44  ;;  %v6772_v61 = vld [vmem:[#allocation8 + $0x1e0] ss:$16 sps:$4 sm:$0xff]   ;;  %v6774_v44 = vld [vmem:[#allocation8 + $0x1e8] ss:$16 sps:$4 sm:$0xff]  }
 0x7ce   :  { %1851 = vmatprep.mubr.bf16.mxu0 %v7994_v37  ;;  %1924 = vmatprep.mubr.bf16.mxu1 %v7994_v37 }
 0x7d0   :  { %1822 = vmatpush1.bf16.msra.mxu0 %v5122_v50  ;;  %1895 = vmatpush1.bf16.msra.mxu1 %v5125_v55 }
 0x7d1   :  { %1823 = vmatprep.subr.bf16.mxu0 %v5130_v28  ;;  %1896 = vmatprep.subr.bf16.mxu1 %v5133_v57  ;;  %v8008_v28 = vld [vmem:[#allocation29_spill] sm:$0xff] }
 0x7d4   :  { %1824 = vmatpush1.bf16.msra.mxu0 %v5128_v34  ;;  %1897 = vmatpush1.bf16.msra.mxu1 %v5131_v27  ;;  %v8009_v34 = vld [vmem:[#allocation40_spill] sm:$0xff] }
 0x7d5   :  { %1825 = vmatprep.subr.bf16.mxu0 %v5136_v22  ;;  %1898 = vmatprep.subr.bf16.mxu1 %v5139_v26 }
 0x7d8   :  { %1826 = vmatpush1.bf16.msra.mxu0 %v5134_v33  ;;  %1899 = vmatpush1.bf16.msra.mxu1 %v5137_v12  ;;  %v8010_v33 = vld [vmem:[#allocation30_spill] sm:$0xff] }
 0x7d9   :  { %1827 = vmatprep.subr.bf16.mxu0 %v5142_v15  ;;  %1900 = vmatprep.subr.bf16.mxu1 %v5145_v16  ;;  %v8011_v15 = vld [vmem:[#allocation41_spill] sm:$0xff] }
 0x7dc   :  { %1828 = vmatpush1.bf16.msra.mxu0 %v5140_v24  ;;  %1901 = vmatpush1.bf16.msra.mxu1 %v5143_v52 }
 0x7dd   :  { %1829 = vmatprep.subr.bf16.mxu0 %v5148_v30  ;;  %1902 = vmatprep.subr.bf16.mxu1 %v5151_v58 }
 0x7e0   :  { %1830 = vmatpush1.bf16.msra.mxu0 %v5146_v41  ;;  %1903 = vmatpush1.bf16.msra.mxu1 %v5149_v45 }
 0x7e1   :  { %1831 = vmatprep.subr.bf16.mxu0 %v5154_v59  ;;  %1904 = vmatprep.subr.bf16.mxu1 %v5157_v7 }
 0x7e4   :  { %1832 = vmatpush1.bf16.msra.mxu0 %v5152_v8  ;;  %1905 = vmatpush1.bf16.msra.mxu1 %v5155_v11 }
 0x7e5   :  { %1833 = vmatprep.subr.bf16.mxu0 %v5160_v13  ;;  %1906 = vmatprep.subr.bf16.mxu1 %v5163_v14 }
 0x7e8   :  { %1834 = vmatpush1.bf16.msra.mxu0 %v5158_v17  ;;  %1907 = vmatpush1.bf16.msra.mxu1 %v5161_v54 }
 0x7e9   :  { %2125 = vmatprep.subr.bf16.mxu0 %v6684_v56  ;;  %2166 = vmatprep.subr.bf16.mxu1 %v6686_v47 }
 0x7eb   :  { %1852 = vmatmul.mubr.bf16.vlgmr.msra.gmra.mrb[32].mxu0 %v1634_v39  ;;  %1925 = vmatmul.mubr.bf16.vlgmr.msra.gmra.mrb[64].mxu1 %v1634_v39 }
 0x7ec   :  { %1861 = vmatprep.mubr.bf16.mxu0 %v7994_v37  ;;  %1934 = vmatprep.mubr.bf16.mxu1 %v7994_v37 }
 0x7ed   :  { %2126 = vmatpush1.bf16.msra.mxu0 %v6688_v35  ;;  %2167 = vmatpush1.bf16.msra.mxu1 %v6690_v49 }
 0x7ee   :  { %2127 = vmatprep.subr.bf16.mxu0 %v6696_v31  ;;  %2168 = vmatprep.subr.bf16.mxu1 %v6698_v25 }
 0x7f1   :  { %2128 = vmatpush1.bf16.msra.mxu0 %v6700_v60  ;;  %2169 = vmatpush1.bf16.msra.mxu1 %v6702_v63 }
 0x7f2   :  { %2129 = vmatprep.subr.bf16.mxu0 %v6708_v21  ;;  %2170 = vmatprep.subr.bf16.mxu1 %v6710_v1 }
 0x7f3   :  { %1862 = vmatmul.mubr.bf16.gmra.mrb[36].mxu0 %v1635_v18  ;;  %1935 = vmatmul.mubr.bf16.gmra.mrb[68].mxu1 %v1635_v18 }
 0x7f4   :  { %1871 = vmatprep.mubr.bf16.mxu0 %v7994_v37  ;;  %1944 = vmatprep.mubr.bf16.mxu1 %v7994_v37 }
 0x7f5   :  { %2130 = vmatpush1.bf16.msra.mxu0 %v6712_v2  ;;  %2171 = vmatpush1.bf16.msra.mxu1 %v6714_v5 }
 0x7f6   :  { %2131 = vmatprep.subr.bf16.mxu0 %v6720_v6  ;;  %2172 = vmatprep.subr.bf16.mxu1 %v6722_v9 }
 0x7f9   :  { %2132 = vmatpush1.bf16.msra.mxu0 %v6724_v10  ;;  %2173 = vmatpush1.bf16.msra.mxu1 %v6726_v3 }
 0x7fa   :  { %2133 = vmatprep.subr.bf16.mxu0 %v6732_v42  ;;  %2174 = vmatprep.subr.bf16.mxu1 %v6734_v0 }
 0x7fb   :  { %1872 = vmatmul.mubr.bf16.gmra.mrb[40].mxu0 %v1636_v29  ;;  %1945 = vmatmul.mubr.bf16.gmra.mrb[72].mxu1 %v1636_v29 }
 0x7fc   :  { %1881 = vmatprep.mubr.bf16.mxu0 %v7994_v37  ;;  %1954 = vmatprep.mubr.bf16.mxu1 %v7994_v37 }
 0x7fd   :  { %2134 = vmatpush1.bf16.msra.mxu0 %v6736_v46  ;;  %2175 = vmatpush1.bf16.msra.mxu1 %v6738_v19 }
 0x7fe   :  { %2135 = vmatprep.subr.bf16.mxu0 %v6744_v36  ;;  %2176 = vmatprep.subr.bf16.mxu1 %v6746_v32 }
 0x801   :  { %2136 = vmatpush1.bf16.msra.mxu0 %v6748_v38  ;;  %2177 = vmatpush1.bf16.msra.mxu1 %v6750_v20 }
 0x802   :  { %2137 = vmatprep.subr.bf16.mxu0 %v6756_v43  ;;  %2178 = vmatprep.subr.bf16.mxu1 %v6758_v51 }
 0x805   :  { %2138 = vmatpush1.bf16.msra.mxu0 %v6760_v23  ;;  %2179 = vmatpush1.bf16.msra.mxu1 %v6762_v4 }
 0x806   :  { %2139 = vmatprep.subr.bf16.mxu0 %v6768_v62  ;;  %2180 = vmatprep.subr.bf16.mxu1 %v6770_v53 }
 0x809   :  { %2140 = vmatpush1.bf16.msra.mxu0 %v6772_v61  ;;  %2181 = vmatpush1.bf16.msra.mxu1 %v6774_v44 }
 0x80a   :  { %2237 = vmatprep.subr.bf16.mxu0 %v6684_v56  ;;  %2278 = vmatprep.subr.bf16.mxu1 %v6686_v47 }
 0x89e   :  { %v1479_v50 = vpop.f32.mrb[28].mxu0  ;;  %v1520_v55 = vpop.f32.mrb[60].mxu1 }
 0x89f   :  { %v1527_v57 = vadd.f32 %v1479_v50, %v8008_v28  ;;  %v1529_v27 = vadd.f32 %v1520_v55, %v8009_v34  ;;  %v1481_v22 = vpop.f32.mrb[29].mxu0  ;;  %v1522_v26 = vpop.f32.mrb[61].mxu1 }
 0x8a0   :  { %v1528_v12 = vadd.f32 %v1481_v22, %v8010_v33  ;;  %v1530_v16 = vadd.f32 %v1522_v26, %v8011_v15  ;;  %v1483_v24 = vpop.f32.mrb[30].mxu0  ;;  %v1524_v52 = vpop.f32.mrb[62].mxu1 }
 0x8a1   :  { %v4781_v30 = vmul.f32 -1.442695, %v1527_v57  ;;  %v1484_v58 = vpop.f32.mrb[31].mxu0  ;;  %v1525_v41 = vpop.f32.mrb[63].mxu1 }
 0x8a2   :  { %v4782_v45 = vmul.f32 -1.442695, %v1528_v12  ;;  %v4783_v59 = vmul.f32 -1.442695, %v1530_v16 }
 0x8a3   :  { %5428 = vpow2.f32 %v4781_v30 }
 0x8a4   :  { %5430 = vpow2.f32 %v4782_v45 }
 0x8a5   :  { %5432 = vpow2.f32 %v4783_v59 }
 0x8a6   :  { %5434 = vtanh.f32 %v1529_v27 }
 0x8ad   :  { %v5429_v7 = vpop.eup %5428 }
 0x8ae   :  { %v5431_v8 = vpop.eup %5430  ;;  %v1534_v11 = vadd.f32 1.0, %v5429_v7 }
 0x8af   :  { %v1540_v13 = vadd.f32 1.0, %v5431_v8  ;;  %v5433_v14 = vpop.eup %5432 }
 0x8b0   :  { %5436 = vrcp.f32 %v1534_v11  ;;  %v5435_v17 = vpop.eup %5434  ;;  %v1547_v29 = vadd.f32 1.0, %v5433_v14 }
 0x8b1   :  { %5438 = vrcp.f32 %v1540_v13 }
 0x8b2   :  { %5440 = vrcp.f32 %v1547_v29  ;;  %v1625_v29 = vld [vmem:[#allocation9 + $0x4] sm:$0xf] }
 0x8ba   :  { %v5437_v54 = vpop.eup %5436 }
 0x8bb   :  { %v5439_v39 = vpop.eup %5438  ;;  %v1551_v18 = vmul.f32 %v5437_v54, %v5435_v17 }
 0x8bc   :  { %v1550_v50 = vmul.f32 %v5439_v39, %v6663_v40  ;;  %v5441_v58 = vpop.eup %5440 }
 0x8be   :  { %v1552_v55 = vadd.f32 %v1551_v18, %v1550_v50  ;;  %v6787_v28 = vpop.f32.mrb[32].mxu0  ;;  %v6789_v57 = vpop.f32.mrb[64].mxu1 }
 0x8bf   :  { %v6791_v34 = vpop.f32.mrb[33].mxu0  ;;  %v6793_v27 = vpop.f32.mrb[65].mxu1 }
 0x8c0   :  { %1557 = vst [vmem:[#allocation15] sm:$0xff] %v1552_v55  ;;  %v6795_v22 = vpop.f32.mrb[34].mxu0  ;;  %v6797_v26 = vpop.f32.mrb[66].mxu1  ;;  %5442 = vtanh.f32 %v1552_v55 }
 0x8c1   :  { %v6799_v33 = vpop.f32.mrb[35].mxu0  ;;  %v6801_v12 = vpop.f32.mrb[67].mxu1 }
 0x8c6   :  { %v6803_v40 = vpop.f32.mrb[36].mxu0  ;;  %v6805_v15 = vpop.f32.mrb[68].mxu1 }
 0x8c7   :  { %8012 = vst [vmem:[#allocation33_spill] sm:$0xff] %v6805_v15  ;;  %v6807_v16 = vpop.f32.mrb[37].mxu0  ;;  %v6809_v24 = vpop.f32.mrb[69].mxu1 }
 0x8c8   :  { %8013 = vst [vmem:[#allocation23_spill] sm:$0xff] %v6807_v16  ;;  %8014 = vst [vmem:[#allocation34_spill] sm:$0xff] %v6809_v24  ;;  %v6811_v52 = vpop.f32.mrb[38].mxu0  ;;  %v6813_v30 = vpop.f32.mrb[70].mxu1 }
 0x8c9   :  { %8015 = vst [vmem:[#allocation24_spill] sm:$0xff] %v6811_v52  ;;  %8016 = vst [vmem:[#allocation35_spill] sm:$0xff] %v6813_v30  ;;  %v6815_v41 = vpop.f32.mrb[39].mxu0  ;;  %v6817_v45 = vpop.f32.mrb[71].mxu1 }
 0x8ca   :  { %8017 = vst [vmem:[#allocation25_spill] sm:$0xff] %v6815_v41  ;;  %8018 = vst [vmem:[#allocation36_spill] sm:$0xff] %v6817_v45  ;;  %v5443_v59 = vpop.eup %5442 }
 0x8cb   :  { %v1554_v7 = vmul.f32 %v5443_v59, %v5441_v58 }
 0x8cd   :  { %v1637_v8 = vpack.c.bf16 %v1554_v7, %v6666_v48  ;;  %1556 = vst [vmem:[#allocation13] sm:$0xff] %v1554_v7 }
 0x8ce   :  { %v6820_v11 = vpop.f32.mrb[40].mxu0  ;;  %v6822_v13 = vpop.f32.mrb[72].mxu1 }
 0x8cf   :  { %8019 = vst [vmem:[#allocation26_spill] sm:$0xff] %v6820_v11  ;;  %8020 = vst [vmem:[#allocation37_spill] sm:$0xff] %v6822_v13  ;;  %v6824_v14 = vpop.f32.mrb[41].mxu0  ;;  %v6826_v17 = vpop.f32.mrb[73].mxu1  ;;  %1882 = vmatmul.mubr.bf16.gmra.mrb[44].mxu0 %v1637_v8  ;;  %1955 = vmatmul.mubr.bf16.gmra.mrb[76].mxu1 %v1637_v8 }
 0x8d0   :  { %8021 = vst [vmem:[#allocation27_spill] sm:$0xff] %v6824_v14  ;;  %8022 = vst [vmem:[#allocation38_spill] sm:$0xff] %v6826_v17  ;;  %v6828_v54 = vpop.f32.mrb[42].mxu0  ;;  %v6830_v39 = vpop.f32.mrb[74].mxu1  ;;  %2157 = vmatprep.mubr.bf16.mxu0 %v7994_v37  ;;  %2198 = vmatprep.mubr.bf16.mxu1 %v7994_v37 }
 0x8d1   :  { %8023 = vst [vmem:[#allocation28_spill] sm:$0xff] %v6828_v54  ;;  %8024 = vst [vmem:[#allocation39_spill] sm:$0xff] %v6830_v39  ;;  %v6834_v48 = vpop.f32.mrb[43].mxu0  ;;  %v6836_v18 = vpop.f32.mrb[75].mxu1  ;;  %v8034_v39 = vld [vmem:[#allocation31_spill] sm:$0xff] }
 0x8d2   :  { %8025 = vst [vmem:[#allocation29_spill] sm:$0xff] %v6834_v48  ;;  %8026 = vst [vmem:[#allocation40_spill] sm:$0xff] %v6836_v18  ;;  %v8033_v18 = vld [vmem:[#allocation21_spill] sm:$0xff]  ;;  %v6890_v54 = vrot.slane %v1625_v29, %v8034_v39 }
 0x8d3   :  { %v6887_v48 = vrot.slane %v1625_v29, %v8033_v18 }
 0x8d4   :  { %v1927_v18 = vadd.f32 %v6789_v57, %v6890_v54 }
 0x8d7   :  { %2158 = vmatmul.mubr.bf16.vlgmr.msra.gmra.mrb[48].mxu0 %v7994_v37  ;;  %2199 = vmatmul.mubr.bf16.vlgmr.msra.gmra.mrb[80].mxu1 %v7994_v37 }
 0x8d8   :  { %2238 = vmatpush1.bf16.msra.mxu0 %v6688_v35  ;;  %2279 = vmatpush1.bf16.msra.mxu1 %v6690_v49 }
 0x8d9   :  { %2239 = vmatprep.subr.bf16.mxu0 %v6696_v31  ;;  %2280 = vmatprep.subr.bf16.mxu1 %v6698_v25 }
 0x8da   :  { %2269 = vmatprep.mubr.bf16.mxu0 %v7994_v37  ;;  %2310 = vmatprep.mubr.bf16.mxu1 %v7994_v37 }
 0x8dc   :  { %2240 = vmatpush1.bf16.msra.mxu0 %v6700_v60  ;;  %2281 = vmatpush1.bf16.msra.mxu1 %v6702_v63 }
 0x8dd   :  { %2241 = vmatprep.subr.bf16.mxu0 %v6708_v21  ;;  %2282 = vmatprep.subr.bf16.mxu1 %v6710_v1 }
 0x8e0   :  { %2242 = vmatpush1.bf16.msra.mxu0 %v6712_v2  ;;  %2283 = vmatpush1.bf16.msra.mxu1 %v6714_v5 }
 0x8e1   :  { %2243 = vmatprep.subr.bf16.mxu0 %v6720_v6  ;;  %2284 = vmatprep.subr.bf16.mxu1 %v6722_v9 }
 0x8e4   :  { %2244 = vmatpush1.bf16.msra.mxu0 %v6724_v10  ;;  %2285 = vmatpush1.bf16.msra.mxu1 %v6726_v3 }
 0x8e5   :  { %2245 = vmatprep.subr.bf16.mxu0 %v6732_v42  ;;  %2286 = vmatprep.subr.bf16.mxu1 %v6734_v0 }
 0x8e8   :  { %2246 = vmatpush1.bf16.msra.mxu0 %v6736_v46  ;;  %2287 = vmatpush1.bf16.msra.mxu1 %v6738_v19 }
 0x8e9   :  { %2247 = vmatprep.subr.bf16.mxu0 %v6744_v36  ;;  %2288 = vmatprep.subr.bf16.mxu1 %v6746_v32 }
 0x8ec   :  { %2248 = vmatpush1.bf16.msra.mxu0 %v6748_v38  ;;  %2289 = vmatpush1.bf16.msra.mxu1 %v6750_v20 }
 0x8ed   :  { %2249 = vmatprep.subr.bf16.mxu0 %v6756_v43  ;;  %2290 = vmatprep.subr.bf16.mxu1 %v6758_v51 }
 0x8f0   :  { %2250 = vmatpush1.bf16.msra.mxu0 %v6760_v23  ;;  %2291 = vmatpush1.bf16.msra.mxu1 %v6762_v4 }
 0x8f1   :  { %2251 = vmatprep.subr.bf16.mxu0 %v6768_v62  ;;  %2292 = vmatprep.subr.bf16.mxu1 %v6770_v53 }
 0x8f4   :  { %2252 = vmatpush1.bf16.msra.mxu0 %v6772_v61  ;;  %2293 = vmatpush1.bf16.msra.mxu1 %v6774_v44 }
 0x8f5   :  { %2349 = vmatprep.subr.bf16.mxu0 %v6684_v56  ;;  %2390 = vmatprep.subr.bf16.mxu1 %v6686_v47 }
 0x9a2   :  { %v6874_v50 = vpop.f32.mrb[44].mxu0  ;;  %v6876_v55 = vpop.f32.mrb[76].mxu1 }
 0x9a3   :  { %8027 = vst [vmem:[#allocation30_spill] sm:$0xff] %v6874_v50  ;;  %8028 = vst [vmem:[#allocation41_spill] sm:$0xff] %v6876_v55  ;;  %v6878_v58 = vpop.f32.mrb[45].mxu0  ;;  %v6880_v59 = vpop.f32.mrb[77].mxu1  ;;  %v8037_v50 = vld [vmem:[#allocation22_spill] sm:$0xff] }
 0x9a4   :  { %8029 = vst [vmem:[#allocation42_spill] sm:$0xff] %v6878_v58  ;;  %8030 = vst [vmem:[#allocation43_spill] sm:$0xff] %v6880_v59  ;;  %v6882_v7 = vpop.f32.mrb[46].mxu0  ;;  %v6884_v8 = vpop.f32.mrb[78].mxu1  ;;  %v6897_v55 = vrot.slane %v1625_v29, %v8037_v50  ;;  %v8038_v58 = vld [vmem:[#allocation32_spill] sm:$0xff] }
 0x9a5   :  { %8031 = vst [vmem:[#allocation44_spill] sm:$0xff] %v6882_v7  ;;  %8032 = vst [vmem:[#allocation45_spill] sm:$0xff] %v6884_v8  ;;  %v6892_v17 = vpop.f32.mrb[47].mxu0  ;;  %v6894_v14 = vpop.f32.mrb[79].mxu1  ;;  %v6900_v13 = vrot.slane %v1625_v29, %v8038_v58  ;;  %v1854_v7 = vadd.f32 %v6787_v28, %v6887_v48 }
 0x9a6   :  { %8035 = vst [vmem:[#allocation46_spill] sm:$0xff] %v6892_v17  ;;  %8036 = vst [vmem:[#allocation47_spill] sm:$0xff] %v6894_v14  ;;  %v1856_v39 = vadd.f32 %v6791_v34, %v6897_v55 }
 0x9a7   :  { %v1929_v17 = vadd.f32 %v6793_v27, %v6900_v13 }
 0x9aa   :  { %v2159_v8 = vpop.f32.mrb[48].mxu0  ;;  %v2200_v14 = vpop.f32.mrb[80].mxu1 }
 0x9ab   :  { %v2207_v59 = vadd.f32 %v2159_v8, %v1854_v7  ;;  %v2209_v50 = vadd.f32 %v2200_v14, %v1927_v18  ;;  %v2161_v11 = vpop.f32.mrb[49].mxu0  ;;  %v2202_v45 = vpop.f32.mrb[81].mxu1  ;;  %v1933_v8 = vadd.f32 %v6801_v12, %v6900_v13 }
 0x9ac   :  { %v2208_v29 = vadd.f32 %v2161_v11, %v1856_v39  ;;  %v2210_v58 = vadd.f32 %v2202_v45, %v1929_v17  ;;  %v2163_v41 = vpop.f32.mrb[50].mxu0  ;;  %v2204_v30 = vpop.f32.mrb[82].mxu1 }
 0x9ad   :  { %v4848_v28 = vmul.f32 -1.442695, %v2207_v59  ;;  %v2164_v52 = vpop.f32.mrb[51].mxu0  ;;  %v2205_v24 = vpop.f32.mrb[83].mxu1  ;;  %v1860_v59 = vadd.f32 %v6799_v33, %v6897_v55 }
 0x9ae   :  { %v4849_v57 = vmul.f32 -1.442695, %v2208_v29  ;;  %v4850_v34 = vmul.f32 -1.442695, %v2210_v58  ;;  %v1931_v58 = vadd.f32 %v6797_v26, %v6890_v54 }
 0x9af   :  { %5444 = vpow2.f32 %v4848_v28 }
 0x9b0   :  { %5446 = vpow2.f32 %v4849_v57 }
 0x9b1   :  { %5448 = vpow2.f32 %v4850_v34 }
 0x9b2   :  { %5450 = vtanh.f32 %v2209_v50  ;;  %v1858_v50 = vadd.f32 %v6795_v22, %v6887_v48 }
 0x9b9   :  { %v5445_v16 = vpop.eup %5444 }
 0x9ba   :  { %v5447_v15 = vpop.eup %5446  ;;  %v2214_v27 = vadd.f32 1.0, %v5445_v16 }
 0x9bb   :  { %v2220_v7 = vadd.f32 1.0, %v5447_v15  ;;  %v5449_v14 = vpop.eup %5448 }
 0x9bc   :  { %5452 = vrcp.f32 %v2214_v27  ;;  %v5451_v11 = vpop.eup %5450  ;;  %v2227_v17 = vadd.f32 1.0, %v5449_v14 }
 0x9bd   :  { %5454 = vrcp.f32 %v2220_v7 }
 0x9be   :  { %5456 = vrcp.f32 %v2227_v17 }
 0x9c6   :  { %v5453_v45 = vpop.eup %5452 }
 0x9c7   :  { %v5455_v41 = vpop.eup %5454  ;;  %v2231_v30 = vmul.f32 %v5453_v45, %v5451_v11 }
 0x9c8   :  { %v2230_v52 = vmul.f32 0.0, %v5455_v41  ;;  %v5457_v39 = vpop.eup %5456 }
 0x9ca   :  { %v6910_v24 = vadd.f32 %v2231_v30, %v2230_v52 }
 0x9cc   :  { %5458 = vtanh.f32 %v6910_v24 }
 0x9d6   :  { %v5459_v18 = vpop.eup %5458 }
 0x9d7   :  { %v6913_v16 = vmul.f32 %v5459_v18, %v5457_v39 }
 0x9d9   :  { %v2236_v15 = vpack.c.bf16 %v6913_v16, %v6913_v16 }
 0x9db   :  { %2270 = vmatmul.mubr.bf16.vlgmr.msra.gmra.mrb[52].mxu0 %v2236_v15  ;;  %2311 = vmatmul.mubr.bf16.vlgmr.msra.gmra.mrb[84].mxu1 %v2236_v15 }
 0x9dc   :  { %2350 = vmatpush1.bf16.msra.mxu0 %v6688_v35  ;;  %2391 = vmatpush1.bf16.msra.mxu1 %v6690_v49 }
 0x9dd   :  { %2351 = vmatprep.subr.bf16.mxu0 %v6696_v31  ;;  %2392 = vmatprep.subr.bf16.mxu1 %v6698_v25 }
 0x9de   :  { %2381 = vmatprep.mubr.bf16.mxu0 %v7994_v37  ;;  %2422 = vmatprep.mubr.bf16.mxu1 %v7994_v37 }
 0x9e0   :  { %2352 = vmatpush1.bf16.msra.mxu0 %v6700_v60  ;;  %2393 = vmatpush1.bf16.msra.mxu1 %v6702_v63 }
 0x9e1   :  { %2353 = vmatprep.subr.bf16.mxu0 %v6708_v21  ;;  %2394 = vmatprep.subr.bf16.mxu1 %v6710_v1 }
 0x9e4   :  { %2354 = vmatpush1.bf16.msra.mxu0 %v6712_v2  ;;  %2395 = vmatpush1.bf16.msra.mxu1 %v6714_v5 }
 0x9e5   :  { %2355 = vmatprep.subr.bf16.mxu0 %v6720_v6  ;;  %2396 = vmatprep.subr.bf16.mxu1 %v6722_v9 }
 0x9e8   :  { %2356 = vmatpush1.bf16.msra.mxu0 %v6724_v10  ;;  %2397 = vmatpush1.bf16.msra.mxu1 %v6726_v3 }
 0x9e9   :  { %2357 = vmatprep.subr.bf16.mxu0 %v6732_v42  ;;  %2398 = vmatprep.subr.bf16.mxu1 %v6734_v0 }
 0x9ec   :  { %2358 = vmatpush1.bf16.msra.mxu0 %v6736_v46  ;;  %2399 = vmatpush1.bf16.msra.mxu1 %v6738_v19 }
 0x9ed   :  { %2359 = vmatprep.subr.bf16.mxu0 %v6744_v36  ;;  %2400 = vmatprep.subr.bf16.mxu1 %v6746_v32 }
 0x9f0   :  { %2360 = vmatpush1.bf16.msra.mxu0 %v6748_v38  ;;  %2401 = vmatpush1.bf16.msra.mxu1 %v6750_v20 }
 0x9f1   :  { %2361 = vmatprep.subr.bf16.mxu0 %v6756_v43  ;;  %2402 = vmatprep.subr.bf16.mxu1 %v6758_v51 }
 0x9f4   :  { %2362 = vmatpush1.bf16.msra.mxu0 %v6760_v23  ;;  %2403 = vmatpush1.bf16.msra.mxu1 %v6762_v4 }
 0x9f5   :  { %2363 = vmatprep.subr.bf16.mxu0 %v6768_v62  ;;  %2404 = vmatprep.subr.bf16.mxu1 %v6770_v53 }
 0x9f8   :  { %2364 = vmatpush1.bf16.msra.mxu0 %v6772_v61  ;;  %2405 = vmatpush1.bf16.msra.mxu1 %v6774_v44 }
 0x9f9   :  { %2461 = vmatprep.subr.bf16.mxu0 %v6684_v56  ;;  %2502 = vmatprep.subr.bf16.mxu1 %v6686_v47 }
 0xaae   :  { %v2271_v29 = vpop.f32.mrb[52].mxu0  ;;  %v2312_v28 = vpop.f32.mrb[84].mxu1 }
 0xaaf   :  { %v2319_v57 = vadd.f32 %v2271_v29, %v1858_v50  ;;  %v2321_v34 = vadd.f32 %v2312_v28, %v1931_v58  ;;  %v2273_v27 = vpop.f32.mrb[53].mxu0  ;;  %v2314_v7 = vpop.f32.mrb[85].mxu1 }
 0xab0   :  { %v2320_v14 = vadd.f32 %v2273_v27, %v1860_v59  ;;  %v2322_v11 = vadd.f32 %v2314_v7, %v1933_v8  ;;  %v2275_v45 = vpop.f32.mrb[54].mxu0  ;;  %v2316_v41 = vpop.f32.mrb[86].mxu1 }
 0xab1   :  { %v4851_v22 = vmul.f32 -1.442695, %v2319_v57  ;;  %v2276_v30 = vpop.f32.mrb[55].mxu0  ;;  %v2317_v17 = vpop.f32.mrb[87].mxu1  ;;  %v8040_v41 = vld [vmem:[#allocation23_spill] sm:$0xff] }
 0xab2   :  { %v4852_v26 = vmul.f32 -1.442695, %v2320_v14  ;;  %v4853_v33 = vmul.f32 -1.442695, %v2322_v11  ;;  %v8039_v11 = vld [vmem:[#allocation33_spill] sm:$0xff]  ;;  %v8041_v30 = vld [vmem:[#allocation34_spill] sm:$0xff] }
 0xab3   :  { %5460 = vpow2.f32 %v4851_v22  ;;  %v1937_v45 = vadd.f32 %v8039_v11, %v6890_v54  ;;  %v1866_v22 = vadd.f32 %v8040_v41, %v6897_v55  ;;  %v1939_v17 = vadd.f32 %v8041_v30, %v6900_v13 }
 0xab4   :  { %5462 = vpow2.f32 %v4852_v26 }
 0xab5   :  { %5464 = vpow2.f32 %v4853_v33 }
 0xab6   :  { %5466 = vtanh.f32 %v2321_v34 }
 0xabd   :  { %v5461_v52 = vpop.eup %5460 }
 0xabe   :  { %v5463_v39 = vpop.eup %5462  ;;  %v2326_v12 = vadd.f32 1.0, %v5461_v52 }
 0xabf   :  { %v2332_v18 = vadd.f32 1.0, %v5463_v39  ;;  %v5465_v15 = vpop.eup %5464 }
 0xac0   :  { %5468 = vrcp.f32 %v2326_v12  ;;  %v5467_v50 = vpop.eup %5466  ;;  %v2339_v29 = vadd.f32 1.0, %v5465_v15 }
 0xac1   :  { %5470 = vrcp.f32 %v2332_v18 }
 0xac2   :  { %5472 = vrcp.f32 %v2339_v29 }
 0xaca   :  { %v5469_v58 = vpop.eup %5468 }
 0xacb   :  { %v5471_v59 = vpop.eup %5470  ;;  %v2343_v8 = vmul.f32 %v5469_v58, %v5467_v50 }
 0xacc   :  { %v2342_v28 = vmul.f32 %v5471_v59, %v6910_v24  ;;  %v5473_v27 = vpop.eup %5472  ;;  %v1864_v24 = vadd.f32 %v6803_v40, %v6887_v48 }
 0xace   :  { %v6960_v57 = vadd.f32 %v2343_v8, %v2342_v28 }
 0xad0   :  { %5474 = vtanh.f32 %v6960_v57 }
 0xada   :  { %v5475_v7 = vpop.eup %5474 }
 0xadb   :  { %v6963_v14 = vmul.f32 %v5475_v7, %v5473_v27 }
 0xadd   :  { %v2348_v34 = vpack.c.bf16 %v6963_v14, %v6963_v14 }
 0xadf   :  { %2382 = vmatmul.mubr.bf16.vlgmr.msra.gmra.mrb[56].mxu0 %v2348_v34  ;;  %2423 = vmatmul.mubr.bf16.vlgmr.msra.gmra.mrb[88].mxu1 %v2348_v34 }
 0xae0   :  { %2462 = vmatpush1.bf16.msra.mxu0 %v6688_v35  ;;  %2503 = vmatpush1.bf16.msra.mxu1 %v6690_v49 }
 0xae1   :  { %2463 = vmatprep.subr.bf16.mxu0 %v6696_v31  ;;  %2504 = vmatprep.subr.bf16.mxu1 %v6698_v25 }
 0xae2   :  { %2493 = vmatprep.mubr.bf16.mxu0 %v7994_v37  ;;  %2534 = vmatprep.mubr.bf16.mxu1 %v7994_v37 }
 0xae4   :  { %2464 = vmatpush1.bf16.msra.mxu0 %v6700_v60  ;;  %2505 = vmatpush1.bf16.msra.mxu1 %v6702_v63 }
 0xae5   :  { %2465 = vmatprep.subr.bf16.mxu0 %v6708_v21  ;;  %2506 = vmatprep.subr.bf16.mxu1 %v6710_v1 }
 0xae8   :  { %2466 = vmatpush1.bf16.msra.mxu0 %v6712_v2  ;;  %2507 = vmatpush1.bf16.msra.mxu1 %v6714_v5 }
 0xae9   :  { %2467 = vmatprep.subr.bf16.mxu0 %v6720_v6  ;;  %2508 = vmatprep.subr.bf16.mxu1 %v6722_v9 }
 0xaec   :  { %2468 = vmatpush1.bf16.msra.mxu0 %v6724_v10  ;;  %2509 = vmatpush1.bf16.msra.mxu1 %v6726_v3 }
 0xaed   :  { %2469 = vmatprep.subr.bf16.mxu0 %v6732_v42  ;;  %2510 = vmatprep.subr.bf16.mxu1 %v6734_v0 }
 0xaf0   :  { %2470 = vmatpush1.bf16.msra.mxu0 %v6736_v46  ;;  %2511 = vmatpush1.bf16.msra.mxu1 %v6738_v19 }
 0xaf1   :  { %2471 = vmatprep.subr.bf16.mxu0 %v6744_v36  ;;  %2512 = vmatprep.subr.bf16.mxu1 %v6746_v32 }
 0xaf4   :  { %2472 = vmatpush1.bf16.msra.mxu0 %v6748_v38  ;;  %2513 = vmatpush1.bf16.msra.mxu1 %v6750_v20 }
 0xaf5   :  { %2473 = vmatprep.subr.bf16.mxu0 %v6756_v43  ;;  %2514 = vmatprep.subr.bf16.mxu1 %v6758_v51 }
 0xaf8   :  { %2474 = vmatpush1.bf16.msra.mxu0 %v6760_v23  ;;  %2515 = vmatpush1.bf16.msra.mxu1 %v6762_v4 }
 0xaf9   :  { %2475 = vmatprep.subr.bf16.mxu0 %v6768_v62  ;;  %2516 = vmatprep.subr.bf16.mxu1 %v6770_v53 }
 0xafc   :  { %2476 = vmatpush1.bf16.msra.mxu0 %v6772_v61  ;;  %2517 = vmatpush1.bf16.msra.mxu1 %v6774_v44 }
 0xafd   :  { %2573 = vmatprep.subr.bf16.mxu0 %v6684_v56  ;;  %2614 = vmatprep.subr.bf16.mxu1 %v6686_v47 }
 0xbb2   :  { %v2383_v26 = vpop.f32.mrb[56].mxu0  ;;  %v2424_v33 = vpop.f32.mrb[88].mxu1 }
 0xbb3   :  { %v2431_v52 = vadd.f32 %v2383_v26, %v1864_v24  ;;  %v2433_v39 = vadd.f32 %v2424_v33, %v1937_v45  ;;  %v2385_v12 = vpop.f32.mrb[57].mxu0  ;;  %v2426_v18 = vpop.f32.mrb[89].mxu1 }
 0xbb4   :  { %v2432_v15 = vadd.f32 %v2385_v12, %v1866_v22  ;;  %v2434_v50 = vadd.f32 %v2426_v18, %v1939_v17  ;;  %v2387_v58 = vpop.f32.mrb[58].mxu0  ;;  %v2428_v59 = vpop.f32.mrb[90].mxu1 }
 0xbb5   :  { %v4854_v40 = vmul.f32 -1.442695, %v2431_v52  ;;  %v2388_v8 = vpop.f32.mrb[59].mxu0  ;;  %v2429_v29 = vpop.f32.mrb[91].mxu1  ;;  %v8043_v58 = vld [vmem:[#allocation35_spill] sm:$0xff] }
 0xbb6   :  { %v4855_v28 = vmul.f32 -1.442695, %v2432_v15  ;;  %v4856_v27 = vmul.f32 -1.442695, %v2434_v50  ;;  %v1941_v59 = vadd.f32 %v8043_v58, %v6890_v54  ;;  %v8045_v29 = vld [vmem:[#allocation36_spill] sm:$0xff] }
 0xbb7   :  { %5476 = vpow2.f32 %v4854_v40  ;;  %v8044_v40 = vld [vmem:[#allocation25_spill] sm:$0xff] }
 0xbb8   :  { %5478 = vpow2.f32 %v4855_v28  ;;  %v1870_v8 = vadd.f32 %v8044_v40, %v6897_v55  ;;  %v1943_v28 = vadd.f32 %v8045_v29, %v6900_v13 }
 0xbb9   :  { %5480 = vpow2.f32 %v4856_v27 }
 0xbba   :  { %5482 = vtanh.f32 %v2433_v39 }
 0xbc1   :  { %v5477_v7 = vpop.eup %5476 }
 0xbc2   :  { %v5479_v34 = vpop.eup %5478  ;;  %v2438_v11 = vadd.f32 1.0, %v5477_v7 }
 0xbc3   :  { %v2444_v24 = vadd.f32 1.0, %v5479_v34  ;;  %v5481_v45 = vpop.eup %5480 }
 0xbc4   :  { %5484 = vrcp.f32 %v2438_v11  ;;  %v5483_v41 = vpop.eup %5482  ;;  %v2451_v26 = vadd.f32 1.0, %v5481_v45 }
 0xbc5   :  { %5486 = vrcp.f32 %v2444_v24 }
 0xbc6   :  { %5488 = vrcp.f32 %v2451_v26 }
 0xbce   :  { %v5485_v22 = vpop.eup %5484 }
 0xbcf   :  { %v5487_v30 = vpop.eup %5486  ;;  %v2455_v17 = vmul.f32 %v5485_v22, %v5483_v41 }
 0xbd0   :  { %v2454_v33 = vmul.f32 %v5487_v30, %v6960_v57  ;;  %v5489_v12 = vpop.eup %5488  ;;  %v8042_v57 = vld [vmem:[#allocation24_spill] sm:$0xff] }
 0xbd1   :  { %v1868_v50 = vadd.f32 %v8042_v57, %v6887_v48 }
 0xbd2   :  { %v7010_v52 = vadd.f32 %v2455_v17, %v2454_v33 }
 0xbd4   :  { %5490 = vtanh.f32 %v7010_v52 }
 0xbde   :  { %v5491_v18 = vpop.eup %5490 }
 0xbdf   :  { %v7013_v15 = vmul.f32 %v5491_v18, %v5489_v12 }
 0xbe1   :  { %v2460_v39 = vpack.c.bf16 %v7013_v15, %v7013_v15 }
 0xbe3   :  { %2494 = vmatmul.mubr.bf16.vlgmr.msra.gmra.mrb[60].mxu0 %v2460_v39  ;;  %2535 = vmatmul.mubr.bf16.vlgmr.msra.gmra.mrb[92].mxu1 %v2460_v39 }
 0xbe4   :  { %2574 = vmatpush1.bf16.msra.mxu0 %v6688_v35  ;;  %2615 = vmatpush1.bf16.msra.mxu1 %v6690_v49 }
 0xbe5   :  { %2575 = vmatprep.subr.bf16.mxu0 %v6696_v31  ;;  %2616 = vmatprep.subr.bf16.mxu1 %v6698_v25 }
 0xbe6   :  { %2605 = vmatprep.mubr.bf16.mxu0 %v7994_v37  ;;  %2646 = vmatprep.mubr.bf16.mxu1 %v7994_v37 }
 0xbe8   :  { %2576 = vmatpush1.bf16.msra.mxu0 %v6700_v60  ;;  %2617 = vmatpush1.bf16.msra.mxu1 %v6702_v63 }
 0xbe9   :  { %2577 = vmatprep.subr.bf16.mxu0 %v6708_v21  ;;  %2618 = vmatprep.subr.bf16.mxu1 %v6710_v1 }
 0xbec   :  { %2578 = vmatpush1.bf16.msra.mxu0 %v6712_v2  ;;  %2619 = vmatpush1.bf16.msra.mxu1 %v6714_v5 }
 0xbed   :  { %2579 = vmatprep.subr.bf16.mxu0 %v6720_v6  ;;  %2620 = vmatprep.subr.bf16.mxu1 %v6722_v9 }
 0xbf0   :  { %2580 = vmatpush1.bf16.msra.mxu0 %v6724_v10  ;;  %2621 = vmatpush1.bf16.msra.mxu1 %v6726_v3 }
 0xbf1   :  { %2581 = vmatprep.subr.bf16.mxu0 %v6732_v42  ;;  %2622 = vmatprep.subr.bf16.mxu1 %v6734_v0 }
 0xbf4   :  { %2582 = vmatpush1.bf16.msra.mxu0 %v6736_v46  ;;  %2623 = vmatpush1.bf16.msra.mxu1 %v6738_v19 }
 0xbf5   :  { %2583 = vmatprep.subr.bf16.mxu0 %v6744_v36  ;;  %2624 = vmatprep.subr.bf16.mxu1 %v6746_v32 }
 0xbf8   :  { %2584 = vmatpush1.bf16.msra.mxu0 %v6748_v38  ;;  %2625 = vmatpush1.bf16.msra.mxu1 %v6750_v20 }
 0xbf9   :  { %2585 = vmatprep.subr.bf16.mxu0 %v6756_v43  ;;  %2626 = vmatprep.subr.bf16.mxu1 %v6758_v51 }
 0xbfc   :  { %2586 = vmatpush1.bf16.msra.mxu0 %v6760_v23  ;;  %2627 = vmatpush1.bf16.msra.mxu1 %v6762_v4 }
 0xbfd   :  { %2587 = vmatprep.subr.bf16.mxu0 %v6768_v62  ;;  %2628 = vmatprep.subr.bf16.mxu1 %v6770_v53 }
 0xc00   :  { %2588 = vmatpush1.bf16.msra.mxu0 %v6772_v61  ;;  %2629 = vmatpush1.bf16.msra.mxu1 %v6774_v44 }
 0xc01   :  { %2685 = vmatprep.subr.bf16.mxu0 %v6684_v56  ;;  %2726 = vmatprep.subr.bf16.mxu1 %v6686_v47 }
 0xcb6   :  { %v2495_v27 = vpop.f32.mrb[60].mxu0  ;;  %v2536_v7 = vpop.f32.mrb[92].mxu1 }
 0xcb7   :  { %v2543_v34 = vadd.f32 %v2495_v27, %v1868_v50  ;;  %v2545_v11 = vadd.f32 %v2536_v7, %v1941_v59  ;;  %v2497_v24 = vpop.f32.mrb[61].mxu0  ;;  %v2538_v45 = vpop.f32.mrb[93].mxu1 }
 0xcb8   :  { %v2544_v41 = vadd.f32 %v2497_v24, %v1870_v8  ;;  %v2546_v22 = vadd.f32 %v2538_v45, %v1943_v28  ;;  %v2499_v30 = vpop.f32.mrb[62].mxu0  ;;  %v2540_v17 = vpop.f32.mrb[94].mxu1 }
 0xcb9   :  { %v4857_v26 = vmul.f32 -1.442695, %v2543_v34  ;;  %v2500_v33 = vpop.f32.mrb[63].mxu0  ;;  %v2541_v12 = vpop.f32.mrb[95].mxu1 }
 0xcba   :  { %v4858_v18 = vmul.f32 -1.442695, %v2544_v41  ;;  %v4859_v39 = vmul.f32 -1.442695, %v2546_v22 }
 0xcbb   :  { %5492 = vpow2.f32 %v4857_v26 }
 0xcbc   :  { %5494 = vpow2.f32 %v4858_v18 }
 0xcbd   :  { %5496 = vpow2.f32 %v4859_v39  ;;  %v7117_v39 = vld [vmem:[#allocation8 + $0x100] ss:$16 sps:$4 sm:$0xff]  }
 0xcbe   :  { %5498 = vtanh.f32 %v2545_v11 }
 0xcc5   :  { %v5493_v57 = vpop.eup %5492 }
 0xcc6   :  { %v5495_v58 = vpop.eup %5494  ;;  %v2550_v40 = vadd.f32 1.0, %v5493_v57  ;;  %v7120_v57 = vld [vmem:[#allocation8 + $0x108] ss:$16 sps:$4 sm:$0xff]  }
 0xcc7   :  { %v2556_v50 = vadd.f32 1.0, %v5495_v58  ;;  %v5497_v59 = vpop.eup %5496  ;;  %v7123_v58 = vld [vmem:[#allocation8 + $0x124] ss:$16 sps:$4 sm:$0xff]  }
 0xcc8   :  { %5500 = vrcp.f32 %v2550_v40  ;;  %v5499_v8 = vpop.eup %5498  ;;  %v2563_v7 = vadd.f32 1.0, %v5497_v59  ;;  %v7126_v40 = vld [vmem:[#allocation8 + $0x12c] ss:$16 sps:$4 sm:$0xff]   ;;  %v7134_v59 = vld [vmem:[#allocation8 + $0x128] ss:$16 sps:$4 sm:$0xff]  }
 0xcc9   :  { %5502 = vrcp.f32 %v2556_v50  ;;  %v7131_v50 = vld [vmem:[#allocation8 + $0x120] ss:$16 sps:$4 sm:$0xff]  }
 0xcca   :  { %5504 = vrcp.f32 %v2563_v7  ;;  %v7149_v7 = vld [vmem:[#allocation8 + $0x164] ss:$16 sps:$4 sm:$0xff]  }
 0xcd2   :  { %v5501_v29 = vpop.eup %5500 }
 0xcd3   :  { %v5503_v28 = vpop.eup %5502  ;;  %v2567_v27 = vmul.f32 %v5501_v29, %v5499_v8  ;;  %v7137_v8 = vld [vmem:[#allocation8 + $0x144] ss:$16 sps:$4 sm:$0xff]   ;;  %v7140_v29 = vld [vmem:[#allocation8 + $0x14c] ss:$16 sps:$4 sm:$0xff]  }
 0xcd4   :  { %v2566_v34 = vmul.f32 %v5503_v28, %v7010_v52  ;;  %v5505_v45 = vpop.eup %5504  ;;  %v7143_v28 = vld [vmem:[#allocation8 + $0x140] ss:$16 sps:$4 sm:$0xff]  }
 0xcd6   :  { %v7060_v24 = vadd.f32 %v2567_v27, %v2566_v34  ;;  %v7146_v27 = vld [vmem:[#allocation8 + $0x148] ss:$16 sps:$4 sm:$0xff]   ;;  %v7152_v34 = vld [vmem:[#allocation8 + $0x16c] ss:$16 sps:$4 sm:$0xff]  }
 0xcd8   :  { %5506 = vtanh.f32 %v7060_v24 }
 0xce2   :  { %v5507_v41 = vpop.eup %5506 }
 0xce3   :  { %v7063_v22 = vmul.f32 %v5507_v41, %v5505_v45  ;;  %v7158_v45 = vld [vmem:[#allocation8 + $0x168] ss:$16 sps:$4 sm:$0xff]   ;;  %v7161_v41 = vld [vmem:[#allocation8 + $0x184] ss:$16 sps:$4 sm:$0xff]  }
 0xce5   :  { %v2572_v11 = vpack.c.bf16 %v7063_v22, %v7063_v22 }
 0xce7   :  { %2606 = vmatmul.mubr.bf16.vlgmr.msra.gmra.mrb[64].mxu0 %v2572_v11  ;;  %2647 = vmatmul.mubr.bf16.vlgmr.msra.gmra.mrb[96].mxu1 %v2572_v11  ;;  %v7164_v11 = vld [vmem:[#allocation8 + $0x18c] ss:$16 sps:$4 sm:$0xff]  }
 0xce8   :  { %2686 = vmatpush1.bf16.msra.mxu0 %v6688_v35  ;;  %2727 = vmatpush1.bf16.msra.mxu1 %v6690_v49  ;;  %v8046_v35 = vld [vmem:[#allocation26_spill] sm:$0xff] }
 0xce9   :  { %2687 = vmatprep.subr.bf16.mxu0 %v6696_v31  ;;  %2728 = vmatprep.subr.bf16.mxu1 %v6698_v25  ;;  %v1874_v49 = vadd.f32 %v8046_v35, %v6887_v48  ;;  %v8047_v31 = vld [vmem:[#allocation37_spill] sm:$0xff] }
 0xcea   :  { %2717 = vmatprep.mubr.bf16.mxu0 %v7994_v37  ;;  %2758 = vmatprep.mubr.bf16.mxu1 %v7994_v37  ;;  %v1947_v25 = vadd.f32 %v8047_v31, %v6890_v54  ;;  %v7167_v35 = vld [vmem:[#allocation8 + $0x180] ss:$16 sps:$4 sm:$0xff]   ;;  %v7173_v31 = vld [vmem:[#allocation8 + $0x1a4] ss:$16 sps:$4 sm:$0xff]  }
 0xcec   :  { %2688 = vmatpush1.bf16.msra.mxu0 %v6700_v60  ;;  %2729 = vmatpush1.bf16.msra.mxu1 %v6702_v63  ;;  %v8048_v60 = vld [vmem:[#allocation27_spill] sm:$0xff] }
 0xced   :  { %2689 = vmatprep.subr.bf16.mxu0 %v6708_v21  ;;  %2730 = vmatprep.subr.bf16.mxu1 %v6710_v1  ;;  %v1876_v63 = vadd.f32 %v8048_v60, %v6897_v55  ;;  %v8049_v21 = vld [vmem:[#allocation38_spill] sm:$0xff]  ;;  %v7179_v60 = vld [vmem:[#allocation8 + $0x1a0] ss:$16 sps:$4 sm:$0xff]  }
 0xcee   :  { %v1949_v1 = vadd.f32 %v8049_v21, %v6900_v13  ;;  %v7185_v21 = vld [vmem:[#allocation8 + $0x1c4] ss:$16 sps:$4 sm:$0xff]  }
 0xcf0   :  { %2690 = vmatpush1.bf16.msra.mxu0 %v6712_v2  ;;  %2731 = vmatpush1.bf16.msra.mxu1 %v6714_v5 }
 0xcf1   :  { %2691 = vmatprep.subr.bf16.mxu0 %v6720_v6  ;;  %2732 = vmatprep.subr.bf16.mxu1 %v6722_v9 }
 0xcf4   :  { %2692 = vmatpush1.bf16.msra.mxu0 %v6724_v10  ;;  %2733 = vmatpush1.bf16.msra.mxu1 %v6726_v3 }
 0xcf5   :  { %2693 = vmatprep.subr.bf16.mxu0 %v6732_v42  ;;  %2734 = vmatprep.subr.bf16.mxu1 %v6734_v0 }
 0xcf8   :  { %2694 = vmatpush1.bf16.msra.mxu0 %v6736_v46  ;;  %2735 = vmatpush1.bf16.msra.mxu1 %v6738_v19 }
 0xcf9   :  { %2695 = vmatprep.subr.bf16.mxu0 %v6744_v36  ;;  %2736 = vmatprep.subr.bf16.mxu1 %v6746_v32 }
 0xcfc   :  { %2696 = vmatpush1.bf16.msra.mxu0 %v6748_v38  ;;  %2737 = vmatpush1.bf16.msra.mxu1 %v6750_v20 }
 0xcfd   :  { %2697 = vmatprep.subr.bf16.mxu0 %v6756_v43  ;;  %2738 = vmatprep.subr.bf16.mxu1 %v6758_v51 }
 0xd00   :  { %2698 = vmatpush1.bf16.msra.mxu0 %v6760_v23  ;;  %2739 = vmatpush1.bf16.msra.mxu1 %v6762_v4 }
 0xd01   :  { %2699 = vmatprep.subr.bf16.mxu0 %v6768_v62  ;;  %2740 = vmatprep.subr.bf16.mxu1 %v6770_v53 }
 0xd04   :  { %2700 = vmatpush1.bf16.msra.mxu0 %v6772_v61  ;;  %2741 = vmatpush1.bf16.msra.mxu1 %v6774_v44 }
 0xd05   :  { %2797 = vmatprep.subr.bf16.mxu0 %v6684_v56  ;;  %2838 = vmatprep.subr.bf16.mxu1 %v6686_v47 }
 0xdba   :  { %v2607_v2 = vpop.f32.mrb[64].mxu0  ;;  %v2648_v5 = vpop.f32.mrb[96].mxu1 }
 0xdbb   :  { %v2655_v6 = vadd.f32 %v2607_v2, %v1874_v49  ;;  %v2657_v9 = vadd.f32 %v2648_v5, %v1947_v25  ;;  %v2609_v10 = vpop.f32.mrb[65].mxu0  ;;  %v2650_v56 = vpop.f32.mrb[97].mxu1  ;;  %v7170_v49 = vld [vmem:[#allocation8 + $0x188] ss:$16 sps:$4 sm:$0xff]   ;;  %v7176_v25 = vld [vmem:[#allocation8 + $0x1ac] ss:$16 sps:$4 sm:$0xff]  }
 0xdbc   :  { %v2656_v3 = vadd.f32 %v2609_v10, %v1876_v63  ;;  %v2658_v47 = vadd.f32 %v2650_v56, %v1949_v1  ;;  %v2611_v42 = vpop.f32.mrb[66].mxu0  ;;  %v2652_v0 = vpop.f32.mrb[98].mxu1  ;;  %v7182_v63 = vld [vmem:[#allocation8 + $0x1a8] ss:$16 sps:$4 sm:$0xff]   ;;  %v7188_v1 = vld [vmem:[#allocation8 + $0x1cc] ss:$16 sps:$4 sm:$0xff]  }
 0xdbd   :  { %v4860_v46 = vmul.f32 -1.442695, %v2655_v6  ;;  %v2612_v19 = vpop.f32.mrb[67].mxu0  ;;  %v2653_v36 = vpop.f32.mrb[99].mxu1  ;;  %v7191_v2 = vld [vmem:[#allocation8 + $0x1c0] ss:$16 sps:$4 sm:$0xff]  }
 0xdbe   :  { %v4861_v32 = vmul.f32 -1.442695, %v2656_v3  ;;  %v4862_v38 = vmul.f32 -1.442695, %v2658_v47  ;;  %v7194_v5 = vld [vmem:[#allocation8 + $0x1c8] ss:$16 sps:$4 sm:$0xff]  }
 0xdbf   :  { %5508 = vpow2.f32 %v4860_v46  ;;  %v7197_v6 = vld [vmem:[#allocation8 + $0x1e4] ss:$16 sps:$4 sm:$0xff]   ;;  %v7203_v10 = vld [vmem:[#allocation8 + $0x1e0] ss:$16 sps:$4 sm:$0xff]   ;;  %v7206_v56 = vld [vmem:[#allocation8 + $0x1e8] ss:$16 sps:$4 sm:$0xff]  }
 0xdc0   :  { %5510 = vpow2.f32 %v4861_v32  ;;  %v5762_v3 = vld [vmem:[#allocation8 + $0x104] ss:$16 sps:$4 sm:$0xff]   ;;  %v5763_v47 = vld [vmem:[#allocation8 + $0x10c] ss:$16 sps:$4 sm:$0xff]  }
 0xdc1   :  { %5512 = vpow2.f32 %v4862_v38  ;;  %v8050_v42 = vld [vmem:[#allocation28_spill] sm:$0xff]  ;;  %v8051_v46 = vld [vmem:[#allocation39_spill] sm:$0xff]  ;;  %v8052_v36 = vld [vmem:[#allocation29_spill] sm:$0xff] }
 0xdc2   :  { %5514 = vtanh.f32 %v2657_v9  ;;  %v7200_v9 = vld [vmem:[#allocation8 + $0x1ec] ss:$16 sps:$4 sm:$0xff]   ;;  %v1878_v0 = vadd.f32 %v8050_v42, %v6887_v48  ;;  %v1951_v19 = vadd.f32 %v8051_v46, %v6890_v54  ;;  %v1880_v32 = vadd.f32 %v8052_v36, %v6897_v55  ;;  %v8053_v38 = vld [vmem:[#allocation40_spill] sm:$0xff] }
 0xdc9   :  { %v5509_v20 = vpop.eup %5508 }
 0xdca   :  { %v5511_v43 = vpop.eup %5510  ;;  %v2662_v51 = vadd.f32 1.0, %v5509_v20  ;;  %v1953_v20 = vadd.f32 %v8053_v38, %v6900_v13 }
 0xdcb   :  { %v2668_v23 = vadd.f32 1.0, %v5511_v43  ;;  %v5513_v4 = vpop.eup %5512 }
 0xdcc   :  { %5516 = vrcp.f32 %v2662_v51  ;;  %v5515_v62 = vpop.eup %5514  ;;  %v2675_v52 = vadd.f32 1.0, %v5513_v4 }
 0xdcd   :  { %5518 = vrcp.f32 %v2668_v23 }
 0xdce   :  { %5520 = vrcp.f32 %v2675_v52 }
 0xdd6   :  { %v5517_v53 = vpop.eup %5516 }
 0xdd7   :  { %v5519_v61 = vpop.eup %5518  ;;  %v2679_v44 = vmul.f32 %v5517_v53, %v5515_v62 }
 0xdd8   :  { %v2678_v30 = vmul.f32 %v5519_v61, %v7060_v24  ;;  %v5521_v26 = vpop.eup %5520  ;;  %v7155_v24 = vld [vmem:[#allocation8 + $0x160] ss:$16 sps:$4 sm:$0xff]  }
 0xdda   :  { %v7110_v17 = vadd.f32 %v2679_v44, %v2678_v30 }
 0xddc   :  { %5522 = vtanh.f32 %v7110_v17 }
 0xde6   :  { %v5523_v33 = vpop.eup %5522 }
 0xde7   :  { %v7113_v12 = vmul.f32 %v5523_v33, %v5521_v26 }
 0xde9   :  { %v2684_v18 = vpack.c.bf16 %v7113_v12, %v7113_v12 }
 0xdeb   :  { %2718 = vmatmul.mubr.bf16.vlgmr.msra.gmra.mrb[68].mxu0 %v2684_v18  ;;  %2759 = vmatmul.mubr.bf16.vlgmr.msra.gmra.mrb[100].mxu1 %v2684_v18 }
 0xdec   :  { %2798 = vmatpush1.bf16.msra.mxu0 %v7117_v39  ;;  %2839 = vmatpush1.bf16.msra.mxu1 %v7120_v57 }
 0xded   :  { %2799 = vmatprep.subr.bf16.mxu0 %v7123_v58  ;;  %2840 = vmatprep.subr.bf16.mxu1 %v7126_v40 }
 0xdee   :  { %2829 = vmatprep.mubr.bf16.mxu0 %v7994_v37  ;;  %2870 = vmatprep.mubr.bf16.mxu1 %v7994_v37 }
 0xdf0   :  { %2800 = vmatpush1.bf16.msra.mxu0 %v7131_v50  ;;  %2841 = vmatpush1.bf16.msra.mxu1 %v7134_v59 }
 0xdf1   :  { %2801 = vmatprep.subr.bf16.mxu0 %v7137_v8  ;;  %2842 = vmatprep.subr.bf16.mxu1 %v7140_v29 }
 0xdf4   :  { %2802 = vmatpush1.bf16.msra.mxu0 %v7143_v28  ;;  %2843 = vmatpush1.bf16.msra.mxu1 %v7146_v27 }
 0xdf5   :  { %2803 = vmatprep.subr.bf16.mxu0 %v7149_v7  ;;  %2844 = vmatprep.subr.bf16.mxu1 %v7152_v34 }
 0xdf8   :  { %2804 = vmatpush1.bf16.msra.mxu0 %v7155_v24  ;;  %2845 = vmatpush1.bf16.msra.mxu1 %v7158_v45 }
 0xdf9   :  { %2805 = vmatprep.subr.bf16.mxu0 %v7161_v41  ;;  %2846 = vmatprep.subr.bf16.mxu1 %v7164_v11 }
 0xdfc   :  { %2806 = vmatpush1.bf16.msra.mxu0 %v7167_v35  ;;  %2847 = vmatpush1.bf16.msra.mxu1 %v7170_v49 }
 0xdfd   :  { %2807 = vmatprep.subr.bf16.mxu0 %v7173_v31  ;;  %2848 = vmatprep.subr.bf16.mxu1 %v7176_v25 }
 0xe00   :  { %2808 = vmatpush1.bf16.msra.mxu0 %v7179_v60  ;;  %2849 = vmatpush1.bf16.msra.mxu1 %v7182_v63 }
 0xe01   :  { %2809 = vmatprep.subr.bf16.mxu0 %v7185_v21  ;;  %2850 = vmatprep.subr.bf16.mxu1 %v7188_v1 }
 0xe04   :  { %2810 = vmatpush1.bf16.msra.mxu0 %v7191_v2  ;;  %2851 = vmatpush1.bf16.msra.mxu1 %v7194_v5 }
 0xe05   :  { %2811 = vmatprep.subr.bf16.mxu0 %v7197_v6  ;;  %2852 = vmatprep.subr.bf16.mxu1 %v7200_v9 }
 0xe08   :  { %2812 = vmatpush1.bf16.msra.mxu0 %v7203_v10  ;;  %2853 = vmatpush1.bf16.msra.mxu1 %v7206_v56 }
 0xe09   :  { %2909 = vmatprep.subr.bf16.mxu0 %v5762_v3  ;;  %2950 = vmatprep.subr.bf16.mxu1 %v5763_v47 }
 0xebe   :  { %v2719_v43 = vpop.f32.mrb[68].mxu0  ;;  %v2760_v51 = vpop.f32.mrb[100].mxu1 }
 0xebf   :  { %v2767_v23 = vadd.f32 %v2719_v43, %v1878_v0  ;;  %v2769_v4 = vadd.f32 %v2760_v51, %v1951_v19  ;;  %v2721_v62 = vpop.f32.mrb[69].mxu0  ;;  %v2762_v53 = vpop.f32.mrb[101].mxu1 }
 0xec0   :  { %v2768_v61 = vadd.f32 %v2721_v62, %v1880_v32  ;;  %v2770_v44 = vadd.f32 %v2762_v53, %v1953_v20  ;;  %v2723_v52 = vpop.f32.mrb[70].mxu0  ;;  %v2764_v30 = vpop.f32.mrb[102].mxu1 }
 0xec1   :  { %v4863_v26 = vmul.f32 -1.442695, %v2767_v23  ;;  %v2724_v33 = vpop.f32.mrb[71].mxu0  ;;  %v2765_v18 = vpop.f32.mrb[103].mxu1 }
 0xec2   :  { %v4864_v3 = vmul.f32 -1.442695, %v2768_v61  ;;  %v4865_v47 = vmul.f32 -1.442695, %v2770_v44 }
 0xec3   :  { %5524 = vpow2.f32 %v4863_v26 }
 0xec4   :  { %5526 = vpow2.f32 %v4864_v3 }
 0xec5   :  { %5528 = vpow2.f32 %v4865_v47 }
 0xec6   :  { %5530 = vtanh.f32 %v2769_v4 }
 0xecd   :  { %v5525_v42 = vpop.eup %5524 }
 0xece   :  { %v5527_v46 = vpop.eup %5526  ;;  %v2774_v36 = vadd.f32 1.0, %v5525_v42 }
 0xecf   :  { %v2780_v0 = vadd.f32 1.0, %v5527_v46  ;;  %v5529_v19 = vpop.eup %5528 }
 0xed0   :  { %5532 = vrcp.f32 %v2774_v36  ;;  %v5531_v32 = vpop.eup %5530  ;;  %v2787_v51 = vadd.f32 1.0, %v5529_v19  ;;  %v5212_v36 = vld [vmem:[#allocation6 + $0x200] ss:$16 sps:$4 sm:$0xff]  }
 0xed1   :  { %5534 = vrcp.f32 %v2780_v0  ;;  %v5215_v0 = vld [vmem:[#allocation6 + $0x208] ss:$16 sps:$4 sm:$0xff]  }
 0xed2   :  { %5536 = vrcp.f32 %v2787_v51  ;;  %v5226_v51 = vld [vmem:[#allocation6 + $0x244] ss:$16 sps:$4 sm:$0xff]  }
 0xeda   :  { %v5533_v38 = vpop.eup %5532 }
 0xedb   :  { %v5535_v20 = vpop.eup %5534  ;;  %v2791_v43 = vmul.f32 %v5533_v38, %v5531_v32  ;;  %v5220_v32 = vld [vmem:[#allocation6 + $0x224] ss:$16 sps:$4 sm:$0xff]   ;;  %v5223_v38 = vld [vmem:[#allocation6 + $0x22c] ss:$16 sps:$4 sm:$0xff]  }
 0xedc   :  { %v2790_v23 = vmul.f32 %v5535_v20, %v7110_v17  ;;  %v5537_v53 = vpop.eup %5536  ;;  %v5214_v17 = vld [vmem:[#allocation6 + $0x204] ss:$16 sps:$4 sm:$0xff]   ;;  %v5218_v20 = vld [vmem:[#allocation6 + $0x220] ss:$16 sps:$4 sm:$0xff]  }
 0xede   :  { %v7218_v62 = vadd.f32 %v2791_v43, %v2790_v23  ;;  %v5221_v43 = vld [vmem:[#allocation6 + $0x228] ss:$16 sps:$4 sm:$0xff]   ;;  %v5229_v23 = vld [vmem:[#allocation6 + $0x24c] ss:$16 sps:$4 sm:$0xff]  }
 0xee0   :  { %5538 = vtanh.f32 %v7218_v62 }
 0xeea   :  { %v5539_v61 = vpop.eup %5538 }
 0xeeb   :  { %v7221_v44 = vmul.f32 %v5539_v61, %v5537_v53  ;;  %v5227_v53 = vld [vmem:[#allocation6 + $0x248] ss:$16 sps:$4 sm:$0xff]   ;;  %v5232_v61 = vld [vmem:[#allocation6 + $0x264] ss:$16 sps:$4 sm:$0xff]  }
 0xeed   :  { %v2796_v4 = vpack.c.bf16 %v7221_v44, %v7221_v44 }
 0xeef   :  { %2830 = vmatmul.mubr.bf16.vlgmr.msra.gmra.mrb[72].mxu0 %v2796_v4  ;;  %2871 = vmatmul.mubr.bf16.vlgmr.msra.gmra.mrb[104].mxu1 %v2796_v4  ;;  %v5235_v4 = vld [vmem:[#allocation6 + $0x26c] ss:$16 sps:$4 sm:$0xff]  }
 0xef0   :  { %2910 = vmatpush1.bf16.msra.mxu0 %v7117_v39  ;;  %2951 = vmatpush1.bf16.msra.mxu1 %v7120_v57  ;;  %v5217_v39 = vld [vmem:[#allocation6 + $0x20c] ss:$16 sps:$4 sm:$0xff]   ;;  %v8054_v57 = vld [vmem:[#allocation30_spill] sm:$0xff] }
 0xef1   :  { %2911 = vmatprep.subr.bf16.mxu0 %v7123_v58  ;;  %2952 = vmatprep.subr.bf16.mxu1 %v7126_v40  ;;  %v1884_v58 = vadd.f32 %v8054_v57, %v6887_v48  ;;  %v8055_v40 = vld [vmem:[#allocation41_spill] sm:$0xff]  ;;  %v5238_v57 = vld [vmem:[#allocation6 + $0x284] ss:$16 sps:$4 sm:$0xff]  }
 0xef2   :  { %2941 = vmatprep.mubr.bf16.mxu0 %v7994_v37  ;;  %2982 = vmatprep.mubr.bf16.mxu1 %v7994_v37 }
 0xef4   :  { %2912 = vmatpush1.bf16.msra.mxu0 %v7131_v50  ;;  %2953 = vmatpush1.bf16.msra.mxu1 %v7134_v59  ;;  %v1957_v50 = vadd.f32 %v8055_v40, %v6890_v54  ;;  %v8056_v59 = vld [vmem:[#allocation42_spill] sm:$0xff]  ;;  %v5236_v40 = vld [vmem:[#allocation6 + $0x280] ss:$16 sps:$4 sm:$0xff]  }
 0xef5   :  { %2913 = vmatprep.subr.bf16.mxu0 %v7137_v8  ;;  %2954 = vmatprep.subr.bf16.mxu1 %v7140_v29  ;;  %v1886_v8 = vadd.f32 %v8056_v59, %v6897_v55  ;;  %v8057_v29 = vld [vmem:[#allocation43_spill] sm:$0xff]  ;;  %v5244_v59 = vld [vmem:[#allocation6 + $0x2a4] ss:$16 sps:$4 sm:$0xff]  }
 0xef8   :  { %2914 = vmatpush1.bf16.msra.mxu0 %v7143_v28  ;;  %2955 = vmatpush1.bf16.msra.mxu1 %v7146_v27  ;;  %v1959_v28 = vadd.f32 %v8057_v29, %v6900_v13  ;;  %v5242_v29 = vld [vmem:[#allocation6 + $0x2a0] ss:$16 sps:$4 sm:$0xff]  }
 0xef9   :  { %2915 = vmatprep.subr.bf16.mxu0 %v7149_v7  ;;  %2956 = vmatprep.subr.bf16.mxu1 %v7152_v34 }
 0xefc   :  { %2916 = vmatpush1.bf16.msra.mxu0 %v7155_v24  ;;  %2957 = vmatpush1.bf16.msra.mxu1 %v7158_v45 }
 0xefd   :  { %2917 = vmatprep.subr.bf16.mxu0 %v7161_v41  ;;  %2958 = vmatprep.subr.bf16.mxu1 %v7164_v11 }
 0xf00   :  { %2918 = vmatpush1.bf16.msra.mxu0 %v7167_v35  ;;  %2959 = vmatpush1.bf16.msra.mxu1 %v7170_v49 }
 0xf01   :  { %2919 = vmatprep.subr.bf16.mxu0 %v7173_v31  ;;  %2960 = vmatprep.subr.bf16.mxu1 %v7176_v25 }
 0xf04   :  { %2920 = vmatpush1.bf16.msra.mxu0 %v7179_v60  ;;  %2961 = vmatpush1.bf16.msra.mxu1 %v7182_v63 }
 0xf05   :  { %2921 = vmatprep.subr.bf16.mxu0 %v7185_v21  ;;  %2962 = vmatprep.subr.bf16.mxu1 %v7188_v1 }
 0xf08   :  { %2922 = vmatpush1.bf16.msra.mxu0 %v7191_v2  ;;  %2963 = vmatpush1.bf16.msra.mxu1 %v7194_v5 }
 0xf09   :  { %2923 = vmatprep.subr.bf16.mxu0 %v7197_v6  ;;  %2964 = vmatprep.subr.bf16.mxu1 %v7200_v9 }
 0xf0c   :  { %2924 = vmatpush1.bf16.msra.mxu0 %v7203_v10  ;;  %2965 = vmatpush1.bf16.msra.mxu1 %v7206_v56 }
 0xf0d   :  { %3285 = vmatprep.subr.bf16.mxu0 %v5214_v17  ;;  %3358 = vmatprep.subr.bf16.mxu1 %v5217_v39  ;;  %v5230_v17 = vld [vmem:[#allocation6 + $0x260] ss:$16 sps:$4 sm:$0xff]   ;;  %v5233_v39 = vld [vmem:[#allocation6 + $0x268] ss:$16 sps:$4 sm:$0xff]  }
 0xfc2   :  { %v2831_v27 = vpop.f32.mrb[72].mxu0  ;;  %v2872_v7 = vpop.f32.mrb[104].mxu1 }
 0xfc3   :  { %v2879_v34 = vadd.f32 %v2831_v27, %v1884_v58  ;;  %v2881_v24 = vadd.f32 %v2872_v7, %v1957_v50  ;;  %v2833_v45 = vpop.f32.mrb[73].mxu0  ;;  %v2874_v41 = vpop.f32.mrb[105].mxu1  ;;  %v5241_v58 = vld [vmem:[#allocation6 + $0x28c] ss:$16 sps:$4 sm:$0xff]   ;;  %v5239_v50 = vld [vmem:[#allocation6 + $0x288] ss:$16 sps:$4 sm:$0xff]  }
 0xfc4   :  { %v2880_v11 = vadd.f32 %v2833_v45, %v1886_v8  ;;  %v2882_v35 = vadd.f32 %v2874_v41, %v1959_v28  ;;  %v2835_v49 = vpop.f32.mrb[74].mxu0  ;;  %v2876_v31 = vpop.f32.mrb[106].mxu1  ;;  %v5247_v8 = vld [vmem:[#allocation6 + $0x2ac] ss:$16 sps:$4 sm:$0xff]   ;;  %v5245_v28 = vld [vmem:[#allocation6 + $0x2a8] ss:$16 sps:$4 sm:$0xff]  }
 0xfc5   :  { %v4866_v25 = vmul.f32 -1.442695, %v2879_v34  ;;  %v2836_v60 = vpop.f32.mrb[75].mxu0  ;;  %v2877_v63 = vpop.f32.mrb[107].mxu1  ;;  %v5250_v27 = vld [vmem:[#allocation6 + $0x2c4] ss:$16 sps:$4 sm:$0xff]   ;;  %v3100_v49 = vpack.c.bf16 %v6963_v14, %v6913_v16  ;;  %v3101_v31 = vpack.c.bf16 %v7063_v22, %v7013_v15 }
 0xfc6   :  { %v4867_v21 = vmul.f32 -1.442695, %v2880_v11  ;;  %v4868_v1 = vmul.f32 -1.442695, %v2882_v35  ;;  %v5253_v7 = vld [vmem:[#allocation6 + $0x2cc] ss:$16 sps:$4 sm:$0xff]  }
 0xfc7   :  { %5540 = vpow2.f32 %v4866_v25  ;;  %v5248_v34 = vld [vmem:[#allocation6 + $0x2c0] ss:$16 sps:$4 sm:$0xff]   ;;  %v5256_v45 = vld [vmem:[#allocation6 + $0x2e4] ss:$16 sps:$4 sm:$0xff]   ;;  %v5259_v41 = vld [vmem:[#allocation6 + $0x2ec] ss:$16 sps:$4 sm:$0xff]   ;;  %v3102_v25 = vpack.c.bf16 %v7221_v44, %v7113_v12 }
 0xfc8   :  { %5542 = vpow2.f32 %v4867_v21  ;;  %v5254_v11 = vld [vmem:[#allocation6 + $0x2e0] ss:$16 sps:$4 sm:$0xff]   ;;  %v5257_v35 = vld [vmem:[#allocation6 + $0x2e8] ss:$16 sps:$4 sm:$0xff]   ;;  %v7287_v16 = vld [vmem:[#allocation8 + $0x204] ss:$16 sps:$4 sm:$0xff]  }
 0xfc9   :  { %5544 = vpow2.f32 %v4868_v1  ;;  %v7289_v14 = vld [vmem:[#allocation8 + $0x20c] ss:$16 sps:$4 sm:$0xff]   ;;  %v7291_v15 = vld [vmem:[#allocation8 + $0x200] ss:$16 sps:$4 sm:$0xff]   ;;  %v7293_v22 = vld [vmem:[#allocation8 + $0x208] ss:$16 sps:$4 sm:$0xff]  }
 0xfca   :  { %5546 = vtanh.f32 %v2881_v24  ;;  %v5251_v24 = vld [vmem:[#allocation6 + $0x2c8] ss:$16 sps:$4 sm:$0xff]   ;;  %v7299_v12 = vld [vmem:[#allocation8 + $0x224] ss:$16 sps:$4 sm:$0xff]   ;;  %v7301_v44 = vld [vmem:[#allocation8 + $0x22c] ss:$16 sps:$4 sm:$0xff]  }
 0xfcb   :  { %v7303_v60 = vld [vmem:[#allocation8 + $0x220] ss:$16 sps:$4 sm:$0xff]   ;;  %v7305_v63 = vld [vmem:[#allocation8 + $0x228] ss:$16 sps:$4 sm:$0xff]   ;;  %v7311_v21 = vld [vmem:[#allocation8 + $0x244] ss:$16 sps:$4 sm:$0xff]  }
 0xfcc   :  { %v7313_v1 = vld [vmem:[#allocation8 + $0x24c] ss:$16 sps:$4 sm:$0xff]  }
 0xfd1   :  { %v5541_v2 = vpop.eup %5540 }
 0xfd2   :  { %v5543_v5 = vpop.eup %5542  ;;  %v2886_v6 = vadd.f32 1.0, %v5541_v2  ;;  %v7315_v2 = vld [vmem:[#allocation8 + $0x240] ss:$16 sps:$4 sm:$0xff]  }
 0xfd3   :  { %v2892_v9 = vadd.f32 1.0, %v5543_v5  ;;  %v5545_v10 = vpop.eup %5544  ;;  %v7317_v5 = vld [vmem:[#allocation8 + $0x248] ss:$16 sps:$4 sm:$0xff]  }
 0xfd4   :  { %5548 = vrcp.f32 %v2886_v6  ;;  %v5547_v56 = vpop.eup %5546  ;;  %v2899_v33 = vadd.f32 1.0, %v5545_v10  ;;  %v7323_v6 = vld [vmem:[#allocation8 + $0x264] ss:$16 sps:$4 sm:$0xff]   ;;  %v7327_v10 = vld [vmem:[#allocation8 + $0x260] ss:$16 sps:$4 sm:$0xff]  }
 0xfd5   :  { %5550 = vrcp.f32 %v2892_v9  ;;  %v7325_v9 = vld [vmem:[#allocation8 + $0x26c] ss:$16 sps:$4 sm:$0xff]  }
 0xfd6   :  { %5552 = vrcp.f32 %v2899_v33  ;;  %v7341_v33 = vld [vmem:[#allocation8 + $0x288] ss:$16 sps:$4 sm:$0xff]  }
 0xfde   :  { %v5549_v52 = vpop.eup %5548 }
 0xfdf   :  { %v5551_v30 = vpop.eup %5550  ;;  %v2903_v26 = vmul.f32 %v5549_v52, %v5547_v56  ;;  %v7329_v56 = vld [vmem:[#allocation8 + $0x268] ss:$16 sps:$4 sm:$0xff]   ;;  %v7335_v52 = vld [vmem:[#allocation8 + $0x284] ss:$16 sps:$4 sm:$0xff]  }
 0xfe0   :  { %v2902_v18 = vmul.f32 %v5551_v30, %v7218_v62  ;;  %v5553_v47 = vpop.eup %5552  ;;  %v5224_v62 = vld [vmem:[#allocation6 + $0x240] ss:$16 sps:$4 sm:$0xff]   ;;  %v7337_v30 = vld [vmem:[#allocation8 + $0x28c] ss:$16 sps:$4 sm:$0xff]  }
 0xfe2   :  { %v7266_v3 = vadd.f32 %v2903_v26, %v2902_v18  ;;  %v7339_v26 = vld [vmem:[#allocation8 + $0x280] ss:$16 sps:$4 sm:$0xff]   ;;  %v7347_v18 = vld [vmem:[#allocation8 + $0x2a4] ss:$16 sps:$4 sm:$0xff]  }
 0xfe4   :  { %5554 = vtanh.f32 %v7266_v3 }
 0xfee   :  { %v5555_v42 = vpop.eup %5554 }
 0xfef   :  { %v7269_v46 = vmul.f32 %v5555_v42, %v5553_v47  ;;  %v7349_v47 = vld [vmem:[#allocation8 + $0x2ac] ss:$16 sps:$4 sm:$0xff]   ;;  %v7351_v42 = vld [vmem:[#allocation8 + $0x2a0] ss:$16 sps:$4 sm:$0xff]  }
 0xff1   :  { %v2908_v19 = vpack.c.bf16 %v7269_v46, %v7269_v46 }
 0xff3   :  { %2942 = vmatmul.mubr.bf16.vlgmr.msra.gmra.mrb[76].mxu0 %v2908_v19  ;;  %2983 = vmatmul.mubr.bf16.vlgmr.msra.gmra.mrb[108].mxu1 %v2908_v19  ;;  %v7361_v19 = vld [vmem:[#allocation8 + $0x2cc] ss:$16 sps:$4 sm:$0xff]  }
 0xff4   :  { %3286 = vmatpush1.bf16.msra.mxu0 %v5212_v36  ;;  %3359 = vmatpush1.bf16.msra.mxu1 %v5215_v0  ;;  %v7353_v36 = vld [vmem:[#allocation8 + $0x2a8] ss:$16 sps:$4 sm:$0xff]   ;;  %v7359_v0 = vld [vmem:[#allocation8 + $0x2c4] ss:$16 sps:$4 sm:$0xff]  }
 0xff5   :  { %3287 = vmatprep.subr.bf16.mxu0 %v5220_v32  ;;  %3360 = vmatprep.subr.bf16.mxu1 %v5223_v38  ;;  %v7363_v32 = vld [vmem:[#allocation8 + $0x2c0] ss:$16 sps:$4 sm:$0xff]   ;;  %v7365_v38 = vld [vmem:[#allocation8 + $0x2c8] ss:$16 sps:$4 sm:$0xff]  }
 0xff6   :  { %3317 = vmatprep.mubr.bf16.mxu0 %v7994_v37  ;;  %3390 = vmatprep.mubr.bf16.mxu1 %v7994_v37 }
 0xff8   :  { %3288 = vmatpush1.bf16.msra.mxu0 %v5218_v20  ;;  %3361 = vmatpush1.bf16.msra.mxu1 %v5221_v43  ;;  %v7371_v20 = vld [vmem:[#allocation8 + $0x2e4] ss:$16 sps:$4 sm:$0xff]   ;;  %v7373_v43 = vld [vmem:[#allocation8 + $0x2ec] ss:$16 sps:$4 sm:$0xff]  }
 0xff9   :  { %3289 = vmatprep.subr.bf16.mxu0 %v5226_v51  ;;  %3362 = vmatprep.subr.bf16.mxu1 %v5229_v23  ;;  %v7375_v51 = vld [vmem:[#allocation8 + $0x2e0] ss:$16 sps:$4 sm:$0xff]   ;;  %v7377_v23 = vld [vmem:[#allocation8 + $0x2e8] ss:$16 sps:$4 sm:$0xff]  }
 0xffc   :  { %3290 = vmatpush1.bf16.msra.mxu0 %v5224_v62  ;;  %3363 = vmatpush1.bf16.msra.mxu1 %v5227_v53  ;;  %v8058_v62 = vld [vmem:[#allocation44_spill] sm:$0xff] }
 0xffd   :  { %3291 = vmatprep.subr.bf16.mxu0 %v5232_v61  ;;  %3364 = vmatprep.subr.bf16.mxu1 %v5235_v4  ;;  %v1888_v53 = vadd.f32 %v8058_v62, %v6887_v48  ;;  %v8059_v61 = vld [vmem:[#allocation45_spill] sm:$0xff] }
 0xffe   :  { %v1961_v4 = vadd.f32 %v8059_v61, %v6890_v54 }
0x1000   :  { %3292 = vmatpush1.bf16.msra.mxu0 %v5230_v17  ;;  %3365 = vmatpush1.bf16.msra.mxu1 %v5233_v39  ;;  %v8060_v17 = vld [vmem:[#allocation46_spill] sm:$0xff] }
0x1001   :  { %3293 = vmatprep.subr.bf16.mxu0 %v5238_v57  ;;  %3366 = vmatprep.subr.bf16.mxu1 %v5241_v58  ;;  %v1890_v39 = vadd.f32 %v8060_v17, %v6897_v55  ;;  %v8061_v57 = vld [vmem:[#allocation47_spill] sm:$0xff] }
0x1002   :  { %v1963_v58 = vadd.f32 %v8061_v57, %v6900_v13 }
0x1004   :  { %3294 = vmatpush1.bf16.msra.mxu0 %v5236_v40  ;;  %3367 = vmatpush1.bf16.msra.mxu1 %v5239_v50 }
0x1005   :  { %3295 = vmatprep.subr.bf16.mxu0 %v5244_v59  ;;  %3368 = vmatprep.subr.bf16.mxu1 %v5247_v8 }
0x1008   :  { %3296 = vmatpush1.bf16.msra.mxu0 %v5242_v29  ;;  %3369 = vmatpush1.bf16.msra.mxu1 %v5245_v28 }
0x1009   :  { %3297 = vmatprep.subr.bf16.mxu0 %v5250_v27  ;;  %3370 = vmatprep.subr.bf16.mxu1 %v5253_v7 }
0x100c   :  { %3298 = vmatpush1.bf16.msra.mxu0 %v5248_v34  ;;  %3371 = vmatpush1.bf16.msra.mxu1 %v5251_v24 }
0x100d   :  { %3299 = vmatprep.subr.bf16.mxu0 %v5256_v45  ;;  %3372 = vmatprep.subr.bf16.mxu1 %v5259_v41 }
0x1010   :  { %3300 = vmatpush1.bf16.msra.mxu0 %v5254_v11  ;;  %3373 = vmatpush1.bf16.msra.mxu1 %v5257_v35 }
0x1011   :  { %3591 = vmatprep.subr.bf16.mxu0 %v7287_v16  ;;  %3632 = vmatprep.subr.bf16.mxu1 %v7289_v14 }
0x1013   :  { %3318 = vmatmul.mubr.bf16.vlgmr.msra.gmra.mrb[80].mxu0 %v3100_v49  ;;  %3391 = vmatmul.mubr.bf16.vlgmr.msra.gmra.mrb[112].mxu1 %v3100_v49 }
0x1014   :  { %3327 = vmatprep.mubr.bf16.mxu0 %v7994_v37  ;;  %3400 = vmatprep.mubr.bf16.mxu1 %v7994_v37 }
0x1015   :  { %3592 = vmatpush1.bf16.msra.mxu0 %v7291_v15  ;;  %3633 = vmatpush1.bf16.msra.mxu1 %v7293_v22 }
0x1016   :  { %3593 = vmatprep.subr.bf16.mxu0 %v7299_v12  ;;  %3634 = vmatprep.subr.bf16.mxu1 %v7301_v44 }
0x1019   :  { %3594 = vmatpush1.bf16.msra.mxu0 %v7303_v60  ;;  %3635 = vmatpush1.bf16.msra.mxu1 %v7305_v63 }
0x101a   :  { %3595 = vmatprep.subr.bf16.mxu0 %v7311_v21  ;;  %3636 = vmatprep.subr.bf16.mxu1 %v7313_v1 }
0x101b   :  { %3328 = vmatmul.mubr.bf16.gmra.mrb[84].mxu0 %v3101_v31  ;;  %3401 = vmatmul.mubr.bf16.gmra.mrb[116].mxu1 %v3101_v31 }
0x101c   :  { %3337 = vmatprep.mubr.bf16.mxu0 %v7994_v37  ;;  %3410 = vmatprep.mubr.bf16.mxu1 %v7994_v37 }
0x101d   :  { %3596 = vmatpush1.bf16.msra.mxu0 %v7315_v2  ;;  %3637 = vmatpush1.bf16.msra.mxu1 %v7317_v5 }
0x101e   :  { %3597 = vmatprep.subr.bf16.mxu0 %v7323_v6  ;;  %3638 = vmatprep.subr.bf16.mxu1 %v7325_v9 }
0x1021   :  { %3598 = vmatpush1.bf16.msra.mxu0 %v7327_v10  ;;  %3639 = vmatpush1.bf16.msra.mxu1 %v7329_v56 }
0x1022   :  { %3599 = vmatprep.subr.bf16.mxu0 %v7335_v52  ;;  %3640 = vmatprep.subr.bf16.mxu1 %v7337_v30 }
0x1023   :  { %3338 = vmatmul.mubr.bf16.gmra.mrb[88].mxu0 %v3102_v25  ;;  %3411 = vmatmul.mubr.bf16.gmra.mrb[120].mxu1 %v3102_v25 }
0x1024   :  { %3347 = vmatprep.mubr.bf16.mxu0 %v7994_v37  ;;  %3420 = vmatprep.mubr.bf16.mxu1 %v7994_v37 }
0x1025   :  { %3600 = vmatpush1.bf16.msra.mxu0 %v7339_v26  ;;  %3641 = vmatpush1.bf16.msra.mxu1 %v7341_v33 }
0x1026   :  { %3601 = vmatprep.subr.bf16.mxu0 %v7347_v18  ;;  %3642 = vmatprep.subr.bf16.mxu1 %v7349_v47 }
0x1029   :  { %3602 = vmatpush1.bf16.msra.mxu0 %v7351_v42  ;;  %3643 = vmatpush1.bf16.msra.mxu1 %v7353_v36 }
0x102a   :  { %3603 = vmatprep.subr.bf16.mxu0 %v7359_v0  ;;  %3644 = vmatprep.subr.bf16.mxu1 %v7361_v19 }
0x102d   :  { %3604 = vmatpush1.bf16.msra.mxu0 %v7363_v32  ;;  %3645 = vmatpush1.bf16.msra.mxu1 %v7365_v38 }
0x102e   :  { %3605 = vmatprep.subr.bf16.mxu0 %v7371_v20  ;;  %3646 = vmatprep.subr.bf16.mxu1 %v7373_v43 }
0x1031   :  { %3606 = vmatpush1.bf16.msra.mxu0 %v7375_v51  ;;  %3647 = vmatpush1.bf16.msra.mxu1 %v7377_v23 }
0x1032   :  { %3703 = vmatprep.subr.bf16.mxu0 %v7287_v16  ;;  %3744 = vmatprep.subr.bf16.mxu1 %v7289_v14 }
0x10c6   :  { %v2943_v40 = vpop.f32.mrb[76].mxu0  ;;  %v2984_v50 = vpop.f32.mrb[108].mxu1 }
0x10c7   :  { %v2991_v59 = vadd.f32 %v2943_v40, %v1888_v53  ;;  %v2993_v8 = vadd.f32 %v2984_v50, %v1961_v4  ;;  %v2945_v29 = vpop.f32.mrb[77].mxu0  ;;  %v2986_v28 = vpop.f32.mrb[109].mxu1 }
0x10c8   :  { %v2992_v27 = vadd.f32 %v2945_v29, %v1890_v39  ;;  %v2994_v7 = vadd.f32 %v2986_v28, %v1963_v58  ;;  %v2947_v34 = vpop.f32.mrb[78].mxu0  ;;  %v2988_v24 = vpop.f32.mrb[110].mxu1 }
0x10c9   :  { %v4869_v48 = vmul.f32 -1.442695, %v2991_v59  ;;  %v2948_v45 = vpop.f32.mrb[79].mxu0  ;;  %v2989_v41 = vpop.f32.mrb[111].mxu1 }
0x10ca   :  { %v4870_v54 = vmul.f32 -1.442695, %v2992_v27  ;;  %v4871_v55 = vmul.f32 -1.442695, %v2994_v7 }
0x10cb   :  { %5556 = vpow2.f32 %v4869_v48 }
0x10cc   :  { %5558 = vpow2.f32 %v4870_v54 }
0x10cd   :  { %5560 = vpow2.f32 %v4871_v55 }
0x10ce   :  { %5562 = vtanh.f32 %v2993_v8 }
0x10d5   :  { %v5557_v11 = vpop.eup %5556 }
0x10d6   :  { %v5559_v35 = vpop.eup %5558  ;;  %v2998_v13 = vadd.f32 1.0, %v5557_v11 }
0x10d7   :  { %v3004_v49 = vadd.f32 1.0, %v5559_v35  ;;  %v5561_v31 = vpop.eup %5560 }
0x10d8   :  { %5564 = vrcp.f32 %v2998_v13  ;;  %v5563_v25 = vpop.eup %5562  ;;  %v3011_v4 = vadd.f32 1.0, %v5561_v31 }
0x10d9   :  { %5566 = vrcp.f32 %v3004_v49 }
0x10da   :  { %5568 = vrcp.f32 %v3011_v4  ;;  %v3091_v4 = vld [vmem:[#allocation9 + $0x8] sm:$0xf] }
0x10e2   :  { %v5565_v62 = vpop.eup %5564 }
0x10e3   :  { %v5567_v53 = vpop.eup %5566  ;;  %v3015_v61 = vmul.f32 %v5565_v62, %v5563_v25 }
0x10e4   :  { %v3014_v17 = vmul.f32 %v5567_v53, %v7266_v3  ;;  %v5569_v45 = vpop.eup %5568 }
0x10e6   :  { %v3016_v39 = vadd.f32 %v3015_v61, %v3014_v17  ;;  %v7394_v57 = vpop.f32.mrb[80].mxu0  ;;  %v7396_v58 = vpop.f32.mrb[112].mxu1 }
0x10e7   :  { %v7398_v40 = vpop.f32.mrb[81].mxu0  ;;  %v7400_v50 = vpop.f32.mrb[113].mxu1 }
0x10e8   :  { %3023 = vst [vmem:[#allocation15 + $0x8] sm:$0xff] %v3016_v39  ;;  %v7402_v59 = vpop.f32.mrb[82].mxu0  ;;  %v7404_v8 = vpop.f32.mrb[114].mxu1  ;;  %5570 = vtanh.f32 %v3016_v39 }
0x10e9   :  { %v7406_v29 = vpop.f32.mrb[83].mxu0  ;;  %v7408_v28 = vpop.f32.mrb[115].mxu1 }
0x10ee   :  { %v7410_v3 = vpop.f32.mrb[84].mxu0  ;;  %v7412_v27 = vpop.f32.mrb[116].mxu1 }
0x10ef   :  { %8062 = vst [vmem:[#allocation33_spill] sm:$0xff] %v7412_v27  ;;  %v7414_v7 = vpop.f32.mrb[85].mxu0  ;;  %v7416_v34 = vpop.f32.mrb[117].mxu1 }
0x10f0   :  { %8063 = vst [vmem:[#allocation23_spill] sm:$0xff] %v7414_v7  ;;  %8064 = vst [vmem:[#allocation34_spill] sm:$0xff] %v7416_v34  ;;  %v7418_v24 = vpop.f32.mrb[86].mxu0  ;;  %v7420_v48 = vpop.f32.mrb[118].mxu1 }
0x10f1   :  { %8065 = vst [vmem:[#allocation24_spill] sm:$0xff] %v7418_v24  ;;  %8066 = vst [vmem:[#allocation35_spill] sm:$0xff] %v7420_v48  ;;  %v7422_v41 = vpop.f32.mrb[87].mxu0  ;;  %v7424_v54 = vpop.f32.mrb[119].mxu1 }
0x10f2   :  { %8067 = vst [vmem:[#allocation25_spill] sm:$0xff] %v7422_v41  ;;  %8068 = vst [vmem:[#allocation36_spill] sm:$0xff] %v7424_v54  ;;  %v5571_v55 = vpop.eup %5570 }
0x10f3   :  { %v3018_v11 = vmul.f32 %v5571_v55, %v5569_v45 }
0x10f5   :  { %v3103_v35 = vpack.c.bf16 %v3018_v11, %v7269_v46  ;;  %3021 = vst [vmem:[#allocation13 + $0x8] sm:$0xff] %v3018_v11 }
0x10f6   :  { %v7427_v13 = vpop.f32.mrb[88].mxu0  ;;  %v7429_v49 = vpop.f32.mrb[120].mxu1 }
0x10f7   :  { %8069 = vst [vmem:[#allocation26_spill] sm:$0xff] %v7427_v13  ;;  %8070 = vst [vmem:[#allocation37_spill] sm:$0xff] %v7429_v49  ;;  %v7431_v31 = vpop.f32.mrb[89].mxu0  ;;  %v7433_v25 = vpop.f32.mrb[121].mxu1  ;;  %3348 = vmatmul.mubr.bf16.gmra.mrb[92].mxu0 %v3103_v35  ;;  %3421 = vmatmul.mubr.bf16.gmra.mrb[124].mxu1 %v3103_v35 }
0x10f8   :  { %8071 = vst [vmem:[#allocation27_spill] sm:$0xff] %v7431_v31  ;;  %8072 = vst [vmem:[#allocation38_spill] sm:$0xff] %v7433_v25  ;;  %v7435_v62 = vpop.f32.mrb[90].mxu0  ;;  %v7437_v53 = vpop.f32.mrb[122].mxu1  ;;  %3623 = vmatprep.mubr.bf16.mxu0 %v7994_v37  ;;  %3664 = vmatprep.mubr.bf16.mxu1 %v7994_v37 }
0x10f9   :  { %8073 = vst [vmem:[#allocation28_spill] sm:$0xff] %v7435_v62  ;;  %8074 = vst [vmem:[#allocation39_spill] sm:$0xff] %v7437_v53  ;;  %v7441_v46 = vpop.f32.mrb[91].mxu0  ;;  %v7443_v61 = vpop.f32.mrb[123].mxu1  ;;  %v8084_v53 = vld [vmem:[#allocation31_spill] sm:$0xff] }
0x10fa   :  { %8075 = vst [vmem:[#allocation29_spill] sm:$0xff] %v7441_v46  ;;  %8076 = vst [vmem:[#allocation40_spill] sm:$0xff] %v7443_v61  ;;  %v8083_v61 = vld [vmem:[#allocation21_spill] sm:$0xff]  ;;  %v7497_v62 = vrot.slane %v3091_v4, %v8084_v53 }
0x10fb   :  { %v7494_v46 = vrot.slane %v3091_v4, %v8083_v61 }
0x10fc   :  { %v3393_v61 = vadd.f32 %v7396_v58, %v7497_v62 }
0x10ff   :  { %3624 = vmatmul.mubr.bf16.vlgmr.msra.gmra.mrb[96].mxu0 %v7994_v37  ;;  %3665 = vmatmul.mubr.bf16.vlgmr.msra.gmra.mrb[128].mxu1 %v7994_v37 }
0x1100   :  { %3704 = vmatpush1.bf16.msra.mxu0 %v7291_v15  ;;  %3745 = vmatpush1.bf16.msra.mxu1 %v7293_v22 }
0x1101   :  { %3705 = vmatprep.subr.bf16.mxu0 %v7299_v12  ;;  %3746 = vmatprep.subr.bf16.mxu1 %v7301_v44 }
0x1102   :  { %3735 = vmatprep.mubr.bf16.mxu0 %v7994_v37  ;;  %3776 = vmatprep.mubr.bf16.mxu1 %v7994_v37 }
0x1104   :  { %3706 = vmatpush1.bf16.msra.mxu0 %v7303_v60  ;;  %3747 = vmatpush1.bf16.msra.mxu1 %v7305_v63 }
0x1105   :  { %3707 = vmatprep.subr.bf16.mxu0 %v7311_v21  ;;  %3748 = vmatprep.subr.bf16.mxu1 %v7313_v1 }
0x1108   :  { %3708 = vmatpush1.bf16.msra.mxu0 %v7315_v2  ;;  %3749 = vmatpush1.bf16.msra.mxu1 %v7317_v5 }
0x1109   :  { %3709 = vmatprep.subr.bf16.mxu0 %v7323_v6  ;;  %3750 = vmatprep.subr.bf16.mxu1 %v7325_v9 }
0x110c   :  { %3710 = vmatpush1.bf16.msra.mxu0 %v7327_v10  ;;  %3751 = vmatpush1.bf16.msra.mxu1 %v7329_v56 }
0x110d   :  { %3711 = vmatprep.subr.bf16.mxu0 %v7335_v52  ;;  %3752 = vmatprep.subr.bf16.mxu1 %v7337_v30 }
0x1110   :  { %3712 = vmatpush1.bf16.msra.mxu0 %v7339_v26  ;;  %3753 = vmatpush1.bf16.msra.mxu1 %v7341_v33 }
0x1111   :  { %3713 = vmatprep.subr.bf16.mxu0 %v7347_v18  ;;  %3754 = vmatprep.subr.bf16.mxu1 %v7349_v47 }
0x1114   :  { %3714 = vmatpush1.bf16.msra.mxu0 %v7351_v42  ;;  %3755 = vmatpush1.bf16.msra.mxu1 %v7353_v36 }
0x1115   :  { %3715 = vmatprep.subr.bf16.mxu0 %v7359_v0  ;;  %3756 = vmatprep.subr.bf16.mxu1 %v7361_v19 }
0x1118   :  { %3716 = vmatpush1.bf16.msra.mxu0 %v7363_v32  ;;  %3757 = vmatpush1.bf16.msra.mxu1 %v7365_v38 }
0x1119   :  { %3717 = vmatprep.subr.bf16.mxu0 %v7371_v20  ;;  %3758 = vmatprep.subr.bf16.mxu1 %v7373_v43 }
0x111c   :  { %3718 = vmatpush1.bf16.msra.mxu0 %v7375_v51  ;;  %3759 = vmatpush1.bf16.msra.mxu1 %v7377_v23 }
0x111d   :  { %3815 = vmatprep.subr.bf16.mxu0 %v7287_v16  ;;  %3856 = vmatprep.subr.bf16.mxu1 %v7289_v14 }
0x11ca   :  { %v7481_v17 = vpop.f32.mrb[92].mxu0  ;;  %v7483_v39 = vpop.f32.mrb[124].mxu1 }
0x11cb   :  { %8077 = vst [vmem:[#allocation30_spill] sm:$0xff] %v7481_v17  ;;  %8078 = vst [vmem:[#allocation41_spill] sm:$0xff] %v7483_v39  ;;  %v7485_v45 = vpop.f32.mrb[93].mxu0  ;;  %v7487_v55 = vpop.f32.mrb[125].mxu1  ;;  %v8087_v17 = vld [vmem:[#allocation22_spill] sm:$0xff] }
0x11cc   :  { %8079 = vst [vmem:[#allocation42_spill] sm:$0xff] %v7485_v45  ;;  %8080 = vst [vmem:[#allocation43_spill] sm:$0xff] %v7487_v55  ;;  %v7489_v11 = vpop.f32.mrb[94].mxu0  ;;  %v7491_v35 = vpop.f32.mrb[126].mxu1  ;;  %v7504_v39 = vrot.slane %v3091_v4, %v8087_v17  ;;  %v8088_v45 = vld [vmem:[#allocation32_spill] sm:$0xff] }
0x11cd   :  { %8081 = vst [vmem:[#allocation44_spill] sm:$0xff] %v7489_v11  ;;  %8082 = vst [vmem:[#allocation45_spill] sm:$0xff] %v7491_v35  ;;  %v7499_v25 = vpop.f32.mrb[95].mxu0  ;;  %v7501_v31 = vpop.f32.mrb[127].mxu1  ;;  %v7507_v49 = vrot.slane %v3091_v4, %v8088_v45  ;;  %v3320_v11 = vadd.f32 %v7394_v57, %v7494_v46 }
0x11ce   :  { %8085 = vst [vmem:[#allocation46_spill] sm:$0xff] %v7499_v25  ;;  %8086 = vst [vmem:[#allocation47_spill] sm:$0xff] %v7501_v31  ;;  %v3322_v53 = vadd.f32 %v7398_v40, %v7504_v39 }
0x11cf   :  { %v3395_v25 = vadd.f32 %v7400_v50, %v7507_v49 }
0x11d2   :  { %v3625_v35 = vpop.f32.mrb[96].mxu0  ;;  %v3666_v31 = vpop.f32.mrb[128].mxu1 }
0x11d3   :  { %v3673_v55 = vadd.f32 %v3625_v35, %v3320_v11  ;;  %v3675_v17 = vadd.f32 %v3666_v31, %v3393_v61  ;;  %v3627_v13 = vpop.f32.mrb[97].mxu0  ;;  %v3668_v54 = vpop.f32.mrb[129].mxu1  ;;  %v3324_v61 = vadd.f32 %v7402_v59, %v7494_v46 }
0x11d4   :  { %v3674_v4 = vadd.f32 %v3627_v13, %v3322_v53  ;;  %v3676_v45 = vadd.f32 %v3668_v54, %v3395_v25  ;;  %v3629_v41 = vpop.f32.mrb[98].mxu0  ;;  %v3670_v48 = vpop.f32.mrb[130].mxu1  ;;  %v3397_v53 = vadd.f32 %v7404_v8, %v7497_v62 }
0x11d5   :  { %v4936_v57 = vmul.f32 -1.442695, %v3673_v55  ;;  %v3630_v24 = vpop.f32.mrb[99].mxu0  ;;  %v3671_v34 = vpop.f32.mrb[131].mxu1 }
0x11d6   :  { %v4937_v58 = vmul.f32 -1.442695, %v3674_v4  ;;  %v4938_v40 = vmul.f32 -1.442695, %v3676_v45  ;;  %v3399_v4 = vadd.f32 %v7408_v28, %v7507_v49 }
0x11d7   :  { %5572 = vpow2.f32 %v4936_v57 }
0x11d8   :  { %5574 = vpow2.f32 %v4937_v58 }
0x11d9   :  { %5576 = vpow2.f32 %v4938_v40 }
0x11da   :  { %5578 = vtanh.f32 %v3675_v17  ;;  %v3326_v17 = vadd.f32 %v7406_v29, %v7504_v39 }
0x11e1   :  { %v5573_v7 = vpop.eup %5572 }
0x11e2   :  { %v5575_v27 = vpop.eup %5574  ;;  %v3680_v50 = vadd.f32 1.0, %v5573_v7 }
0x11e3   :  { %v3686_v11 = vadd.f32 1.0, %v5575_v27  ;;  %v5577_v31 = vpop.eup %5576 }
0x11e4   :  { %5580 = vrcp.f32 %v3680_v50  ;;  %v5579_v13 = vpop.eup %5578  ;;  %v3693_v25 = vadd.f32 1.0, %v5577_v31 }
0x11e5   :  { %5582 = vrcp.f32 %v3686_v11 }
0x11e6   :  { %5584 = vrcp.f32 %v3693_v25 }
0x11ee   :  { %v5581_v54 = vpop.eup %5580 }
0x11ef   :  { %v5583_v41 = vpop.eup %5582  ;;  %v3697_v48 = vmul.f32 %v5581_v54, %v5579_v13 }
0x11f0   :  { %v3696_v24 = vmul.f32 0.0, %v5583_v41  ;;  %v5585_v55 = vpop.eup %5584 }
0x11f2   :  { %v7517_v34 = vadd.f32 %v3697_v48, %v3696_v24 }
0x11f4   :  { %5586 = vtanh.f32 %v7517_v34 }
0x11fe   :  { %v5587_v35 = vpop.eup %5586 }
0x11ff   :  { %v7520_v7 = vmul.f32 %v5587_v35, %v5585_v55 }
0x1201   :  { %v3702_v27 = vpack.c.bf16 %v7520_v7, %v7520_v7 }
0x1203   :  { %3736 = vmatmul.mubr.bf16.vlgmr.msra.gmra.mrb[100].mxu0 %v3702_v27  ;;  %3777 = vmatmul.mubr.bf16.vlgmr.msra.gmra.mrb[132].mxu1 %v3702_v27 }
0x1204   :  { %3816 = vmatpush1.bf16.msra.mxu0 %v7291_v15  ;;  %3857 = vmatpush1.bf16.msra.mxu1 %v7293_v22 }
0x1205   :  { %3817 = vmatprep.subr.bf16.mxu0 %v7299_v12  ;;  %3858 = vmatprep.subr.bf16.mxu1 %v7301_v44 }
0x1206   :  { %3847 = vmatprep.mubr.bf16.mxu0 %v7994_v37  ;;  %3888 = vmatprep.mubr.bf16.mxu1 %v7994_v37 }
0x1208   :  { %3818 = vmatpush1.bf16.msra.mxu0 %v7303_v60  ;;  %3859 = vmatpush1.bf16.msra.mxu1 %v7305_v63 }
0x1209   :  { %3819 = vmatprep.subr.bf16.mxu0 %v7311_v21  ;;  %3860 = vmatprep.subr.bf16.mxu1 %v7313_v1 }
0x120c   :  { %3820 = vmatpush1.bf16.msra.mxu0 %v7315_v2  ;;  %3861 = vmatpush1.bf16.msra.mxu1 %v7317_v5 }
0x120d   :  { %3821 = vmatprep.subr.bf16.mxu0 %v7323_v6  ;;  %3862 = vmatprep.subr.bf16.mxu1 %v7325_v9 }
0x1210   :  { %3822 = vmatpush1.bf16.msra.mxu0 %v7327_v10  ;;  %3863 = vmatpush1.bf16.msra.mxu1 %v7329_v56 }
0x1211   :  { %3823 = vmatprep.subr.bf16.mxu0 %v7335_v52  ;;  %3864 = vmatprep.subr.bf16.mxu1 %v7337_v30 }
0x1214   :  { %3824 = vmatpush1.bf16.msra.mxu0 %v7339_v26  ;;  %3865 = vmatpush1.bf16.msra.mxu1 %v7341_v33 }
0x1215   :  { %3825 = vmatprep.subr.bf16.mxu0 %v7347_v18  ;;  %3866 = vmatprep.subr.bf16.mxu1 %v7349_v47 }
0x1218   :  { %3826 = vmatpush1.bf16.msra.mxu0 %v7351_v42  ;;  %3867 = vmatpush1.bf16.msra.mxu1 %v7353_v36 }
0x1219   :  { %3827 = vmatprep.subr.bf16.mxu0 %v7359_v0  ;;  %3868 = vmatprep.subr.bf16.mxu1 %v7361_v19 }
0x121c   :  { %3828 = vmatpush1.bf16.msra.mxu0 %v7363_v32  ;;  %3869 = vmatpush1.bf16.msra.mxu1 %v7365_v38 }
0x121d   :  { %3829 = vmatprep.subr.bf16.mxu0 %v7371_v20  ;;  %3870 = vmatprep.subr.bf16.mxu1 %v7373_v43 }
0x1220   :  { %3830 = vmatpush1.bf16.msra.mxu0 %v7375_v51  ;;  %3871 = vmatpush1.bf16.msra.mxu1 %v7377_v23 }
0x1221   :  { %3927 = vmatprep.subr.bf16.mxu0 %v7287_v16  ;;  %3968 = vmatprep.subr.bf16.mxu1 %v7289_v14 }
0x12d6   :  { %v3737_v45 = vpop.f32.mrb[100].mxu0  ;;  %v3778_v57 = vpop.f32.mrb[132].mxu1 }
0x12d7   :  { %v3785_v58 = vadd.f32 %v3737_v45, %v3324_v61  ;;  %v3787_v40 = vadd.f32 %v3778_v57, %v3397_v53  ;;  %v3739_v50 = vpop.f32.mrb[101].mxu0  ;;  %v3780_v11 = vpop.f32.mrb[133].mxu1 }
0x12d8   :  { %v3786_v31 = vadd.f32 %v3739_v50, %v3326_v17  ;;  %v3788_v13 = vadd.f32 %v3780_v11, %v3399_v4  ;;  %v3741_v54 = vpop.f32.mrb[102].mxu0  ;;  %v3782_v41 = vpop.f32.mrb[134].mxu1 }
0x12d9   :  { %v4939_v59 = vmul.f32 -1.442695, %v3785_v58  ;;  %v3742_v48 = vpop.f32.mrb[103].mxu0  ;;  %v3783_v25 = vpop.f32.mrb[135].mxu1  ;;  %v8090_v41 = vld [vmem:[#allocation23_spill] sm:$0xff] }
0x12da   :  { %v4940_v8 = vmul.f32 -1.442695, %v3786_v31  ;;  %v4941_v29 = vmul.f32 -1.442695, %v3788_v13  ;;  %v8089_v13 = vld [vmem:[#allocation33_spill] sm:$0xff]  ;;  %v8091_v48 = vld [vmem:[#allocation34_spill] sm:$0xff] }
0x12db   :  { %5588 = vpow2.f32 %v4939_v59  ;;  %v3403_v54 = vadd.f32 %v8089_v13, %v7497_v62  ;;  %v3332_v59 = vadd.f32 %v8090_v41, %v7504_v39  ;;  %v3405_v25 = vadd.f32 %v8091_v48, %v7507_v49 }
0x12dc   :  { %5590 = vpow2.f32 %v4940_v8 }
0x12dd   :  { %5592 = vpow2.f32 %v4941_v29 }
0x12de   :  { %5594 = vtanh.f32 %v3787_v40 }
0x12e5   :  { %v5589_v24 = vpop.eup %5588 }
0x12e6   :  { %v5591_v55 = vpop.eup %5590  ;;  %v3792_v28 = vadd.f32 1.0, %v5589_v24 }
0x12e7   :  { %v3798_v35 = vadd.f32 1.0, %v5591_v55  ;;  %v5593_v27 = vpop.eup %5592 }
0x12e8   :  { %5596 = vrcp.f32 %v3792_v28  ;;  %v5595_v61 = vpop.eup %5594  ;;  %v3805_v45 = vadd.f32 1.0, %v5593_v27 }
0x12e9   :  { %5598 = vrcp.f32 %v3798_v35 }
0x12ea   :  { %5600 = vrcp.f32 %v3805_v45 }
0x12f2   :  { %v5597_v53 = vpop.eup %5596 }
0x12f3   :  { %v5599_v17 = vpop.eup %5598  ;;  %v3809_v4 = vmul.f32 %v5597_v53, %v5595_v61 }
0x12f4   :  { %v3808_v57 = vmul.f32 %v5599_v17, %v7517_v34  ;;  %v5601_v50 = vpop.eup %5600  ;;  %v3330_v34 = vadd.f32 %v7410_v3, %v7494_v46 }
0x12f6   :  { %v7567_v58 = vadd.f32 %v3809_v4, %v3808_v57 }
0x12f8   :  { %5602 = vtanh.f32 %v7567_v58 }
0x1302   :  { %v5603_v11 = vpop.eup %5602 }
0x1303   :  { %v7570_v31 = vmul.f32 %v5603_v11, %v5601_v50 }
0x1305   :  { %v3814_v40 = vpack.c.bf16 %v7570_v31, %v7570_v31 }
0x1307   :  { %3848 = vmatmul.mubr.bf16.vlgmr.msra.gmra.mrb[104].mxu0 %v3814_v40  ;;  %3889 = vmatmul.mubr.bf16.vlgmr.msra.gmra.mrb[136].mxu1 %v3814_v40 }
0x1308   :  { %3928 = vmatpush1.bf16.msra.mxu0 %v7291_v15  ;;  %3969 = vmatpush1.bf16.msra.mxu1 %v7293_v22 }
0x1309   :  { %3929 = vmatprep.subr.bf16.mxu0 %v7299_v12  ;;  %3970 = vmatprep.subr.bf16.mxu1 %v7301_v44 }
0x130a   :  { %3959 = vmatprep.mubr.bf16.mxu0 %v7994_v37  ;;  %4000 = vmatprep.mubr.bf16.mxu1 %v7994_v37 }
0x130c   :  { %3930 = vmatpush1.bf16.msra.mxu0 %v7303_v60  ;;  %3971 = vmatpush1.bf16.msra.mxu1 %v7305_v63 }
0x130d   :  { %3931 = vmatprep.subr.bf16.mxu0 %v7311_v21  ;;  %3972 = vmatprep.subr.bf16.mxu1 %v7313_v1 }
0x1310   :  { %3932 = vmatpush1.bf16.msra.mxu0 %v7315_v2  ;;  %3973 = vmatpush1.bf16.msra.mxu1 %v7317_v5 }
0x1311   :  { %3933 = vmatprep.subr.bf16.mxu0 %v7323_v6  ;;  %3974 = vmatprep.subr.bf16.mxu1 %v7325_v9 }
0x1314   :  { %3934 = vmatpush1.bf16.msra.mxu0 %v7327_v10  ;;  %3975 = vmatpush1.bf16.msra.mxu1 %v7329_v56 }
0x1315   :  { %3935 = vmatprep.subr.bf16.mxu0 %v7335_v52  ;;  %3976 = vmatprep.subr.bf16.mxu1 %v7337_v30 }
0x1318   :  { %3936 = vmatpush1.bf16.msra.mxu0 %v7339_v26  ;;  %3977 = vmatpush1.bf16.msra.mxu1 %v7341_v33 }
0x1319   :  { %3937 = vmatprep.subr.bf16.mxu0 %v7347_v18  ;;  %3978 = vmatprep.subr.bf16.mxu1 %v7349_v47 }
0x131c   :  { %3938 = vmatpush1.bf16.msra.mxu0 %v7351_v42  ;;  %3979 = vmatpush1.bf16.msra.mxu1 %v7353_v36 }
0x131d   :  { %3939 = vmatprep.subr.bf16.mxu0 %v7359_v0  ;;  %3980 = vmatprep.subr.bf16.mxu1 %v7361_v19 }
0x1320   :  { %3940 = vmatpush1.bf16.msra.mxu0 %v7363_v32  ;;  %3981 = vmatpush1.bf16.msra.mxu1 %v7365_v38 }
0x1321   :  { %3941 = vmatprep.subr.bf16.mxu0 %v7371_v20  ;;  %3982 = vmatprep.subr.bf16.mxu1 %v7373_v43 }
0x1324   :  { %3942 = vmatpush1.bf16.msra.mxu0 %v7375_v51  ;;  %3983 = vmatpush1.bf16.msra.mxu1 %v7377_v23 }
0x1325   :  { %4039 = vmatprep.subr.bf16.mxu0 %v7287_v16  ;;  %4080 = vmatprep.subr.bf16.mxu1 %v7289_v14 }
0x13da   :  { %v3849_v8 = vpop.f32.mrb[104].mxu0  ;;  %v3890_v29 = vpop.f32.mrb[136].mxu1 }
0x13db   :  { %v3897_v24 = vadd.f32 %v3849_v8, %v3330_v34  ;;  %v3899_v55 = vadd.f32 %v3890_v29, %v3403_v54  ;;  %v3851_v28 = vpop.f32.mrb[105].mxu0  ;;  %v3892_v35 = vpop.f32.mrb[137].mxu1 }
0x13dc   :  { %v3898_v27 = vadd.f32 %v3851_v28, %v3332_v59  ;;  %v3900_v61 = vadd.f32 %v3892_v35, %v3405_v25  ;;  %v3853_v53 = vpop.f32.mrb[106].mxu0  ;;  %v3894_v17 = vpop.f32.mrb[138].mxu1 }
0x13dd   :  { %v4942_v3 = vmul.f32 -1.442695, %v3897_v24  ;;  %v3854_v4 = vpop.f32.mrb[107].mxu0  ;;  %v3895_v45 = vpop.f32.mrb[139].mxu1  ;;  %v8093_v53 = vld [vmem:[#allocation35_spill] sm:$0xff] }
0x13de   :  { %v4943_v57 = vmul.f32 -1.442695, %v3898_v27  ;;  %v4944_v50 = vmul.f32 -1.442695, %v3900_v61  ;;  %v3407_v17 = vadd.f32 %v8093_v53, %v7497_v62  ;;  %v8095_v45 = vld [vmem:[#allocation36_spill] sm:$0xff] }
0x13df   :  { %5604 = vpow2.f32 %v4942_v3  ;;  %v8094_v3 = vld [vmem:[#allocation25_spill] sm:$0xff] }
0x13e0   :  { %5606 = vpow2.f32 %v4943_v57  ;;  %v3336_v4 = vadd.f32 %v8094_v3, %v7504_v39  ;;  %v3409_v57 = vadd.f32 %v8095_v45, %v7507_v49 }
0x13e1   :  { %5608 = vpow2.f32 %v4944_v50 }
0x13e2   :  { %5610 = vtanh.f32 %v3899_v55 }
0x13e9   :  { %v5605_v11 = vpop.eup %5604 }
0x13ea   :  { %v5607_v40 = vpop.eup %5606  ;;  %v3904_v13 = vadd.f32 1.0, %v5605_v11 }
0x13eb   :  { %v3910_v34 = vadd.f32 1.0, %v5607_v40  ;;  %v5609_v54 = vpop.eup %5608 }
0x13ec   :  { %5612 = vrcp.f32 %v3904_v13  ;;  %v5611_v41 = vpop.eup %5610  ;;  %v3917_v8 = vadd.f32 1.0, %v5609_v54 }
0x13ed   :  { %5614 = vrcp.f32 %v3910_v34 }
0x13ee   :  { %5616 = vrcp.f32 %v3917_v8 }
0x13f6   :  { %v5613_v59 = vpop.eup %5612 }
0x13f7   :  { %v5615_v48 = vpop.eup %5614  ;;  %v3921_v25 = vmul.f32 %v5613_v59, %v5611_v41 }
0x13f8   :  { %v3920_v29 = vmul.f32 %v5615_v48, %v7567_v58  ;;  %v5617_v28 = vpop.eup %5616  ;;  %v8092_v58 = vld [vmem:[#allocation24_spill] sm:$0xff] }
0x13f9   :  { %v3334_v61 = vadd.f32 %v8092_v58, %v7494_v46 }
0x13fa   :  { %v7617_v24 = vadd.f32 %v3921_v25, %v3920_v29 }
0x13fc   :  { %5618 = vtanh.f32 %v7617_v24 }
0x1406   :  { %v5619_v35 = vpop.eup %5618 }
0x1407   :  { %v7620_v27 = vmul.f32 %v5619_v35, %v5617_v28 }
0x1409   :  { %v3926_v55 = vpack.c.bf16 %v7620_v27, %v7620_v27 }
0x140b   :  { %3960 = vmatmul.mubr.bf16.vlgmr.msra.gmra.mrb[108].mxu0 %v3926_v55  ;;  %4001 = vmatmul.mubr.bf16.vlgmr.msra.gmra.mrb[140].mxu1 %v3926_v55 }
0x140c   :  { %4040 = vmatpush1.bf16.msra.mxu0 %v7291_v15  ;;  %4081 = vmatpush1.bf16.msra.mxu1 %v7293_v22 }
0x140d   :  { %4041 = vmatprep.subr.bf16.mxu0 %v7299_v12  ;;  %4082 = vmatprep.subr.bf16.mxu1 %v7301_v44 }
0x140e   :  { %4071 = vmatprep.mubr.bf16.mxu0 %v7994_v37  ;;  %4112 = vmatprep.mubr.bf16.mxu1 %v7994_v37 }
0x1410   :  { %4042 = vmatpush1.bf16.msra.mxu0 %v7303_v60  ;;  %4083 = vmatpush1.bf16.msra.mxu1 %v7305_v63 }
0x1411   :  { %4043 = vmatprep.subr.bf16.mxu0 %v7311_v21  ;;  %4084 = vmatprep.subr.bf16.mxu1 %v7313_v1 }
0x1414   :  { %4044 = vmatpush1.bf16.msra.mxu0 %v7315_v2  ;;  %4085 = vmatpush1.bf16.msra.mxu1 %v7317_v5 }
0x1415   :  { %4045 = vmatprep.subr.bf16.mxu0 %v7323_v6  ;;  %4086 = vmatprep.subr.bf16.mxu1 %v7325_v9 }
0x1418   :  { %4046 = vmatpush1.bf16.msra.mxu0 %v7327_v10  ;;  %4087 = vmatpush1.bf16.msra.mxu1 %v7329_v56 }
0x1419   :  { %4047 = vmatprep.subr.bf16.mxu0 %v7335_v52  ;;  %4088 = vmatprep.subr.bf16.mxu1 %v7337_v30 }
0x141c   :  { %4048 = vmatpush1.bf16.msra.mxu0 %v7339_v26  ;;  %4089 = vmatpush1.bf16.msra.mxu1 %v7341_v33 }
0x141d   :  { %4049 = vmatprep.subr.bf16.mxu0 %v7347_v18  ;;  %4090 = vmatprep.subr.bf16.mxu1 %v7349_v47 }
0x1420   :  { %4050 = vmatpush1.bf16.msra.mxu0 %v7351_v42  ;;  %4091 = vmatpush1.bf16.msra.mxu1 %v7353_v36 }
0x1421   :  { %4051 = vmatprep.subr.bf16.mxu0 %v7359_v0  ;;  %4092 = vmatprep.subr.bf16.mxu1 %v7361_v19 }
0x1424   :  { %4052 = vmatpush1.bf16.msra.mxu0 %v7363_v32  ;;  %4093 = vmatpush1.bf16.msra.mxu1 %v7365_v38 }
0x1425   :  { %4053 = vmatprep.subr.bf16.mxu0 %v7371_v20  ;;  %4094 = vmatprep.subr.bf16.mxu1 %v7373_v43 }
0x1428   :  { %4054 = vmatpush1.bf16.msra.mxu0 %v7375_v51  ;;  %4095 = vmatpush1.bf16.msra.mxu1 %v7377_v23 }
0x1429   :  { %4151 = vmatprep.subr.bf16.mxu0 %v7287_v16  ;;  %4192 = vmatprep.subr.bf16.mxu1 %v7289_v14 }
0x14de   :  { %v3961_v50 = vpop.f32.mrb[108].mxu0  ;;  %v4002_v11 = vpop.f32.mrb[140].mxu1 }
0x14df   :  { %v4009_v40 = vadd.f32 %v3961_v50, %v3334_v61  ;;  %v4011_v13 = vadd.f32 %v4002_v11, %v3407_v17  ;;  %v3963_v34 = vpop.f32.mrb[109].mxu0  ;;  %v4004_v54 = vpop.f32.mrb[141].mxu1 }
0x14e0   :  { %v4010_v41 = vadd.f32 %v3963_v34, %v3336_v4  ;;  %v4012_v59 = vadd.f32 %v4004_v54, %v3409_v57  ;;  %v3965_v48 = vpop.f32.mrb[110].mxu0  ;;  %v4006_v25 = vpop.f32.mrb[142].mxu1 }
0x14e1   :  { %v4945_v8 = vmul.f32 -1.442695, %v4009_v40  ;;  %v3966_v29 = vpop.f32.mrb[111].mxu0  ;;  %v4007_v28 = vpop.f32.mrb[143].mxu1 }
0x14e2   :  { %v4946_v35 = vmul.f32 -1.442695, %v4010_v41  ;;  %v4947_v55 = vmul.f32 -1.442695, %v4012_v59 }
0x14e3   :  { %5620 = vpow2.f32 %v4945_v8 }
0x14e4   :  { %5622 = vpow2.f32 %v4946_v35 }
0x14e5   :  { %5624 = vpow2.f32 %v4947_v55  ;;  %v7724_v55 = vld [vmem:[#allocation8 + $0x200] ss:$16 sps:$4 sm:$0xff]  }
0x14e6   :  { %5626 = vtanh.f32 %v4011_v13 }
0x14ed   :  { %v5621_v58 = vpop.eup %5620 }
0x14ee   :  { %v5623_v53 = vpop.eup %5622  ;;  %v4016_v3 = vadd.f32 1.0, %v5621_v58  ;;  %v7727_v58 = vld [vmem:[#allocation8 + $0x208] ss:$16 sps:$4 sm:$0xff]  }
0x14ef   :  { %v4022_v61 = vadd.f32 1.0, %v5623_v53  ;;  %v5625_v17 = vpop.eup %5624  ;;  %v7730_v53 = vld [vmem:[#allocation8 + $0x224] ss:$16 sps:$4 sm:$0xff]  }
0x14f0   :  { %5628 = vrcp.f32 %v4016_v3  ;;  %v5627_v4 = vpop.eup %5626  ;;  %v4029_v11 = vadd.f32 1.0, %v5625_v17  ;;  %v7733_v3 = vld [vmem:[#allocation8 + $0x22c] ss:$16 sps:$4 sm:$0xff]   ;;  %v7741_v17 = vld [vmem:[#allocation8 + $0x228] ss:$16 sps:$4 sm:$0xff]  }
0x14f1   :  { %5630 = vrcp.f32 %v4022_v61  ;;  %v7738_v61 = vld [vmem:[#allocation8 + $0x220] ss:$16 sps:$4 sm:$0xff]  }
0x14f2   :  { %5632 = vrcp.f32 %v4029_v11  ;;  %v7756_v11 = vld [vmem:[#allocation8 + $0x264] ss:$16 sps:$4 sm:$0xff]  }
0x14fa   :  { %v5629_v45 = vpop.eup %5628 }
0x14fb   :  { %v5631_v57 = vpop.eup %5630  ;;  %v4033_v50 = vmul.f32 %v5629_v45, %v5627_v4  ;;  %v7744_v4 = vld [vmem:[#allocation8 + $0x244] ss:$16 sps:$4 sm:$0xff]   ;;  %v7747_v45 = vld [vmem:[#allocation8 + $0x24c] ss:$16 sps:$4 sm:$0xff]  }
0x14fc   :  { %v4032_v40 = vmul.f32 %v5631_v57, %v7617_v24  ;;  %v5633_v54 = vpop.eup %5632  ;;  %v7750_v57 = vld [vmem:[#allocation8 + $0x240] ss:$16 sps:$4 sm:$0xff]  }
0x14fe   :  { %v7667_v34 = vadd.f32 %v4033_v50, %v4032_v40  ;;  %v7753_v50 = vld [vmem:[#allocation8 + $0x248] ss:$16 sps:$4 sm:$0xff]   ;;  %v7759_v40 = vld [vmem:[#allocation8 + $0x26c] ss:$16 sps:$4 sm:$0xff]  }
0x1500   :  { %5634 = vtanh.f32 %v7667_v34 }
0x150a   :  { %v5635_v41 = vpop.eup %5634 }
0x150b   :  { %v7670_v59 = vmul.f32 %v5635_v41, %v5633_v54  ;;  %v7765_v54 = vld [vmem:[#allocation8 + $0x268] ss:$16 sps:$4 sm:$0xff]   ;;  %v7768_v41 = vld [vmem:[#allocation8 + $0x284] ss:$16 sps:$4 sm:$0xff]  }
0x150d   :  { %v4038_v13 = vpack.c.bf16 %v7670_v59, %v7670_v59 }
0x150f   :  { %4072 = vmatmul.mubr.bf16.vlgmr.msra.gmra.mrb[112].mxu0 %v4038_v13  ;;  %4113 = vmatmul.mubr.bf16.vlgmr.msra.gmra.mrb[144].mxu1 %v4038_v13  ;;  %v7771_v13 = vld [vmem:[#allocation8 + $0x28c] ss:$16 sps:$4 sm:$0xff]  }
0x1510   :  { %4152 = vmatpush1.bf16.msra.mxu0 %v7291_v15  ;;  %4193 = vmatpush1.bf16.msra.mxu1 %v7293_v22  ;;  %v8096_v15 = vld [vmem:[#allocation26_spill] sm:$0xff] }
0x1511   :  { %4153 = vmatprep.subr.bf16.mxu0 %v7299_v12  ;;  %4194 = vmatprep.subr.bf16.mxu1 %v7301_v44  ;;  %v3340_v22 = vadd.f32 %v8096_v15, %v7494_v46  ;;  %v8097_v12 = vld [vmem:[#allocation37_spill] sm:$0xff] }
0x1512   :  { %4183 = vmatprep.mubr.bf16.mxu0 %v7994_v37  ;;  %4224 = vmatprep.mubr.bf16.mxu1 %v7994_v37  ;;  %v3413_v44 = vadd.f32 %v8097_v12, %v7497_v62  ;;  %v7774_v15 = vld [vmem:[#allocation8 + $0x280] ss:$16 sps:$4 sm:$0xff]   ;;  %v7780_v12 = vld [vmem:[#allocation8 + $0x2a4] ss:$16 sps:$4 sm:$0xff]  }
0x1514   :  { %4154 = vmatpush1.bf16.msra.mxu0 %v7303_v60  ;;  %4195 = vmatpush1.bf16.msra.mxu1 %v7305_v63  ;;  %v8098_v60 = vld [vmem:[#allocation27_spill] sm:$0xff] }
0x1515   :  { %4155 = vmatprep.subr.bf16.mxu0 %v7311_v21  ;;  %4196 = vmatprep.subr.bf16.mxu1 %v7313_v1  ;;  %v3342_v63 = vadd.f32 %v8098_v60, %v7504_v39  ;;  %v8099_v21 = vld [vmem:[#allocation38_spill] sm:$0xff]  ;;  %v7786_v60 = vld [vmem:[#allocation8 + $0x2a0] ss:$16 sps:$4 sm:$0xff]  }
0x1516   :  { %v3415_v1 = vadd.f32 %v8099_v21, %v7507_v49  ;;  %v7792_v21 = vld [vmem:[#allocation8 + $0x2c4] ss:$16 sps:$4 sm:$0xff]  }
0x1518   :  { %4156 = vmatpush1.bf16.msra.mxu0 %v7315_v2  ;;  %4197 = vmatpush1.bf16.msra.mxu1 %v7317_v5 }
0x1519   :  { %4157 = vmatprep.subr.bf16.mxu0 %v7323_v6  ;;  %4198 = vmatprep.subr.bf16.mxu1 %v7325_v9 }
0x151c   :  { %4158 = vmatpush1.bf16.msra.mxu0 %v7327_v10  ;;  %4199 = vmatpush1.bf16.msra.mxu1 %v7329_v56 }
0x151d   :  { %4159 = vmatprep.subr.bf16.mxu0 %v7335_v52  ;;  %4200 = vmatprep.subr.bf16.mxu1 %v7337_v30 }
0x1520   :  { %4160 = vmatpush1.bf16.msra.mxu0 %v7339_v26  ;;  %4201 = vmatpush1.bf16.msra.mxu1 %v7341_v33 }
0x1521   :  { %4161 = vmatprep.subr.bf16.mxu0 %v7347_v18  ;;  %4202 = vmatprep.subr.bf16.mxu1 %v7349_v47 }
0x1524   :  { %4162 = vmatpush1.bf16.msra.mxu0 %v7351_v42  ;;  %4203 = vmatpush1.bf16.msra.mxu1 %v7353_v36 }
0x1525   :  { %4163 = vmatprep.subr.bf16.mxu0 %v7359_v0  ;;  %4204 = vmatprep.subr.bf16.mxu1 %v7361_v19 }
0x1528   :  { %4164 = vmatpush1.bf16.msra.mxu0 %v7363_v32  ;;  %4205 = vmatpush1.bf16.msra.mxu1 %v7365_v38 }
0x1529   :  { %4165 = vmatprep.subr.bf16.mxu0 %v7371_v20  ;;  %4206 = vmatprep.subr.bf16.mxu1 %v7373_v43 }
0x152c   :  { %4166 = vmatpush1.bf16.msra.mxu0 %v7375_v51  ;;  %4207 = vmatpush1.bf16.msra.mxu1 %v7377_v23 }
0x152d   :  { %4263 = vmatprep.subr.bf16.mxu0 %v7287_v16  ;;  %4304 = vmatprep.subr.bf16.mxu1 %v7289_v14 }
0x15e2   :  { %v4073_v2 = vpop.f32.mrb[112].mxu0  ;;  %v4114_v5 = vpop.f32.mrb[144].mxu1 }
0x15e3   :  { %v4121_v6 = vadd.f32 %v4073_v2, %v3340_v22  ;;  %v4123_v9 = vadd.f32 %v4114_v5, %v3413_v44  ;;  %v4075_v10 = vpop.f32.mrb[113].mxu0  ;;  %v4116_v16 = vpop.f32.mrb[145].mxu1  ;;  %v7777_v22 = vld [vmem:[#allocation8 + $0x288] ss:$16 sps:$4 sm:$0xff]   ;;  %v7783_v44 = vld [vmem:[#allocation8 + $0x2ac] ss:$16 sps:$4 sm:$0xff]  }
0x15e4   :  { %v4122_v56 = vadd.f32 %v4075_v10, %v3342_v63  ;;  %v4124_v14 = vadd.f32 %v4116_v16, %v3415_v1  ;;  %v4077_v52 = vpop.f32.mrb[114].mxu0  ;;  %v4118_v30 = vpop.f32.mrb[146].mxu1  ;;  %v7789_v63 = vld [vmem:[#allocation8 + $0x2a8] ss:$16 sps:$4 sm:$0xff]   ;;  %v7795_v1 = vld [vmem:[#allocation8 + $0x2cc] ss:$16 sps:$4 sm:$0xff]  }
0x15e5   :  { %v4948_v26 = vmul.f32 -1.442695, %v4121_v6  ;;  %v4078_v33 = vpop.f32.mrb[115].mxu0  ;;  %v4119_v18 = vpop.f32.mrb[147].mxu1  ;;  %v7798_v2 = vld [vmem:[#allocation8 + $0x2c0] ss:$16 sps:$4 sm:$0xff]  }
0x15e6   :  { %v4949_v47 = vmul.f32 -1.442695, %v4122_v56  ;;  %v4950_v42 = vmul.f32 -1.442695, %v4124_v14  ;;  %v7801_v5 = vld [vmem:[#allocation8 + $0x2c8] ss:$16 sps:$4 sm:$0xff]  }
0x15e7   :  { %5636 = vpow2.f32 %v4948_v26  ;;  %v7804_v6 = vld [vmem:[#allocation8 + $0x2e4] ss:$16 sps:$4 sm:$0xff]   ;;  %v7810_v10 = vld [vmem:[#allocation8 + $0x2e0] ss:$16 sps:$4 sm:$0xff]   ;;  %v7813_v16 = vld [vmem:[#allocation8 + $0x2e8] ss:$16 sps:$4 sm:$0xff]  }
0x15e8   :  { %5638 = vpow2.f32 %v4949_v47  ;;  %v5794_v56 = vld [vmem:[#allocation8 + $0x204] ss:$16 sps:$4 sm:$0xff]   ;;  %v5795_v14 = vld [vmem:[#allocation8 + $0x20c] ss:$16 sps:$4 sm:$0xff]  }
0x15e9   :  { %5640 = vpow2.f32 %v4950_v42  ;;  %v8100_v52 = vld [vmem:[#allocation28_spill] sm:$0xff]  ;;  %v8101_v26 = vld [vmem:[#allocation39_spill] sm:$0xff]  ;;  %v8102_v18 = vld [vmem:[#allocation29_spill] sm:$0xff] }
0x15ea   :  { %5642 = vtanh.f32 %v4123_v9  ;;  %v7807_v9 = vld [vmem:[#allocation8 + $0x2ec] ss:$16 sps:$4 sm:$0xff]   ;;  %v3344_v30 = vadd.f32 %v8100_v52, %v7494_v46  ;;  %v3417_v33 = vadd.f32 %v8101_v26, %v7497_v62  ;;  %v3346_v47 = vadd.f32 %v8102_v18, %v7504_v39  ;;  %v8103_v42 = vld [vmem:[#allocation40_spill] sm:$0xff] }
0x15f1   :  { %v5637_v36 = vpop.eup %5636 }
0x15f2   :  { %v5639_v0 = vpop.eup %5638  ;;  %v4128_v19 = vadd.f32 1.0, %v5637_v36  ;;  %v3419_v36 = vadd.f32 %v8103_v42, %v7507_v49 }
0x15f3   :  { %v4134_v32 = vadd.f32 1.0, %v5639_v0  ;;  %v5641_v38 = vpop.eup %5640 }
0x15f4   :  { %5644 = vrcp.f32 %v4128_v19  ;;  %v5643_v20 = vpop.eup %5642  ;;  %v4141_v24 = vadd.f32 1.0, %v5641_v38 }
0x15f5   :  { %5646 = vrcp.f32 %v4134_v32 }
0x15f6   :  { %5648 = vrcp.f32 %v4141_v24 }
0x15fe   :  { %v5645_v43 = vpop.eup %5644 }
0x15ff   :  { %v5647_v51 = vpop.eup %5646  ;;  %v4145_v23 = vmul.f32 %v5645_v43, %v5643_v20 }
0x1600   :  { %v4144_v48 = vmul.f32 %v5647_v51, %v7667_v34  ;;  %v5649_v8 = vpop.eup %5648  ;;  %v7762_v34 = vld [vmem:[#allocation8 + $0x260] ss:$16 sps:$4 sm:$0xff]  }
0x1602   :  { %v7717_v25 = vadd.f32 %v4145_v23, %v4144_v48 }
0x1604   :  { %5650 = vtanh.f32 %v7717_v25 }
0x160e   :  { %v5651_v29 = vpop.eup %5650 }
0x160f   :  { %v7720_v28 = vmul.f32 %v5651_v29, %v5649_v8 }
0x1611   :  { %v4150_v35 = vpack.c.bf16 %v7720_v28, %v7720_v28 }
0x1613   :  { %4184 = vmatmul.mubr.bf16.vlgmr.msra.gmra.mrb[116].mxu0 %v4150_v35  ;;  %4225 = vmatmul.mubr.bf16.vlgmr.msra.gmra.mrb[148].mxu1 %v4150_v35 }
0x1614   :  { %4264 = vmatpush1.bf16.msra.mxu0 %v7724_v55  ;;  %4305 = vmatpush1.bf16.msra.mxu1 %v7727_v58 }
0x1615   :  { %4265 = vmatprep.subr.bf16.mxu0 %v7730_v53  ;;  %4306 = vmatprep.subr.bf16.mxu1 %v7733_v3 }
0x1616   :  { %4295 = vmatprep.mubr.bf16.mxu0 %v7994_v37  ;;  %4336 = vmatprep.mubr.bf16.mxu1 %v7994_v37 }
0x1618   :  { %4266 = vmatpush1.bf16.msra.mxu0 %v7738_v61  ;;  %4307 = vmatpush1.bf16.msra.mxu1 %v7741_v17 }
0x1619   :  { %4267 = vmatprep.subr.bf16.mxu0 %v7744_v4  ;;  %4308 = vmatprep.subr.bf16.mxu1 %v7747_v45 }
0x161c   :  { %4268 = vmatpush1.bf16.msra.mxu0 %v7750_v57  ;;  %4309 = vmatpush1.bf16.msra.mxu1 %v7753_v50 }
0x161d   :  { %4269 = vmatprep.subr.bf16.mxu0 %v7756_v11  ;;  %4310 = vmatprep.subr.bf16.mxu1 %v7759_v40 }
0x1620   :  { %4270 = vmatpush1.bf16.msra.mxu0 %v7762_v34  ;;  %4311 = vmatpush1.bf16.msra.mxu1 %v7765_v54 }
0x1621   :  { %4271 = vmatprep.subr.bf16.mxu0 %v7768_v41  ;;  %4312 = vmatprep.subr.bf16.mxu1 %v7771_v13 }
0x1624   :  { %4272 = vmatpush1.bf16.msra.mxu0 %v7774_v15  ;;  %4313 = vmatpush1.bf16.msra.mxu1 %v7777_v22 }
0x1625   :  { %4273 = vmatprep.subr.bf16.mxu0 %v7780_v12  ;;  %4314 = vmatprep.subr.bf16.mxu1 %v7783_v44 }
0x1628   :  { %4274 = vmatpush1.bf16.msra.mxu0 %v7786_v60  ;;  %4315 = vmatpush1.bf16.msra.mxu1 %v7789_v63 }
0x1629   :  { %4275 = vmatprep.subr.bf16.mxu0 %v7792_v21  ;;  %4316 = vmatprep.subr.bf16.mxu1 %v7795_v1 }
0x162c   :  { %4276 = vmatpush1.bf16.msra.mxu0 %v7798_v2  ;;  %4317 = vmatpush1.bf16.msra.mxu1 %v7801_v5 }
0x162d   :  { %4277 = vmatprep.subr.bf16.mxu0 %v7804_v6  ;;  %4318 = vmatprep.subr.bf16.mxu1 %v7807_v9 }
0x1630   :  { %4278 = vmatpush1.bf16.msra.mxu0 %v7810_v10  ;;  %4319 = vmatpush1.bf16.msra.mxu1 %v7813_v16 }
0x1631   :  { %4375 = vmatprep.subr.bf16.mxu0 %v5794_v56  ;;  %4416 = vmatprep.subr.bf16.mxu1 %v5795_v14 }
0x16e6   :  { %v4185_v0 = vpop.f32.mrb[116].mxu0  ;;  %v4226_v19 = vpop.f32.mrb[148].mxu1 }
0x16e7   :  { %v4233_v32 = vadd.f32 %v4185_v0, %v3344_v30  ;;  %v4235_v38 = vadd.f32 %v4226_v19, %v3417_v33  ;;  %v4187_v20 = vpop.f32.mrb[117].mxu0  ;;  %v4228_v43 = vpop.f32.mrb[149].mxu1 }
0x16e8   :  { %v4234_v51 = vadd.f32 %v4187_v20, %v3346_v47  ;;  %v4236_v23 = vadd.f32 %v4228_v43, %v3419_v36  ;;  %v4189_v24 = vpop.f32.mrb[118].mxu0  ;;  %v4230_v48 = vpop.f32.mrb[150].mxu1 }
0x16e9   :  { %v4951_v8 = vmul.f32 -1.442695, %v4233_v32  ;;  %v4190_v29 = vpop.f32.mrb[119].mxu0  ;;  %v4231_v35 = vpop.f32.mrb[151].mxu1 }
0x16ea   :  { %v4952_v56 = vmul.f32 -1.442695, %v4234_v51  ;;  %v4953_v14 = vmul.f32 -1.442695, %v4236_v23 }
0x16eb   :  { %5652 = vpow2.f32 %v4951_v8 }
0x16ec   :  { %5654 = vpow2.f32 %v4952_v56 }
0x16ed   :  { %5656 = vpow2.f32 %v4953_v14 }
0x16ee   :  { %5658 = vtanh.f32 %v4235_v38 }
0x16f5   :  { %v5653_v52 = vpop.eup %5652 }
0x16f6   :  { %v5655_v26 = vpop.eup %5654  ;;  %v4240_v18 = vadd.f32 1.0, %v5653_v52 }
0x16f7   :  { %v4246_v30 = vadd.f32 1.0, %v5655_v26  ;;  %v5657_v33 = vpop.eup %5656  ;;  %v5309_v26 = vld [vmem:[#allocation11 + $0x8] sm:$0xff]  }
0x16f8   :  { %5660 = vrcp.f32 %v4240_v18  ;;  %v5659_v47 = vpop.eup %5658  ;;  %v4253_v19 = vadd.f32 1.0, %v5657_v33  ;;  %v4498_v18 = vpack.c.bf16 %v7570_v31, %v7520_v7  ;;  %v5311_v33 = vld [vmem:[#allocation11 + $0x18] sm:$0xff]   ;;  %v4499_v31 = vpack.c.bf16 %v7670_v59, %v7620_v27 }
0x16f9   :  { %5662 = vrcp.f32 %v4246_v30  ;;  %v5310_v30 = vld [vmem:[#allocation11 + $0x10] sm:$0xff]   ;;  %v5315_v7 = vld [vmem:[#allocation11 + $0x38] sm:$0xff]  }
0x16fa   :  { %5664 = vrcp.f32 %v4253_v19  ;;  %v8108_v19 = vld [vmem:[#allocation44_spill] sm:$0xff] }
0x1702   :  { %v5661_v42 = vpop.eup %5660 }
0x1703   :  { %v5663_v36 = vpop.eup %5662  ;;  %v4257_v0 = vmul.f32 %v5661_v42, %v5659_v47  ;;  %v5312_v47 = vld [vmem:[#allocation11 + $0x20] sm:$0xff]   ;;  %v5313_v42 = vld [vmem:[#allocation11 + $0x28] sm:$0xff]  }
0x1704   :  { %v4256_v32 = vmul.f32 %v5663_v36, %v7717_v25  ;;  %v5665_v43 = vpop.eup %5664  ;;  %v8104_v25 = vld [vmem:[#allocation30_spill] sm:$0xff]  ;;  %v5314_v36 = vld [vmem:[#allocation11 + $0x30] sm:$0xff]  }
0x1706   :  { %v7825_v20 = vadd.f32 %v4257_v0, %v4256_v32  ;;  %v3354_v32 = vadd.f32 %v8108_v19, %v7494_v46 }
0x1708   :  { %5666 = vtanh.f32 %v7825_v20 }
0x1712   :  { %v5667_v51 = vpop.eup %5666 }
0x1713   :  { %v7828_v23 = vmul.f32 %v5667_v51, %v5665_v43  ;;  %v8110_v51 = vld [vmem:[#allocation46_spill] sm:$0xff] }
0x1715   :  { %v4262_v38 = vpack.c.bf16 %v7828_v23, %v7828_v23  ;;  %v4500_v0 = vpack.c.bf16 %v7828_v23, %v7720_v28 }
0x1717   :  { %4296 = vmatmul.mubr.bf16.vlgmr.msra.gmra.mrb[120].mxu0 %v4262_v38  ;;  %4337 = vmatmul.mubr.bf16.vlgmr.msra.gmra.mrb[152].mxu1 %v4262_v38  ;;  %v3356_v38 = vadd.f32 %v8110_v51, %v7504_v39 }
0x1718   :  { %4376 = vmatpush1.bf16.msra.mxu0 %v7724_v55  ;;  %4417 = vmatpush1.bf16.msra.mxu1 %v7727_v58  ;;  %v3350_v55 = vadd.f32 %v8104_v25, %v7494_v46  ;;  %v8105_v58 = vld [vmem:[#allocation41_spill] sm:$0xff] }
0x1719   :  { %4377 = vmatprep.subr.bf16.mxu0 %v7730_v53  ;;  %4418 = vmatprep.subr.bf16.mxu1 %v7733_v3  ;;  %v3423_v53 = vadd.f32 %v8105_v58, %v7497_v62  ;;  %v8106_v3 = vld [vmem:[#allocation42_spill] sm:$0xff] }
0x171a   :  { %4407 = vmatprep.mubr.bf16.mxu0 %v7994_v37  ;;  %4448 = vmatprep.mubr.bf16.mxu1 %v7994_v37  ;;  %v5308_v37 = vld [vmem:[#allocation11] sm:$0xff]  }
0x171c   :  { %4378 = vmatpush1.bf16.msra.mxu0 %v7738_v61  ;;  %4419 = vmatpush1.bf16.msra.mxu1 %v7741_v17  ;;  %v3352_v61 = vadd.f32 %v8106_v3, %v7504_v39  ;;  %v8107_v17 = vld [vmem:[#allocation43_spill] sm:$0xff] }
0x171d   :  { %4379 = vmatprep.subr.bf16.mxu0 %v7744_v4  ;;  %4420 = vmatprep.subr.bf16.mxu1 %v7747_v45  ;;  %v3425_v4 = vadd.f32 %v8107_v17, %v7507_v49 }
0x1720   :  { %4380 = vmatpush1.bf16.msra.mxu0 %v7750_v57  ;;  %4421 = vmatpush1.bf16.msra.mxu1 %v7753_v50 }
0x1721   :  { %4381 = vmatprep.subr.bf16.mxu0 %v7756_v11  ;;  %4422 = vmatprep.subr.bf16.mxu1 %v7759_v40 }
0x1724   :  { %4382 = vmatpush1.bf16.msra.mxu0 %v7762_v34  ;;  %4423 = vmatpush1.bf16.msra.mxu1 %v7765_v54 }
0x1725   :  { %4383 = vmatprep.subr.bf16.mxu0 %v7768_v41  ;;  %4424 = vmatprep.subr.bf16.mxu1 %v7771_v13 }
0x1728   :  { %4384 = vmatpush1.bf16.msra.mxu0 %v7774_v15  ;;  %4425 = vmatpush1.bf16.msra.mxu1 %v7777_v22 }
0x1729   :  { %4385 = vmatprep.subr.bf16.mxu0 %v7780_v12  ;;  %4426 = vmatprep.subr.bf16.mxu1 %v7783_v44 }
0x172c   :  { %4386 = vmatpush1.bf16.msra.mxu0 %v7786_v60  ;;  %4427 = vmatpush1.bf16.msra.mxu1 %v7789_v63 }
0x172d   :  { %4387 = vmatprep.subr.bf16.mxu0 %v7792_v21  ;;  %4428 = vmatprep.subr.bf16.mxu1 %v7795_v1 }
0x1730   :  { %4388 = vmatpush1.bf16.msra.mxu0 %v7798_v2  ;;  %4429 = vmatpush1.bf16.msra.mxu1 %v7801_v5 }
0x1731   :  { %4389 = vmatprep.subr.bf16.mxu0 %v7804_v6  ;;  %4430 = vmatprep.subr.bf16.mxu1 %v7807_v9 }
0x1734   :  { %4390 = vmatpush1.bf16.msra.mxu0 %v7810_v10  ;;  %4431 = vmatpush1.bf16.msra.mxu1 %v7813_v16 }
0x1735   :  { %4981 = vmatprep.subr.bf16.mxu0 %v5308_v37 }
0x17ea   :  { %v4297_v45 = vpop.f32.mrb[120].mxu0  ;;  %v4338_v57 = vpop.f32.mrb[152].mxu1 }
0x17eb   :  { %v4345_v50 = vadd.f32 %v4297_v45, %v3350_v55  ;;  %v4347_v11 = vadd.f32 %v4338_v57, %v3423_v53  ;;  %v4299_v40 = vpop.f32.mrb[121].mxu0  ;;  %v4340_v34 = vpop.f32.mrb[153].mxu1 }
0x17ec   :  { %v4346_v54 = vadd.f32 %v4299_v40, %v3352_v61  ;;  %v4348_v41 = vadd.f32 %v4340_v34, %v3425_v4  ;;  %v4301_v13 = vpop.f32.mrb[122].mxu0  ;;  %v4342_v15 = vpop.f32.mrb[154].mxu1 }
0x17ed   :  { %v4954_v22 = vmul.f32 -1.442695, %v4345_v50  ;;  %v4302_v12 = vpop.f32.mrb[123].mxu0  ;;  %v4343_v44 = vpop.f32.mrb[155].mxu1 }
0x17ee   :  { %v4955_v60 = vmul.f32 -1.442695, %v4346_v54  ;;  %v4956_v63 = vmul.f32 -1.442695, %v4348_v41  ;;  %v7898_v12 = vld [vmem:[%s7959_s5] ss:$0 sm:$0xff] }
0x17ef   :  { %5668 = vpow2.f32 %v4954_v22  ;;  %s5994_s5 = smov [#allocation13]  }
0x17f0   :  { %5670 = vpow2.f32 %v4955_v60  ;;  %s4663_s1 = sshll.u32 %s5994_s5, 4  ;;  %s4664_s1 = int_to_ptr.vmem [resolvable:$true] %s4663_s1 }
0x17f1   :  { %5672 = vpow2.f32 %v4956_v63  ;;  %s5906_s28 = scalar_lea.vmem %s4664_s1, 384  ;;  %p5911_p13 = scmp.lt.s32.totalorder %s4664_s1, %s4664_s1 }
0x17f2   :  { %5674 = vtanh.f32 %v4347_v11  ;;  %p5907_p12 = scmp.ne.s32.totalorder %s4664_s1, %s5906_s28  ;;  %p5912_p0 = scmp.lt.s32.totalorder %s5906_s28, %s5906_s28 }
0x17f4   :  { %p5913_p1 = por %p5912_p0, %p5911_p13 }
0x17f6   :  { %p5914_p2 = pnand %p5913_p1, %p5907_p12 }
0x17f9   :  { %v5669_v21 = vpop.eup %5668 }
0x17fa   :  { %v5671_v1 = vpop.eup %5670  ;;  %v4352_v2 = vadd.f32 1.0, %v5669_v21 }
0x17fb   :  { %v4358_v5 = vadd.f32 1.0, %v5671_v1  ;;  %v5673_v6 = vpop.eup %5672 }
0x17fc   :  { %5676 = vrcp.f32 %v4352_v2  ;;  %v5675_v9 = vpop.eup %5674  ;;  %v4365_v48 = vadd.f32 1.0, %v5673_v6 }
0x17fd   :  { %5678 = vrcp.f32 %v4358_v5 }
0x17fe   :  { %5680 = vrcp.f32 %v4365_v48 }
0x1806   :  { %v5677_v10 = vpop.eup %5676 }
0x1807   :  { %v5679_v16 = vpop.eup %5678  ;;  %v4369_v24 = vmul.f32 %v5677_v10, %v5675_v9 }
0x1808   :  { %v4368_v8 = vmul.f32 %v5679_v16, %v7825_v20  ;;  %v5681_v35 = vpop.eup %5680  ;;  %v8109_v20 = vld [vmem:[#allocation45_spill] sm:$0xff] }
0x1809   :  { %v3427_v43 = vadd.f32 %v8109_v20, %v7497_v62 }
0x180a   :  { %v7873_v29 = vadd.f32 %v4369_v24, %v4368_v8 }
0x180c   :  { %5682 = vtanh.f32 %v7873_v29 }
0x1816   :  { %v5683_v56 = vpop.eup %5682 }
0x1817   :  { %v7876_v14 = vmul.f32 %v5683_v56, %v5681_v35 }
0x1819   :  { %v4374_v52 = vpack.c.bf16 %v7876_v14, %v7876_v14 }
0x181b   :  { %4408 = vmatmul.mubr.bf16.vlgmr.msra.gmra.mrb[124].mxu0 %v4374_v52  ;;  %4449 = vmatmul.mubr.bf16.vlgmr.msra.gmra.mrb[156].mxu1 %v4374_v52 }
0x181c   :  { %4982 = vmatpush3.bf16.msra.mxu0 %v5308_v37  ;;  %4997 = vmatprep.mubr.bf16.mxu0 %v4498_v18  ;;  %v8111_v37 = vld [vmem:[#allocation47_spill] sm:$0xff] }
0x181d   :  { %4983 = vmatprep.subr.bf16.mxu0 %v5309_v26  ;;  %v3429_v25 = vadd.f32 %v8111_v37, %v7507_v49 }
0x1820   :  { %4984 = vmatpush3.bf16.msra.mxu0 %v5309_v26 }
0x1821   :  { %4985 = vmatprep.subr.bf16.mxu0 %v5310_v30 }
0x1824   :  { %4986 = vmatpush3.bf16.msra.mxu0 %v5310_v30 }
0x1825   :  { %4987 = vmatprep.subr.bf16.mxu0 %v5311_v33 }
0x1828   :  { %4988 = vmatpush3.bf16.msra.mxu0 %v5311_v33 }
0x1829   :  { %4989 = vmatprep.subr.bf16.mxu0 %v5312_v47 }
0x182c   :  { %4990 = vmatpush3.bf16.msra.mxu0 %v5312_v47 }
0x182d   :  { %4991 = vmatprep.subr.bf16.mxu0 %v5313_v42 }
0x1830   :  { %4992 = vmatpush3.bf16.msra.mxu0 %v5313_v42 }
0x1831   :  { %4993 = vmatprep.subr.bf16.mxu0 %v5314_v36 }
0x1834   :  { %4994 = vmatpush3.bf16.msra.mxu0 %v5314_v36 }
0x1835   :  { %4995 = vmatprep.subr.bf16.mxu0 %v5315_v7 }
0x1838   :  { %4996 = vmatpush3.bf16.msra.mxu0 %v5315_v7 }
0x183b   :  { %4998 = vmatmul.mubr.bf16.vlgmr.msra.gmra.mrb[128].mxu0 %v4499_v31 }
0x183c   :  { %5001 = vmatprep.mubr.bf16.mxu0 %v4500_v0 }
0x18ee   :  { %v4409_v55 = vpop.f32.mrb[124].mxu0  ;;  %v4450_v58 = vpop.f32.mrb[156].mxu1 }
0x18ef   :  { %v4457_v27 = vadd.f32 %v4409_v55, %v3354_v32  ;;  %v4459_v59 = vadd.f32 %v4450_v58, %v3427_v43  ;;  %v4411_v53 = vpop.f32.mrb[125].mxu0  ;;  %v4452_v28 = vpop.f32.mrb[157].mxu1 }
0x18f0   :  { %v4458_v23 = vadd.f32 %v4411_v53, %v3356_v38  ;;  %v4460_v3 = vadd.f32 %v4452_v28, %v3429_v25  ;;  %v4413_v61 = vpop.f32.mrb[126].mxu0  ;;  %v4454_v17 = vpop.f32.mrb[158].mxu1 }
0x18f1   :  { %v4957_v46 = vmul.f32 -1.442695, %v4457_v27  ;;  %v4414_v4 = vpop.f32.mrb[127].mxu0  ;;  %v4455_v45 = vpop.f32.mrb[159].mxu1 }
0x18f2   :  { %v4958_v62 = vmul.f32 -1.442695, %v4458_v23  ;;  %v4959_v39 = vmul.f32 -1.442695, %v4460_v3 }
0x18f3   :  { %5684 = vpow2.f32 %v4957_v46 }
0x18f4   :  { %5686 = vpow2.f32 %v4958_v62 }
0x18f5   :  { %5688 = vpow2.f32 %v4959_v39 }
0x18f6   :  { %5690 = vtanh.f32 %v4459_v59 }
0x18fd   :  { %v5685_v57 = vpop.eup %5684 }
0x18fe   :  { %v5687_v50 = vpop.eup %5686  ;;  %v4464_v49 = vadd.f32 1.0, %v5685_v57 }
0x18ff   :  { %v4470_v11 = vadd.f32 1.0, %v5687_v50  ;;  %v5689_v40 = vpop.eup %5688 }
0x1900   :  { %5692 = vrcp.f32 %v4464_v49  ;;  %v5691_v34 = vpop.eup %5690  ;;  %v4477_v15 = vadd.f32 1.0, %v5689_v40 }
0x1901   :  { %5694 = vrcp.f32 %v4470_v11 }
0x1902   :  { %5696 = vrcp.f32 %v4477_v15 }
0x190a   :  { %v5693_v54 = vpop.eup %5692 }
0x190b   :  { %v5695_v41 = vpop.eup %5694  ;;  %v4481_v13 = vmul.f32 %v5693_v54, %v5691_v34 }
0x190c   :  { %v4480_v22 = vmul.f32 %v5695_v41, %v7873_v29  ;;  %v5697_v10 = vpop.eup %5696 }
0x190e   :  { %v4482_v44 = vadd.f32 %v4481_v13, %v4480_v22  ;;  %v4999_v60 = vpop.f32.mrb[128].mxu0 }
0x190f   :  { %v4616_v63 = vadd.f32 %v4999_v60, %v7898_v12  ;;  %v4607_v21 = vpop.f32.mrb[129].mxu0 }
0x1910   :  { %4489 = vst [vmem:[#allocation15 + $0x10] sm:$0xff] %v4482_v44  ;;  %v4608_v1 = vadd.f32 %v7898_v12, %v4607_v21  ;;  %v5000_v2 = vpop.f32.mrb[130].mxu0  ;;  %5698 = vtanh.f32 %v4482_v44 }
0x1911   :  { %4640 = vst [vmem:[#allocation12 + $0x10] sm:$0xff] %v4616_v63  ;;  %v4619_v5 = vadd.f32 %v5000_v2, %v7898_v12  ;;  %v4610_v6 = vpop.f32.mrb[131].mxu0 }
0x1912   :  { %4638 = vst [vmem:[#allocation12] sm:$0xff] %v4608_v1  ;;  %v4611_v9 = vadd.f32 %v7898_v12, %v4610_v6 }
0x1913   :  { %4641 = vst [vmem:[#allocation12 + $0x18] sm:$0xff] %v4619_v5 }
0x1914   :  { %4639 = vst [vmem:[#allocation12 + $0x8] sm:$0xff] %v4611_v9 }
0x191a   :  { %v5699_v16 = vpop.eup %5698 }
0x191b   :  { %v4484_v24 = vmul.f32 %v5699_v16, %v5697_v10 }
0x191d   :  { %v4501_v48 = vpack.c.bf16 %v4484_v24, %v7876_v14  ;;  %4487 = vst [vmem:[#allocation13 + $0x10] sm:$0xff] %v4484_v24 }
0x191f   :  { %5002 = vmatmul.mubr.bf16.gmra.mrb[132].mxu0 %v4501_v48 }
0x1920   :  { %5917 = shalt.err (!%p5914_p2)
}
0x1921   :  { %s5918_s9 = scalar_lea.hbm %s7961_s7, 384 }
0x1922   :  { %p5919_p3 = scmp.ne.s32.totalorder %s7961_s7, %s5918_s9  ;;  %p5922_p4 = scmp.lt.u32.totalorder %s5918_s9, %s7961_s7 }
0x1924   :  { %p5924_p5 = pnand %p5922_p4, %p5919_p3 }
0x1926   :  { %5927 = shalt.err (!%p5924_p5)
}
0x1927   :  { %4669 = dma.vmem_to_hbm [thread:$0]  %s4664_s1, 384, %s7961_s7, [#allocation14], %s5989_s3, %s5989_s3, %s5990_s20  }
0x1928   :  { %s5995_s11 = smov [#allocation15]  }
0x1929   :  { %s4675_s18 = sshll.u32 %s5995_s11, 4  ;;  %s4676_s18 = int_to_ptr.vmem [resolvable:$true] %s4675_s18 }
0x192a   :  { %s5928_s19 = scalar_lea.vmem %s4676_s18, 384  ;;  %p5933_p7 = scmp.lt.s32.totalorder %s4676_s18, %s4676_s18 }
0x192b   :  { %p5929_p6 = scmp.ne.s32.totalorder %s4676_s18, %s5928_s19  ;;  %p5934_p8 = scmp.lt.s32.totalorder %s5928_s19, %s5928_s19 }
0x192d   :  { %p5935_p9 = por %p5934_p8, %p5933_p7 }
0x192f   :  { %p5936_p10 = pnand %p5935_p9, %p5929_p6 }
0x1931   :  { %5939 = shalt.err (!%p5936_p10)
}
0x1932   :  { %s5940_s23 = scalar_lea.hbm %s7962_s8, 384 }
0x1933   :  { %p5941_p11 = scmp.ne.s32.totalorder %s7962_s8, %s5940_s23  ;;  %p5944_p12 = scmp.lt.u32.totalorder %s5940_s23, %s7962_s8 }
0x1935   :  { %p5946_p13 = pnand %p5944_p12, %p5941_p11 }
0x1937   :  { %5949 = shalt.err (!%p5946_p13)
}
0x1938   :  { %4681 = dma.vmem_to_hbm [thread:$0]  %s4676_s18, 384, %s7962_s8, [#allocation14], %s5989_s3, %s5989_s3, %s5990_s20  }
0x1939   :  { %s5996_s15 = smov [#allocation12]  }
0x193a   :  { %s4651_s4 = sshll.u32 %s5996_s15, 4  ;;  %s4652_s4 = int_to_ptr.vmem [resolvable:$true] %s4651_s4 }
0x193b   :  { %s5950_s8 = scalar_lea.vmem %s4652_s4, 1024  ;;  %p5955_p1 = scmp.lt.s32.totalorder %s4652_s4, %s4652_s4 }
0x193c   :  { %p5951_p0 = scmp.ne.s32.totalorder %s4652_s4, %s5950_s8  ;;  %p5956_p2 = scmp.lt.s32.totalorder %s5950_s8, %s5950_s8 }
0x193e   :  { %p5957_p3 = por %p5956_p2, %p5955_p1 }
0x1940   :  { %p5958_p4 = pnand %p5957_p3, %p5951_p0 }
0x19f2   :  { %v5003_v8 = vpop.f32.mrb[132].mxu0 }
0x19f3   :  { %v4632_v29 = vadd.f32 %v5003_v8, %v7898_v12  ;;  %v4623_v35 = vpop.f32.mrb[133].mxu0 }
0x19f4   :  { %v4624_v56 = vadd.f32 %v7898_v12, %v4623_v35  ;;  %v5004_v14 = vpop.f32.mrb[134].mxu0 }
0x19f5   :  { %4644 = vst [vmem:[#allocation12 + $0x30] sm:$0xff] %v4632_v29  ;;  %v4635_v52 = vadd.f32 %v5004_v14, %v7898_v12  ;;  %v4626_v26 = vpop.f32.mrb[135].mxu0 }
0x19f6   :  { %4642 = vst [vmem:[#allocation12 + $0x20] sm:$0xff] %v4624_v56  ;;  %v4627_v18 = vadd.f32 %v7898_v12, %v4626_v26 }
0x19f7   :  { %4645 = vst [vmem:[#allocation12 + $0x38] sm:$0xff] %v4635_v52 }
0x19f8   :  { %4643 = vst [vmem:[#allocation12 + $0x28] sm:$0xff] %v4627_v18 }
0x19f9   :  { %5961 = shalt.err (!%p5958_p4)
}
0x19fa   :  { %s5962_s1 = scalar_lea.hbm %s7960_s6, 1024 }
0x19fb   :  { %p5963_p5 = scmp.ne.s32.totalorder %s7960_s6, %s5962_s1  ;;  %p5966_p6 = scmp.lt.u32.totalorder %s5962_s1, %s7960_s6 }
0x19fd   :  { %p5968_p7 = pnand %p5966_p6, %p5963_p5 }
0x19ff   :  { %5971 = shalt.err (!%p5968_p7)
}
0x1a00   :  { %4657 = dma.vmem_to_hbm [thread:$0]  %s4652_s4, 1024, %s7960_s6, [#allocation5], %s5989_s3, %s5989_s3, %s5990_s20  }
0x1a01   :  { %5978 = dma.done.wait [#allocation5], 1024  }
0x1a02   :  { %5979 = vsyncadd [#allocation5], 4294966272 }
0x1a03   :  { %5980 = dma.done.wait [#allocation14], 768  }
0x1a04   :  { %5981 = vsyncadd [#allocation14], 4294966528 }
0x1a05   :  { %4691 = vsyncpa [#allocation4], 1 }
0x1a06   :  { %4692 = vsyncpa [#allocation7], 1 }
0x1a07   :  { %4693 = vsyncpa [#allocation10], 1 }
0x1a08   :  { %4694 = vsyncpa [#allocation5], 1 }
0x1a09   :  { %4695 = vsyncpa [#allocation14], 1 }

</bundles_post_ra>
